<compile_context>
chip_gen: v7x
topology: tpu7x:2x2x1
jax: 0.10.0
libtpu: 0.0.40
codegen_flags: <defaults>
</compile_context>

<pallas_src>
import math
import numpy as np
import jax
import jax.numpy as jnp
from jax import lax
from jax.experimental import pallas as pl
from jax.experimental.pallas import tpu as pltpu  # noqa: F401  (kept for TPU-specific tuning hooks)

# ---------------- small deterministic config (scaled-down KendrickConfig) ----------------
B, S, D = 2, 8, 32              # batch, seq_len, d_model
BS = B * S
NUM_HEADS = 4
HEAD_DIM = D // NUM_HEADS       # used only for the attention scale (as in the torch code)
Q_LORA = 16
QK_NOPE = 8
QK_ROPE = 4
Q_HEAD_DIM = QK_NOPE + QK_ROPE
KV_LORA = 16
V_HEAD = 8
# ALL_MOE
MOE_HEADS = 2
K_DIM = 16
N_KEYS = 64                     # num_experts
KNN = 4
EXPERT_DIM = 1
N_SHARED = 8
MULTIPLE_OF = 4
HID_ACT = MULTIPLE_OF * D       # hidden dim of the knn-wise SwiGLU "activation"
SHARED_HID = EXPERT_DIM * N_SHARED
EPS = 1e-5                      # RMSNorm eps
BN_EPS = 1e-5                   # BatchNorm1d eps
SCALE = 1.0 / math.sqrt(HEAD_DIM)
NEG_BIG = -1e30                 # used to knock out already-selected top-k entries
NEG_MASK = -1e9                 # causal / cross-batch additive mask value

# NOTE: all dropouts (attn/res/SwiGLU/input) are implemented in eval mode (identity).
# TODO(synk): training-mode BatchNorm1d (batch statistics) is not implemented; eval
#             semantics with running stats are used.


# ---------------- helpers used inside the kernel ----------------
def _rms(x, w, eps=EPS):
    ms = jnp.mean(x * x, axis=-1, keepdims=True)
    return x * lax.rsqrt(ms + eps) * w


def _mm(a, b):
    return jnp.dot(a, b, preferred_element_type=jnp.float32)


def _dot_t(a, b):
    # a @ b.T (contract last dims of both) without materializing a transpose
    return lax.dot_general(a, b, (((1,), (1,)), ((), ())),
                           preferred_element_type=jnp.float32)


def _softmax_rows(s):
    m = jnp.max(s, axis=-1, keepdims=True)
    p = jnp.exp(s - m)
    # approx reciprocal lowers to the (otherwise idle) EUP slot; ~1e-3-level rel. diff
    # vs exact division — swap to `p / sum` if bit-level parity with torch is required.
    return p * pl.reciprocal(jnp.sum(p, axis=-1, keepdims=True), approx=True)


# ---------------- the single fused kernel ----------------
def fused_block_kernel(
        x_ref, mask_ref, cosb_ref, sinb_ref, cosw_ref, sinw_ref, rot_ref, rotb_ref,
        n1_ref, wqa_ref, qan_ref, wqb_ref, wkva_ref, kvan_ref, wkvb_ref, wo_ref,
        n2_ref, wqm_ref, bqm_ref, bns_ref, bnb_ref, keys_ref,
        wdn_ref, wup_ref, w1_ref, w3_ref, w2_ref, sw1_ref, sw3_ref, sw2_ref,
        out_ref):
    x = x_ref[...]                                  # (B*S, D)
    mask = mask_ref[...]                            # (B*S, B*S) causal + cross-batch mask

    # ---------------- attention: x = x + attn(norm1(x)) ----------------
    h1 = _rms(x, n1_ref[...])                       # norm1 (RMSNorm)

    qa = _rms(_mm(h1, wqa_ref[...]), qan_ref[...])  # q low-rank + RMSNorm
    q = _mm(qa, wqb_ref[...])                       # (B*S, 48) cols = [nope h0..h3 | pe h0..h3]

    ckv = _mm(h1, wkva_ref[...])                    # (B*S, KV_LORA + ROPE)
    c = _rms(ckv[:, :KV_LORA], kvan_ref[...])
    k_pe = ckv[:, KV_LORA:]                         # (B*S, ROPE)  (not layernormed, as in torch)
    kv = _mm(c, wkvb_ref[...])                      # (B*S, 64) cols = [k_nope h0..h3 | v h0..h3]

    # The torch code calls apply_rope(q_pe, k_pe, ...) whose (k, q) arg order swaps the
    # returned tensors: the *query* rope slice ends up being the roped k_pe (shared across
    # heads) and the *key* rope slice is the per-head roped q_pe.  Reproduced exactly.
    rk = k_pe * cosb_ref[...] + _mm(k_pe, rot_ref[...]) * sinb_ref[...]          # (B*S, ROPE)
    q_pe_all = q[:, NUM_HEADS * QK_NOPE:]                                        # (B*S, H*ROPE)
    rq_all = q_pe_all * cosw_ref[...] + _mm(q_pe_all, rotb_ref[...]) * sinw_ref[...]

    wo = wo_ref[...]                                # (H*V_HEAD, D)
    attn_out = jnp.zeros((BS, D), jnp.float32)
    for h in range(NUM_HEADS):                      # H=4, fully unrolled; all BS rows at once
        qn = q[:, h * QK_NOPE:(h + 1) * QK_NOPE]
        kn = kv[:, h * QK_NOPE:(h + 1) * QK_NOPE]
        vh = kv[:, NUM_HEADS * QK_NOPE + h * V_HEAD:NUM_HEADS * QK_NOPE + (h + 1) * V_HEAD]
        rqh = rq_all[:, h * QK_ROPE:(h + 1) * QK_ROPE]
        sc = (_dot_t(qn, kn) + _dot_t(rk, rqh)) * SCALE + mask      # (B*S, B*S)
        p = _softmax_rows(sc)                        # cross-batch cols masked to ~0
        attn_out = attn_out + _mm(_mm(p, vh), wo[h * V_HEAD:(h + 1) * V_HEAD, :])

    x1 = x + attn_out                               # attention residual stream

    # ---------------- ALL_MOE: x = x + ff(norm2(x)) ----------------
    h2 = _rms(x1, n2_ref[...])                      # norm2 (== "identity" input to ALL_MOE)

    # gating: query_proj Linear + (folded, eval-mode) BatchNorm1d, then per-head key scores
    qm = _mm(h2, wqm_ref[...]) + bqm_ref[...]
    qbn = qm * bns_ref[...] + bnb_ref[...]
    scores = _mm(qbn, keys_ref[...])                # (B*S, MOE_HEADS*N_KEYS) = (16, 128)

    iota_f = lax.broadcasted_iota(jnp.int32, (BS, N_KEYS), 1).astype(jnp.float32)
    basis = [(lax.broadcasted_iota(jnp.int32, (1, KNN), 1) == k).astype(jnp.float32)
             for k in range(KNN)]
    wdn_row = wdn_ref[...]                          # (1, N_KEYS) expert_dim == 1 tables
    wup_row = wup_ref[...]

    # einsum('btd,bthkd->bthk', x, w_down) with expert_dim==1 reduces to sum_d(x) * w_down
    xsum = jnp.sum(h2, axis=-1, keepdims=True)      # (B*S, 1)
    acc = jnp.zeros((BS, 1), jnp.float32)
    for hh in range(MOE_HEADS):
        sc_h = scores[:, hh * N_KEYS:(hh + 1) * N_KEYS]       # (B*S, N_KEYS)
        top_s = jnp.zeros((BS, KNN), jnp.float32)
        wdn_h = jnp.zeros((BS, KNN), jnp.float32)
        wup_h = jnp.zeros((BS, KNN), jnp.float32)
        # in-kernel top-k: iterative masked argmax + one-hot gather of the 64x1 tables
        for k in range(KNN):
            m = jnp.max(sc_h, axis=-1, keepdims=True)
            first = jnp.min(jnp.where(sc_h >= m, iota_f, float(N_KEYS)),
                            axis=-1, keepdims=True)
            sel = iota_f == first                    # exactly one True per row
            onehot = sel.astype(jnp.float32)
            top_s = top_s + m * basis[k]
            wdn_h = wdn_h + jnp.sum(onehot * wdn_row, axis=-1, keepdims=True) * basis[k]
            wup_h = wup_h + jnp.sum(onehot * wup_row, axis=-1, keepdims=True) * basis[k]
            sc_h = jnp.where(sel, NEG_BIG, sc_h)

        mid = xsum * wdn_h                          # (B*S, KNN)
        u = _mm(mid, w1_ref[...])
        g = (u * jax.nn.sigmoid(u)) * _mm(mid, w3_ref[...])
        a = _mm(g, w2_ref[...])                     # SwiGLU over knn axis -> (B*S, KNN)
        p = _softmax_rows(top_s)                    # softmax of the top-k scores
        # einsum('bthk,bthkd->btd', ., w_up) with expert_dim==1 -> (B*S, 1)
        acc = acc + jnp.sum(a * p * wup_h, axis=-1, keepdims=True)

    # shared experts SwiGLU applied to the normed input
    u = _mm(h2, sw1_ref[...])
    shared = _mm((u * jax.nn.sigmoid(u)) * _mm(h2, sw3_ref[...]), sw2_ref[...])

    out_ref[...] = x1 + acc + shared                # MoE output + residual (acc broadcasts over D)


# ---------------- host-side static column permutations (free, done once under jit) ----------------
_Q_PERM = np.array(
    [h * Q_HEAD_DIM + d for h in range(NUM_HEADS) for d in range(QK_NOPE)]
    + [h * Q_HEAD_DIM + QK_NOPE + r for h in range(NUM_HEADS) for r in range(QK_ROPE)],
    dtype=np.int32)
_KV_PERM = np.array(
    [h * (QK_NOPE + V_HEAD) + d for h in range(NUM_HEADS) for d in range(QK_NOPE)]
    + [h * (QK_NOPE + V_HEAD) + QK_NOPE + v for h in range(NUM_HEADS) for v in range(V_HEAD)],
    dtype=np.int32)


@jax.jit
def block_forward(x, mask, cos_full, sin_full, rot, params):
    # tiny XLA-side prep (weight permutations / block-diagonals / folded BN); all constant-sized
    wqb_perm = params["wqb"][:, _Q_PERM]
    wkvb_perm = params["wkvb"][:, _KV_PERM]
    rot_blk = jnp.kron(jnp.eye(NUM_HEADS, dtype=jnp.float32), rot)      # (H*ROPE, H*ROPE)
    cos_bs = jnp.tile(cos_full, (B, 1))                                  # (B*S, ROPE)
    sin_bs = jnp.tile(sin_full, (B, 1))
    cos_wide = jnp.tile(cos_full, (B, NUM_HEADS))                        # (B*S, H*ROPE)
    sin_wide = jnp.tile(sin_full, (B, NUM_HEADS))
    # full (B*S, B*S) additive mask: causal within each batch, -1e9 across batches
    eyeB = jnp.eye(B, dtype=jnp.float32)
    mask_full = (jnp.kron(eyeB, mask)
                 + jnp.kron(1.0 - eyeB, jnp.full((S, S), NEG_MASK, jnp.float32)))
    # eval-mode BatchNorm1d folded to scale/shift
    bn_scale = params["bn_gamma"] * lax.rsqrt(params["bn_var"] + BN_EPS)
    bn_shift = params["bn_beta"] - params["bn_mean"] * bn_scale
    # per-head key matrices as one block-diagonal (heads*k_dim, heads*n_keys) matrix
    kT = jnp.transpose(params["keys"], (0, 2, 1))                        # (MOE_HEADS, K_DIM, N_KEYS)
    rows = []
    for h in range(MOE_HEADS):
        row = [kT[h] if j == h else jnp.zeros((K_DIM, N_KEYS), jnp.float32)
               for j in range(MOE_HEADS)]
        rows.append(jnp.concatenate(row, axis=1))
    keys_bd = jnp.concatenate(rows, axis=0)                              # (32, 128)
    wdn_row = params["w_down_embed"].reshape(1, N_KEYS)                  # expert_dim == 1
    wup_row = params["w_up_embed"].reshape(1, N_KEYS)

    out2d = pl.pallas_call(
        fused_block_kernel,
        out_shape=jax.ShapeDtypeStruct((BS, D), jnp.float32),
        # no grid: single invocation, every (tiny) operand resident in VMEM
    )(
        x.reshape(BS, D), mask_full, cos_bs, sin_bs, cos_wide, sin_wide, rot, rot_blk,
        params["norm1_w"], params["wqa"], params["qa_norm_w"], wqb_perm,
        params["wkva"], params["kva_norm_w"], wkvb_perm, params["wo"],
        params["norm2_w"], params["wq_moe"], params["bq_moe"], bn_scale, bn_shift, keys_bd,
        wdn_row, wup_row,
        params["act_w1"], params["act_w3"], params["act_w2"],
        params["sh_w1"], params["sh_w3"], params["sh_w2"],
    )
    return out2d.reshape(B, S, D)


# ---------------- deterministic parameter / input construction ----------------
def get_uniform_keys(n_keys, dim, seed):
    rng = np.random.RandomState(seed)
    bound = 1.0 / math.sqrt(dim)
    return rng.uniform(-bound, bound, (n_keys, dim)).astype(np.float32)


def init_params(key):
    ks = jax.random.split(key, 16)

    def lin(k, fan_in, fan_out):
        bound = 1.0 / math.sqrt(fan_in)
        return jax.random.uniform(k, (fan_in, fan_out), jnp.float32, -bound, bound)

    keys_np = np.stack([get_uniform_keys(N_KEYS, K_DIM, seed=2 * i) for i in range(MOE_HEADS)])
    return dict(
        norm1_w=jnp.ones((1, D), jnp.float32),
        wqa=lin(ks[0], D, Q_LORA),
        qa_norm_w=jnp.ones((1, Q_LORA), jnp.float32),
        wqb=lin(ks[1], Q_LORA, NUM_HEADS * Q_HEAD_DIM),
        wkva=lin(ks[2], D, KV_LORA + QK_ROPE),
        kva_norm_w=jnp.ones((1, KV_LORA), jnp.float32),
        wkvb=lin(ks[3], KV_LORA, NUM_HEADS * (QK_NOPE + V_HEAD)),
        wo=lin(ks[4], NUM_HEADS * V_HEAD, D),
        norm2_w=jnp.ones((1, D), jnp.float32),
        wq_moe=lin(ks[5], D, MOE_HEADS * K_DIM),
        bq_moe=jax.random.uniform(ks[6], (1, MOE_HEADS * K_DIM), jnp.float32,
                                  -1.0 / math.sqrt(D), 1.0 / math.sqrt(D)),
        bn_gamma=jnp.ones((1, MOE_HEADS * K_DIM), jnp.float32),
        bn_beta=jnp.zeros((1, MOE_HEADS * K_DIM), jnp.float32),
        bn_mean=jnp.zeros((1, MOE_HEADS * K_DIM), jnp.float32),
        bn_var=jnp.ones((1, MOE_HEADS * K_DIM), jnp.float32),
        keys=jnp.asarray(keys_np),
        w_down_embed=jax.random.normal(ks[7], (N_KEYS, EXPERT_DIM), jnp.float32),
        w_up_embed=jax.random.normal(ks[8], (N_KEYS, EXPERT_DIM), jnp.float32),
        act_w1=lin(ks[9], KNN, HID_ACT),
        act_w3=lin(ks[10], KNN, HID_ACT),
        act_w2=lin(ks[11], HID_ACT, KNN),
        sh_w1=lin(ks[12], D, SHARED_HID),
        sh_w3=lin(ks[13], D, SHARED_HID),
        sh_w2=lin(ks[14], SHARED_HID, D),
    )


def make_rope(seq_len, rope_dim):
    half = rope_dim // 2
    freqs = 1.0 / (10000.0 ** (np.arange(0, rope_dim, 2)[:half].astype(np.float64) / rope_dim))
    ang = np.outer(np.arange(seq_len), freqs)            # (S, rope/2)
    cos_full = np.repeat(np.cos(ang), 2, axis=-1)        # interleaved (adjacent-pair) RoPE
    sin_full = np.repeat(np.sin(ang), 2, axis=-1)
    rot = np.zeros((rope_dim, rope_dim), np.float32)     # pair-rotation matrix: x @ rot
    for i in range(half):
        rot[2 * i, 2 * i + 1] = 1.0                      # +x[2i]   -> slot 2i+1
        rot[2 * i + 1, 2 * i] = -1.0                     # -x[2i+1] -> slot 2i
    return (jnp.asarray(cos_full, jnp.float32),
            jnp.asarray(sin_full, jnp.float32),
            jnp.asarray(rot, jnp.float32))


if __name__ == "__main__":
    root = jax.random.PRNGKey(0)
    kx, kp = jax.random.split(root)
    x = jax.random.normal(kx, (B, S, D), jnp.float32)
    params = init_params(kp)
    cos_full, sin_full, rot = make_rope(S, QK_ROPE)
    mask = jnp.asarray(np.triu(np.full((S, S), NEG_MASK, dtype=np.float32), k=1))

    out = block_forward(x, mask, cos_full, sin_full, rot, params)
    out = jax.block_until_ready(out)
    assert out.shape == (B, S, D) and out.dtype == jnp.float32
    print("KERNEL_OK")
</pallas_src>

<mosaic_0001>
module attributes {stable_mosaic.version = 11 : i64} {
  func.func @fused_block_kernel(%arg0: memref<16x32xf32, #tpu.memory_space<vmem>>, %arg1: memref<16x16xf32, #tpu.memory_space<vmem>>, %arg2: memref<16x4xf32, #tpu.memory_space<vmem>>, %arg3: memref<16x4xf32, #tpu.memory_space<vmem>>, %arg4: memref<16x16xf32, #tpu.memory_space<vmem>>, %arg5: memref<16x16xf32, #tpu.memory_space<vmem>>, %arg6: memref<4x4xf32, #tpu.memory_space<vmem>>, %arg7: memref<16x16xf32, #tpu.memory_space<vmem>>, %arg8: memref<1x32xf32, #tpu.memory_space<vmem>>, %arg9: memref<32x16xf32, #tpu.memory_space<vmem>>, %arg10: memref<1x16xf32, #tpu.memory_space<vmem>>, %arg11: memref<16x48xf32, #tpu.memory_space<vmem>>, %arg12: memref<32x20xf32, #tpu.memory_space<vmem>>, %arg13: memref<1x16xf32, #tpu.memory_space<vmem>>, %arg14: memref<16x64xf32, #tpu.memory_space<vmem>>, %arg15: memref<32x32xf32, #tpu.memory_space<vmem>>, %arg16: memref<1x32xf32, #tpu.memory_space<vmem>>, %arg17: memref<32x32xf32, #tpu.memory_space<vmem>>, %arg18: memref<1x32xf32, #tpu.memory_space<vmem>>, %arg19: memref<1x32xf32, #tpu.memory_space<vmem>>, %arg20: memref<1x32xf32, #tpu.memory_space<vmem>>, %arg21: memref<32x128xf32, #tpu.memory_space<vmem>>, %arg22: memref<1x64xf32, #tpu.memory_space<vmem>>, %arg23: memref<1x64xf32, #tpu.memory_space<vmem>>, %arg24: memref<4x128xf32, #tpu.memory_space<vmem>>, %arg25: memref<4x128xf32, #tpu.memory_space<vmem>>, %arg26: memref<128x4xf32, #tpu.memory_space<vmem>>, %arg27: memref<32x8xf32, #tpu.memory_space<vmem>>, %arg28: memref<32x8xf32, #tpu.memory_space<vmem>>, %arg29: memref<8x32xf32, #tpu.memory_space<vmem>>, %arg30: memref<16x32xf32, #tpu.memory_space<vmem>>) attributes {dimension_semantics = [], scalar_prefetch = 0 : i64, scratch_operands = 0 : i64, tpu.core_type = #tpu.core_type<tc>} {
    %c0 = arith.constant 0 : index
    %c0_0 = arith.constant 0 : index
    %0 = vector.load %arg0[%c0, %c0_0] : memref<16x32xf32, #tpu.memory_space<vmem>>, vector<16x32xf32>
    %c0_1 = arith.constant 0 : index
    %c0_2 = arith.constant 0 : index
    %1 = vector.load %arg1[%c0_1, %c0_2] : memref<16x16xf32, #tpu.memory_space<vmem>>, vector<16x16xf32>
    %c0_3 = arith.constant 0 : index
    %c0_4 = arith.constant 0 : index
    %2 = vector.load %arg8[%c0_3, %c0_4] : memref<1x32xf32, #tpu.memory_space<vmem>>, vector<1x32xf32>
    %3 = arith.mulf %0, %0 : vector<16x32xf32>
    %cst = arith.constant dense<0.000000e+00> : vector<16xf32>
    %4 = vector.multi_reduction <add>, %3, %cst [1] : vector<16x32xf32> to vector<16xf32>
    %5 = vector.shape_cast %4 : vector<16xf32> to vector<16x1xf32>
    %cst_5 = arith.constant 3.200000e+01 : f32
    %6 = vector.broadcast %cst_5 : f32 to vector<16x1xf32>
    %7 = arith.divf %5, %6 : vector<16x1xf32>
    %cst_6 = arith.constant 9.99999974E-6 : f32
    %8 = vector.broadcast %cst_6 : f32 to vector<16x1xf32>
    %9 = arith.addf %7, %8 : vector<16x1xf32>
    %10 = math.rsqrt %9 : vector<16x1xf32>
    %11 = vector.broadcast %10 : vector<16x1xf32> to vector<16x32xf32>
    %12 = arith.mulf %0, %11 : vector<16x32xf32>
    %13 = vector.broadcast %2 : vector<1x32xf32> to vector<16x32xf32>
    %14 = arith.mulf %12, %13 : vector<16x32xf32>
    %c0_7 = arith.constant 0 : index
    %c0_8 = arith.constant 0 : index
    %15 = vector.load %arg9[%c0_7, %c0_8] : memref<32x16xf32, #tpu.memory_space<vmem>>, vector<32x16xf32>
    %cst_9 = arith.constant dense<0.000000e+00> : vector<16x16xf32>
    %16 = tpu.matmul %14, %15, %cst_9 {dimension_numbers = #tpu.dot_dimension_numbers<[1], [0], [0], [1], [0, 0, 1, 1], [], []>} : vector<16x32xf32>, vector<32x16xf32>, vector<16x16xf32> -> vector<16x16xf32>
    %c0_10 = arith.constant 0 : index
    %c0_11 = arith.constant 0 : index
    %17 = vector.load %arg10[%c0_10, %c0_11] : memref<1x16xf32, #tpu.memory_space<vmem>>, vector<1x16xf32>
    %18 = arith.mulf %16, %16 : vector<16x16xf32>
    %cst_12 = arith.constant dense<0.000000e+00> : vector<16xf32>
    %19 = vector.multi_reduction <add>, %18, %cst_12 [1] : vector<16x16xf32> to vector<16xf32>
    %20 = vector.shape_cast %19 : vector<16xf32> to vector<16x1xf32>
    %cst_13 = arith.constant 1.600000e+01 : f32
    %21 = vector.broadcast %cst_13 : f32 to vector<16x1xf32>
    %22 = arith.divf %20, %21 : vector<16x1xf32>
    %cst_14 = arith.constant 9.99999974E-6 : f32
    %23 = vector.broadcast %cst_14 : f32 to vector<16x1xf32>
    %24 = arith.addf %22, %23 : vector<16x1xf32>
    %25 = math.rsqrt %24 : vector<16x1xf32>
    %26 = vector.broadcast %25 : vector<16x1xf32> to vector<16x16xf32>
    %27 = arith.mulf %16, %26 : vector<16x16xf32>
    %28 = vector.broadcast %17 : vector<1x16xf32> to vector<16x16xf32>
    %29 = arith.mulf %27, %28 : vector<16x16xf32>
    %c0_15 = arith.constant 0 : index
    %c0_16 = arith.constant 0 : index
    %30 = vector.load %arg11[%c0_15, %c0_16] : memref<16x48xf32, #tpu.memory_space<vmem>>, vector<16x48xf32>
    %cst_17 = arith.constant dense<0.000000e+00> : vector<16x48xf32>
    %31 = tpu.matmul %29, %30, %cst_17 {dimension_numbers = #tpu.dot_dimension_numbers<[1], [0], [0], [1], [0, 0, 1, 1], [], []>} : vector<16x16xf32>, vector<16x48xf32>, vector<16x48xf32> -> vector<16x48xf32>
    %c0_18 = arith.constant 0 : index
    %c0_19 = arith.constant 0 : index
    %32 = vector.load %arg12[%c0_18, %c0_19] : memref<32x20xf32, #tpu.memory_space<vmem>>, vector<32x20xf32>
    %cst_20 = arith.constant dense<0.000000e+00> : vector<16x20xf32>
    %33 = tpu.matmul %14, %32, %cst_20 {dimension_numbers = #tpu.dot_dimension_numbers<[1], [0], [0], [1], [0, 0, 1, 1], [], []>} : vector<16x32xf32>, vector<32x20xf32>, vector<16x20xf32> -> vector<16x20xf32>
    %34 = vector.extract_strided_slice %33 {offsets = [0, 0], sizes = [16, 16], strides = [1, 1]} : vector<16x20xf32> to vector<16x16xf32>
    %c0_21 = arith.constant 0 : index
    %c0_22 = arith.constant 0 : index
    %35 = vector.load %arg13[%c0_21, %c0_22] : memref<1x16xf32, #tpu.memory_space<vmem>>, vector<1x16xf32>
    %36 = arith.mulf %34, %34 : vector<16x16xf32>
    %cst_23 = arith.constant dense<0.000000e+00> : vector<16xf32>
    %37 = vector.multi_reduction <add>, %36, %cst_23 [1] : vector<16x16xf32> to vector<16xf32>
    %38 = vector.shape_cast %37 : vector<16xf32> to vector<16x1xf32>
    %cst_24 = arith.constant 1.600000e+01 : f32
    %39 = vector.broadcast %cst_24 : f32 to vector<16x1xf32>
    %40 = arith.divf %38, %39 : vector<16x1xf32>
    %cst_25 = arith.constant 9.99999974E-6 : f32
    %41 = vector.broadcast %cst_25 : f32 to vector<16x1xf32>
    %42 = arith.addf %40, %41 : vector<16x1xf32>
    %43 = math.rsqrt %42 : vector<16x1xf32>
    %44 = vector.broadcast %43 : vector<16x1xf32> to vector<16x16xf32>
    %45 = arith.mulf %34, %44 : vector<16x16xf32>
    %46 = vector.broadcast %35 : vector<1x16xf32> to vector<16x16xf32>
    %47 = arith.mulf %45, %46 : vector<16x16xf32>
    %48 = vector.extract_strided_slice %33 {offsets = [0, 16], sizes = [16, 4], strides = [1, 1]} : vector<16x20xf32> to vector<16x4xf32>
    %c0_26 = arith.constant 0 : index
    %c0_27 = arith.constant 0 : index
    %49 = vector.load %arg14[%c0_26, %c0_27] : memref<16x64xf32, #tpu.memory_space<vmem>>, vector<16x64xf32>
    %cst_28 = arith.constant dense<0.000000e+00> : vector<16x64xf32>
    %50 = tpu.matmul %47, %49, %cst_28 {dimension_numbers = #tpu.dot_dimension_numbers<[1], [0], [0], [1], [0, 0, 1, 1], [], []>} : vector<16x16xf32>, vector<16x64xf32>, vector<16x64xf32> -> vector<16x64xf32>
    %c0_29 = arith.constant 0 : index
    %c0_30 = arith.constant 0 : index
    %51 = vector.load %arg2[%c0_29, %c0_30] : memref<16x4xf32, #tpu.memory_space<vmem>>, vector<16x4xf32>
    %52 = arith.mulf %48, %51 : vector<16x4xf32>
    %c0_31 = arith.constant 0 : index
    %c0_32 = arith.constant 0 : index
    %53 = vector.load %arg6[%c0_31, %c0_32] : memref<4x4xf32, #tpu.memory_space<vmem>>, vector<4x4xf32>
    %cst_33 = arith.constant dense<0.000000e+00> : vector<16x4xf32>
    %54 = tpu.matmul %48, %53, %cst_33 {dimension_numbers = #tpu.dot_dimension_numbers<[1], [0], [0], [1], [0, 0, 1, 1], [], []>} : vector<16x4xf32>, vector<4x4xf32>, vector<16x4xf32> -> vector<16x4xf32>
    %c0_34 = arith.constant 0 : index
    %c0_35 = arith.constant 0 : index
    %55 = vector.load %arg3[%c0_34, %c0_35] : memref<16x4xf32, #tpu.memory_space<vmem>>, vector<16x4xf32>
    %56 = arith.mulf %54, %55 : vector<16x4xf32>
    %57 = arith.addf %52, %56 : vector<16x4xf32>
    %58 = vector.extract_strided_slice %31 {offsets = [0, 32], sizes = [16, 16], strides = [1, 1]} : vector<16x48xf32> to vector<16x16xf32>
    %c0_36 = arith.constant 0 : index
    %c0_37 = arith.constant 0 : index
    %59 = vector.load %arg4[%c0_36, %c0_37] : memref<16x16xf32, #tpu.memory_space<vmem>>, vector<16x16xf32>
    %60 = arith.mulf %58, %59 : vector<16x16xf32>
    %c0_38 = arith.constant 0 : index
    %c0_39 = arith.constant 0 : index
    %61 = vector.load %arg7[%c0_38, %c0_39] : memref<16x16xf32, #tpu.memory_space<vmem>>, vector<16x16xf32>
    %cst_40 = arith.constant dense<0.000000e+00> : vector<16x16xf32>
    %62 = tpu.matmul %58, %61, %cst_40 {dimension_numbers = #tpu.dot_dimension_numbers<[1], [0], [0], [1], [0, 0, 1, 1], [], []>} : vector<16x16xf32>, vector<16x16xf32>, vector<16x16xf32> -> vector<16x16xf32>
    %c0_41 = arith.constant 0 : index
    %c0_42 = arith.constant 0 : index
    %63 = vector.load %arg5[%c0_41, %c0_42] : memref<16x16xf32, #tpu.memory_space<vmem>>, vector<16x16xf32>
    %64 = arith.mulf %62, %63 : vector<16x16xf32>
    %65 = arith.addf %60, %64 : vector<16x16xf32>
    %c0_43 = arith.constant 0 : index
    %c0_44 = arith.constant 0 : index
    %66 = vector.load %arg15[%c0_43, %c0_44] : memref<32x32xf32, #tpu.memory_space<vmem>>, vector<32x32xf32>
    %cst_45 = arith.constant 0.000000e+00 : f32
    %67 = vector.broadcast %cst_45 : f32 to vector<16x32xf32>
    %68 = vector.extract_strided_slice %31 {offsets = [0, 0], sizes = [16, 8], strides = [1, 1]} : vector<16x48xf32> to vector<16x8xf32>
    %69 = vector.extract_strided_slice %50 {offsets = [0, 0], sizes = [16, 8], strides = [1, 1]} : vector<16x64xf32> to vector<16x8xf32>
    %70 = vector.extract_strided_slice %50 {offsets = [0, 32], sizes = [16, 8], strides = [1, 1]} : vector<16x64xf32> to vector<16x8xf32>
    %71 = vector.extract_strided_slice %65 {offsets = [0, 0], sizes = [16, 4], strides = [1, 1]} : vector<16x16xf32> to vector<16x4xf32>
    %cst_46 = arith.constant dense<0.000000e+00> : vector<16x16xf32>
    %72 = tpu.matmul %68, %69, %cst_46 {dimension_numbers = #tpu.dot_dimension_numbers<[1], [1], [0], [0], [0, 0, 1, 0], [], []>} : vector<16x8xf32>, vector<16x8xf32>, vector<16x16xf32> -> vector<16x16xf32>
    %cst_47 = arith.constant dense<0.000000e+00> : vector<16x16xf32>
    %73 = tpu.matmul %57, %71, %cst_47 {dimension_numbers = #tpu.dot_dimension_numbers<[1], [1], [0], [0], [0, 0, 1, 0], [], []>} : vector<16x4xf32>, vector<16x4xf32>, vector<16x16xf32> -> vector<16x16xf32>
    %74 = arith.addf %72, %73 : vector<16x16xf32>
    %cst_48 = arith.constant 0.353553385 : f32
    %75 = vector.broadcast %cst_48 : f32 to vector<16x16xf32>
    %76 = arith.mulf %74, %75 : vector<16x16xf32>
    %77 = arith.addf %76, %1 : vector<16x16xf32>
    %cst_49 = arith.constant dense<0xFF800000> : vector<16xf32>
    %78 = vector.multi_reduction <maximumf>, %77, %cst_49 [1] : vector<16x16xf32> to vector<16xf32>
    %79 = vector.shape_cast %78 : vector<16xf32> to vector<16x1xf32>
    %80 = vector.broadcast %79 : vector<16x1xf32> to vector<16x16xf32>
    %81 = arith.subf %77, %80 : vector<16x16xf32>
    %82 = math.exp %81 : vector<16x16xf32>
    %cst_50 = arith.constant dense<0.000000e+00> : vector<16xf32>
    %83 = vector.multi_reduction <add>, %82, %cst_50 [1] : vector<16x16xf32> to vector<16xf32>
    %84 = vector.shape_cast %83 : vector<16xf32> to vector<16x1xf32>
    %85 = tpu.reciprocal %84 {approx = true} : vector<16x1xf32> -> vector<16x1xf32>
    %86 = vector.broadcast %85 : vector<16x1xf32> to vector<16x16xf32>
    %87 = arith.mulf %82, %86 : vector<16x16xf32>
    %cst_51 = arith.constant dense<0.000000e+00> : vector<16x8xf32>
    %88 = tpu.matmul %87, %70, %cst_51 {dimension_numbers = #tpu.dot_dimension_numbers<[1], [0], [0], [1], [0, 0, 1, 1], [], []>} : vector<16x16xf32>, vector<16x8xf32>, vector<16x8xf32> -> vector<16x8xf32>
    %89 = vector.extract_strided_slice %66 {offsets = [0, 0], sizes = [8, 32], strides = [1, 1]} : vector<32x32xf32> to vector<8x32xf32>
    %cst_52 = arith.constant dense<0.000000e+00> : vector<16x32xf32>
    %90 = tpu.matmul %88, %89, %cst_52 {dimension_numbers = #tpu.dot_dimension_numbers<[1], [0], [0], [1], [0, 0, 1, 1], [], []>} : vector<16x8xf32>, vector<8x32xf32>, vector<16x32xf32> -> vector<16x32xf32>
    %91 = arith.addf %67, %90 : vector<16x32xf32>
    %92 = vector.extract_strided_slice %31 {offsets = [0, 8], sizes = [16, 8], strides = [1, 1]} : vector<16x48xf32> to vector<16x8xf32>
    %93 = vector.extract_strided_slice %50 {offsets = [0, 8], sizes = [16, 8], strides = [1, 1]} : vector<16x64xf32> to vector<16x8xf32>
    %94 = vector.extract_strided_slice %50 {offsets = [0, 40], sizes = [16, 8], strides = [1, 1]} : vector<16x64xf32> to vector<16x8xf32>
    %95 = vector.extract_strided_slice %65 {offsets = [0, 4], sizes = [16, 4], strides = [1, 1]} : vector<16x16xf32> to vector<16x4xf32>
    %cst_53 = arith.constant dense<0.000000e+00> : vector<16x16xf32>
    %96 = tpu.matmul %92, %93, %cst_53 {dimension_numbers = #tpu.dot_dimension_numbers<[1], [1], [0], [0], [0, 0, 1, 0], [], []>} : vector<16x8xf32>, vector<16x8xf32>, vector<16x16xf32> -> vector<16x16xf32>
    %cst_54 = arith.constant dense<0.000000e+00> : vector<16x16xf32>
    %97 = tpu.matmul %57, %95, %cst_54 {dimension_numbers = #tpu.dot_dimension_numbers<[1], [1], [0], [0], [0, 0, 1, 0], [], []>} : vector<16x4xf32>, vector<16x4xf32>, vector<16x16xf32> -> vector<16x16xf32>
    %98 = arith.addf %96, %97 : vector<16x16xf32>
    %cst_55 = arith.constant 0.353553385 : f32
    %99 = vector.broadcast %cst_55 : f32 to vector<16x16xf32>
    %100 = arith.mulf %98, %99 : vector<16x16xf32>
    %101 = arith.addf %100, %1 : vector<16x16xf32>
    %cst_56 = arith.constant dense<0xFF800000> : vector<16xf32>
    %102 = vector.multi_reduction <maximumf>, %101, %cst_56 [1] : vector<16x16xf32> to vector<16xf32>
    %103 = vector.shape_cast %102 : vector<16xf32> to vector<16x1xf32>
    %104 = vector.broadcast %103 : vector<16x1xf32> to vector<16x16xf32>
    %105 = arith.subf %101, %104 : vector<16x16xf32>
    %106 = math.exp %105 : vector<16x16xf32>
    %cst_57 = arith.constant dense<0.000000e+00> : vector<16xf32>
    %107 = vector.multi_reduction <add>, %106, %cst_57 [1] : vector<16x16xf32> to vector<16xf32>
    %108 = vector.shape_cast %107 : vector<16xf32> to vector<16x1xf32>
    %109 = tpu.reciprocal %108 {approx = true} : vector<16x1xf32> -> vector<16x1xf32>
    %110 = vector.broadcast %109 : vector<16x1xf32> to vector<16x16xf32>
    %111 = arith.mulf %106, %110 : vector<16x16xf32>
    %cst_58 = arith.constant dense<0.000000e+00> : vector<16x8xf32>
    %112 = tpu.matmul %111, %94, %cst_58 {dimension_numbers = #tpu.dot_dimension_numbers<[1], [0], [0], [1], [0, 0, 1, 1], [], []>} : vector<16x16xf32>, vector<16x8xf32>, vector<16x8xf32> -> vector<16x8xf32>
    %113 = vector.extract_strided_slice %66 {offsets = [8, 0], sizes = [8, 32], strides = [1, 1]} : vector<32x32xf32> to vector<8x32xf32>
    %cst_59 = arith.constant dense<0.000000e+00> : vector<16x32xf32>
    %114 = tpu.matmul %112, %113, %cst_59 {dimension_numbers = #tpu.dot_dimension_numbers<[1], [0], [0], [1], [0, 0, 1, 1], [], []>} : vector<16x8xf32>, vector<8x32xf32>, vector<16x32xf32> -> vector<16x32xf32>
    %115 = arith.addf %91, %114 : vector<16x32xf32>
    %116 = vector.extract_strided_slice %31 {offsets = [0, 16], sizes = [16, 8], strides = [1, 1]} : vector<16x48xf32> to vector<16x8xf32>
    %117 = vector.extract_strided_slice %50 {offsets = [0, 16], sizes = [16, 8], strides = [1, 1]} : vector<16x64xf32> to vector<16x8xf32>
    %118 = vector.extract_strided_slice %50 {offsets = [0, 48], sizes = [16, 8], strides = [1, 1]} : vector<16x64xf32> to vector<16x8xf32>
    %119 = vector.extract_strided_slice %65 {offsets = [0, 8], sizes = [16, 4], strides = [1, 1]} : vector<16x16xf32> to vector<16x4xf32>
    %cst_60 = arith.constant dense<0.000000e+00> : vector<16x16xf32>
    %120 = tpu.matmul %116, %117, %cst_60 {dimension_numbers = #tpu.dot_dimension_numbers<[1], [1], [0], [0], [0, 0, 1, 0], [], []>} : vector<16x8xf32>, vector<16x8xf32>, vector<16x16xf32> -> vector<16x16xf32>
    %cst_61 = arith.constant dense<0.000000e+00> : vector<16x16xf32>
    %121 = tpu.matmul %57, %119, %cst_61 {dimension_numbers = #tpu.dot_dimension_numbers<[1], [1], [0], [0], [0, 0, 1, 0], [], []>} : vector<16x4xf32>, vector<16x4xf32>, vector<16x16xf32> -> vector<16x16xf32>
    %122 = arith.addf %120, %121 : vector<16x16xf32>
    %cst_62 = arith.constant 0.353553385 : f32
    %123 = vector.broadcast %cst_62 : f32 to vector<16x16xf32>
    %124 = arith.mulf %122, %123 : vector<16x16xf32>
    %125 = arith.addf %124, %1 : vector<16x16xf32>
    %cst_63 = arith.constant dense<0xFF800000> : vector<16xf32>
    %126 = vector.multi_reduction <maximumf>, %125, %cst_63 [1] : vector<16x16xf32> to vector<16xf32>
    %127 = vector.shape_cast %126 : vector<16xf32> to vector<16x1xf32>
    %128 = vector.broadcast %127 : vector<16x1xf32> to vector<16x16xf32>
    %129 = arith.subf %125, %128 : vector<16x16xf32>
    %130 = math.exp %129 : vector<16x16xf32>
    %cst_64 = arith.constant dense<0.000000e+00> : vector<16xf32>
    %131 = vector.multi_reduction <add>, %130, %cst_64 [1] : vector<16x16xf32> to vector<16xf32>
    %132 = vector.shape_cast %131 : vector<16xf32> to vector<16x1xf32>
    %133 = tpu.reciprocal %132 {approx = true} : vector<16x1xf32> -> vector<16x1xf32>
    %134 = vector.broadcast %133 : vector<16x1xf32> to vector<16x16xf32>
    %135 = arith.mulf %130, %134 : vector<16x16xf32>
    %cst_65 = arith.constant dense<0.000000e+00> : vector<16x8xf32>
    %136 = tpu.matmul %135, %118, %cst_65 {dimension_numbers = #tpu.dot_dimension_numbers<[1], [0], [0], [1], [0, 0, 1, 1], [], []>} : vector<16x16xf32>, vector<16x8xf32>, vector<16x8xf32> -> vector<16x8xf32>
    %137 = vector.extract_strided_slice %66 {offsets = [16, 0], sizes = [8, 32], strides = [1, 1]} : vector<32x32xf32> to vector<8x32xf32>
    %cst_66 = arith.constant dense<0.000000e+00> : vector<16x32xf32>
    %138 = tpu.matmul %136, %137, %cst_66 {dimension_numbers = #tpu.dot_dimension_numbers<[1], [0], [0], [1], [0, 0, 1, 1], [], []>} : vector<16x8xf32>, vector<8x32xf32>, vector<16x32xf32> -> vector<16x32xf32>
    %139 = arith.addf %115, %138 : vector<16x32xf32>
    %140 = vector.extract_strided_slice %31 {offsets = [0, 24], sizes = [16, 8], strides = [1, 1]} : vector<16x48xf32> to vector<16x8xf32>
    %141 = vector.extract_strided_slice %50 {offsets = [0, 24], sizes = [16, 8], strides = [1, 1]} : vector<16x64xf32> to vector<16x8xf32>
    %142 = vector.extract_strided_slice %50 {offsets = [0, 56], sizes = [16, 8], strides = [1, 1]} : vector<16x64xf32> to vector<16x8xf32>
    %143 = vector.extract_strided_slice %65 {offsets = [0, 12], sizes = [16, 4], strides = [1, 1]} : vector<16x16xf32> to vector<16x4xf32>
    %cst_67 = arith.constant dense<0.000000e+00> : vector<16x16xf32>
    %144 = tpu.matmul %140, %141, %cst_67 {dimension_numbers = #tpu.dot_dimension_numbers<[1], [1], [0], [0], [0, 0, 1, 0], [], []>} : vector<16x8xf32>, vector<16x8xf32>, vector<16x16xf32> -> vector<16x16xf32>
    %cst_68 = arith.constant dense<0.000000e+00> : vector<16x16xf32>
    %145 = tpu.matmul %57, %143, %cst_68 {dimension_numbers = #tpu.dot_dimension_numbers<[1], [1], [0], [0], [0, 0, 1, 0], [], []>} : vector<16x4xf32>, vector<16x4xf32>, vector<16x16xf32> -> vector<16x16xf32>
    %146 = arith.addf %144, %145 : vector<16x16xf32>
    %cst_69 = arith.constant 0.353553385 : f32
    %147 = vector.broadcast %cst_69 : f32 to vector<16x16xf32>
    %148 = arith.mulf %146, %147 : vector<16x16xf32>
    %149 = arith.addf %148, %1 : vector<16x16xf32>
    %cst_70 = arith.constant dense<0xFF800000> : vector<16xf32>
    %150 = vector.multi_reduction <maximumf>, %149, %cst_70 [1] : vector<16x16xf32> to vector<16xf32>
    %151 = vector.shape_cast %150 : vector<16xf32> to vector<16x1xf32>
    %152 = vector.broadcast %151 : vector<16x1xf32> to vector<16x16xf32>
    %153 = arith.subf %149, %152 : vector<16x16xf32>
    %154 = math.exp %153 : vector<16x16xf32>
    %cst_71 = arith.constant dense<0.000000e+00> : vector<16xf32>
    %155 = vector.multi_reduction <add>, %154, %cst_71 [1] : vector<16x16xf32> to vector<16xf32>
    %156 = vector.shape_cast %155 : vector<16xf32> to vector<16x1xf32>
    %157 = tpu.reciprocal %156 {approx = true} : vector<16x1xf32> -> vector<16x1xf32>
    %158 = vector.broadcast %157 : vector<16x1xf32> to vector<16x16xf32>
    %159 = arith.mulf %154, %158 : vector<16x16xf32>
    %cst_72 = arith.constant dense<0.000000e+00> : vector<16x8xf32>
    %160 = tpu.matmul %159, %142, %cst_72 {dimension_numbers = #tpu.dot_dimension_numbers<[1], [0], [0], [1], [0, 0, 1, 1], [], []>} : vector<16x16xf32>, vector<16x8xf32>, vector<16x8xf32> -> vector<16x8xf32>
    %161 = vector.extract_strided_slice %66 {offsets = [24, 0], sizes = [8, 32], strides = [1, 1]} : vector<32x32xf32> to vector<8x32xf32>
    %cst_73 = arith.constant dense<0.000000e+00> : vector<16x32xf32>
    %162 = tpu.matmul %160, %161, %cst_73 {dimension_numbers = #tpu.dot_dimension_numbers<[1], [0], [0], [1], [0, 0, 1, 1], [], []>} : vector<16x8xf32>, vector<8x32xf32>, vector<16x32xf32> -> vector<16x32xf32>
    %163 = arith.addf %139, %162 : vector<16x32xf32>
    %164 = arith.addf %0, %163 : vector<16x32xf32>
    %c0_74 = arith.constant 0 : index
    %c0_75 = arith.constant 0 : index
    %165 = vector.load %arg16[%c0_74, %c0_75] : memref<1x32xf32, #tpu.memory_space<vmem>>, vector<1x32xf32>
    %166 = arith.mulf %164, %164 : vector<16x32xf32>
    %cst_76 = arith.constant dense<0.000000e+00> : vector<16xf32>
    %167 = vector.multi_reduction <add>, %166, %cst_76 [1] : vector<16x32xf32> to vector<16xf32>
    %168 = vector.shape_cast %167 : vector<16xf32> to vector<16x1xf32>
    %cst_77 = arith.constant 3.200000e+01 : f32
    %169 = vector.broadcast %cst_77 : f32 to vector<16x1xf32>
    %170 = arith.divf %168, %169 : vector<16x1xf32>
    %cst_78 = arith.constant 9.99999974E-6 : f32
    %171 = vector.broadcast %cst_78 : f32 to vector<16x1xf32>
    %172 = arith.addf %170, %171 : vector<16x1xf32>
    %173 = math.rsqrt %172 : vector<16x1xf32>
    %174 = vector.broadcast %173 : vector<16x1xf32> to vector<16x32xf32>
    %175 = arith.mulf %164, %174 : vector<16x32xf32>
    %176 = vector.broadcast %165 : vector<1x32xf32> to vector<16x32xf32>
    %177 = arith.mulf %175, %176 : vector<16x32xf32>
    %c0_79 = arith.constant 0 : index
    %c0_80 = arith.constant 0 : index
    %178 = vector.load %arg17[%c0_79, %c0_80] : memref<32x32xf32, #tpu.memory_space<vmem>>, vector<32x32xf32>
    %cst_81 = arith.constant dense<0.000000e+00> : vector<16x32xf32>
    %179 = tpu.matmul %177, %178, %cst_81 {dimension_numbers = #tpu.dot_dimension_numbers<[1], [0], [0], [1], [0, 0, 1, 1], [], []>} : vector<16x32xf32>, vector<32x32xf32>, vector<16x32xf32> -> vector<16x32xf32>
    %c0_82 = arith.constant 0 : index
    %c0_83 = arith.constant 0 : index
    %180 = vector.load %arg18[%c0_82, %c0_83] : memref<1x32xf32, #tpu.memory_space<vmem>>, vector<1x32xf32>
    %181 = vector.broadcast %180 : vector<1x32xf32> to vector<16x32xf32>
    %182 = arith.addf %179, %181 : vector<16x32xf32>
    %c0_84 = arith.constant 0 : index
    %c0_85 = arith.constant 0 : index
    %183 = vector.load %arg19[%c0_84, %c0_85] : memref<1x32xf32, #tpu.memory_space<vmem>>, vector<1x32xf32>
    %184 = vector.broadcast %183 : vector<1x32xf32> to vector<16x32xf32>
    %185 = arith.mulf %182, %184 : vector<16x32xf32>
    %c0_86 = arith.constant 0 : index
    %c0_87 = arith.constant 0 : index
    %186 = vector.load %arg20[%c0_86, %c0_87] : memref<1x32xf32, #tpu.memory_space<vmem>>, vector<1x32xf32>
    %187 = vector.broadcast %186 : vector<1x32xf32> to vector<16x32xf32>
    %188 = arith.addf %185, %187 : vector<16x32xf32>
    %c0_88 = arith.constant 0 : index
    %c0_89 = arith.constant 0 : index
    %189 = vector.load %arg21[%c0_88, %c0_89] : memref<32x128xf32, #tpu.memory_space<vmem>>, vector<32x128xf32>
    %cst_90 = arith.constant dense<0.000000e+00> : vector<16x128xf32>
    %190 = tpu.matmul %188, %189, %cst_90 {dimension_numbers = #tpu.dot_dimension_numbers<[1], [0], [0], [1], [0, 0, 1, 1], [], []>} : vector<16x32xf32>, vector<32x128xf32>, vector<16x128xf32> -> vector<16x128xf32>
    %191 = tpu.iota {dimensions = array<i32: 1>} : vector<16x64xi32>
    %192 = arith.sitofp %191 : vector<16x64xi32> to vector<16x64xf32>
    %193 = tpu.iota {dimensions = array<i32: 1>} : vector<1x4xi32>
    %c0_i32 = arith.constant 0 : i32
    %194 = vector.broadcast %c0_i32 : i32 to vector<1x4xi32>
    %195 = arith.cmpi eq, %193, %194 : vector<1x4xi32>
    %196 = arith.extui %195 : vector<1x4xi1> to vector<1x4xi32>
    %197 = arith.sitofp %196 : vector<1x4xi32> to vector<1x4xf32>
    %198 = tpu.iota {dimensions = array<i32: 1>} : vector<1x4xi32>
    %c1_i32 = arith.constant 1 : i32
    %199 = vector.broadcast %c1_i32 : i32 to vector<1x4xi32>
    %200 = arith.cmpi eq, %198, %199 : vector<1x4xi32>
    %201 = arith.extui %200 : vector<1x4xi1> to vector<1x4xi32>
    %202 = arith.sitofp %201 : vector<1x4xi32> to vector<1x4xf32>
    %203 = tpu.iota {dimensions = array<i32: 1>} : vector<1x4xi32>
    %c2_i32 = arith.constant 2 : i32
    %204 = vector.broadcast %c2_i32 : i32 to vector<1x4xi32>
    %205 = arith.cmpi eq, %203, %204 : vector<1x4xi32>
    %206 = arith.extui %205 : vector<1x4xi1> to vector<1x4xi32>
    %207 = arith.sitofp %206 : vector<1x4xi32> to vector<1x4xf32>
    %208 = tpu.iota {dimensions = array<i32: 1>} : vector<1x4xi32>
    %c3_i32 = arith.constant 3 : i32
    %209 = vector.broadcast %c3_i32 : i32 to vector<1x4xi32>
    %210 = arith.cmpi eq, %208, %209 : vector<1x4xi32>
    %211 = arith.extui %210 : vector<1x4xi1> to vector<1x4xi32>
    %212 = arith.sitofp %211 : vector<1x4xi32> to vector<1x4xf32>
    %c0_91 = arith.constant 0 : index
    %c0_92 = arith.constant 0 : index
    %213 = vector.load %arg22[%c0_91, %c0_92] : memref<1x64xf32, #tpu.memory_space<vmem>>, vector<1x64xf32>
    %c0_93 = arith.constant 0 : index
    %c0_94 = arith.constant 0 : index
    %214 = vector.load %arg23[%c0_93, %c0_94] : memref<1x64xf32, #tpu.memory_space<vmem>>, vector<1x64xf32>
    %cst_95 = arith.constant dense<0.000000e+00> : vector<16xf32>
    %215 = vector.multi_reduction <add>, %177, %cst_95 [1] : vector<16x32xf32> to vector<16xf32>
    %216 = vector.shape_cast %215 : vector<16xf32> to vector<16x1xf32>
    %cst_96 = arith.constant 0.000000e+00 : f32
    %217 = vector.broadcast %cst_96 : f32 to vector<16x1xf32>
    %218 = vector.extract_strided_slice %190 {offsets = [0, 0], sizes = [16, 64], strides = [1, 1]} : vector<16x128xf32> to vector<16x64xf32>
    %cst_97 = arith.constant 0.000000e+00 : f32
    %219 = vector.broadcast %cst_97 : f32 to vector<16x4xf32>
    %cst_98 = arith.constant 0.000000e+00 : f32
    %220 = vector.broadcast %cst_98 : f32 to vector<16x4xf32>
    %cst_99 = arith.constant 0.000000e+00 : f32
    %221 = vector.broadcast %cst_99 : f32 to vector<16x4xf32>
    %cst_100 = arith.constant dense<0xFF800000> : vector<16xf32>
    %222 = vector.multi_reduction <maximumf>, %218, %cst_100 [1] : vector<16x64xf32> to vector<16xf32>
    %223 = vector.shape_cast %222 : vector<16xf32> to vector<16x1xf32>
    %224 = vector.broadcast %223 : vector<16x1xf32> to vector<16x64xf32>
    %225 = arith.cmpf oge, %218, %224 : vector<16x64xf32>
    %cst_101 = arith.constant 6.400000e+01 : f32
    %226 = vector.broadcast %cst_101 : f32 to vector<16x64xf32>
    %227 = arith.select %225, %192, %226 : vector<16x64xi1>, vector<16x64xf32>
    %cst_102 = arith.constant dense<0x7F800000> : vector<16xf32>
    %228 = vector.multi_reduction <minimumf>, %227, %cst_102 [1] : vector<16x64xf32> to vector<16xf32>
    %229 = vector.shape_cast %228 : vector<16xf32> to vector<16x1xf32>
    %230 = vector.broadcast %229 : vector<16x1xf32> to vector<16x64xf32>
    %231 = arith.cmpf oeq, %192, %230 : vector<16x64xf32>
    %232 = arith.extui %231 : vector<16x64xi1> to vector<16x64xi32>
    %233 = arith.sitofp %232 : vector<16x64xi32> to vector<16x64xf32>
    %234 = vector.broadcast %223 : vector<16x1xf32> to vector<16x4xf32>
    %235 = vector.broadcast %197 : vector<1x4xf32> to vector<16x4xf32>
    %236 = arith.mulf %234, %235 : vector<16x4xf32>
    %237 = arith.addf %219, %236 : vector<16x4xf32>
    %238 = vector.broadcast %213 : vector<1x64xf32> to vector<16x64xf32>
    %239 = arith.mulf %233, %238 : vector<16x64xf32>
    %cst_103 = arith.constant dense<0.000000e+00> : vector<16xf32>
    %240 = vector.multi_reduction <add>, %239, %cst_103 [1] : vector<16x64xf32> to vector<16xf32>
    %241 = vector.shape_cast %240 : vector<16xf32> to vector<16x1xf32>
    %242 = vector.broadcast %241 : vector<16x1xf32> to vector<16x4xf32>
    %243 = vector.broadcast %197 : vector<1x4xf32> to vector<16x4xf32>
    %244 = arith.mulf %242, %243 : vector<16x4xf32>
    %245 = arith.addf %220, %244 : vector<16x4xf32>
    %246 = vector.broadcast %214 : vector<1x64xf32> to vector<16x64xf32>
    %247 = arith.mulf %233, %246 : vector<16x64xf32>
    %cst_104 = arith.constant dense<0.000000e+00> : vector<16xf32>
    %248 = vector.multi_reduction <add>, %247, %cst_104 [1] : vector<16x64xf32> to vector<16xf32>
    %249 = vector.shape_cast %248 : vector<16xf32> to vector<16x1xf32>
    %250 = vector.broadcast %249 : vector<16x1xf32> to vector<16x4xf32>
    %251 = vector.broadcast %197 : vector<1x4xf32> to vector<16x4xf32>
    %252 = arith.mulf %250, %251 : vector<16x4xf32>
    %253 = arith.addf %221, %252 : vector<16x4xf32>
    %cst_105 = arith.constant -1.000000e+30 : f32
    %254 = vector.broadcast %cst_105 : f32 to vector<16x64xf32>
    %255 = arith.select %231, %254, %218 : vector<16x64xi1>, vector<16x64xf32>
    %cst_106 = arith.constant dense<0xFF800000> : vector<16xf32>
    %256 = vector.multi_reduction <maximumf>, %255, %cst_106 [1] : vector<16x64xf32> to vector<16xf32>
    %257 = vector.shape_cast %256 : vector<16xf32> to vector<16x1xf32>
    %258 = vector.broadcast %257 : vector<16x1xf32> to vector<16x64xf32>
    %259 = arith.cmpf oge, %255, %258 : vector<16x64xf32>
    %cst_107 = arith.constant 6.400000e+01 : f32
    %260 = vector.broadcast %cst_107 : f32 to vector<16x64xf32>
    %261 = arith.select %259, %192, %260 : vector<16x64xi1>, vector<16x64xf32>
    %cst_108 = arith.constant dense<0x7F800000> : vector<16xf32>
    %262 = vector.multi_reduction <minimumf>, %261, %cst_108 [1] : vector<16x64xf32> to vector<16xf32>
    %263 = vector.shape_cast %262 : vector<16xf32> to vector<16x1xf32>
    %264 = vector.broadcast %263 : vector<16x1xf32> to vector<16x64xf32>
    %265 = arith.cmpf oeq, %192, %264 : vector<16x64xf32>
    %266 = arith.extui %265 : vector<16x64xi1> to vector<16x64xi32>
    %267 = arith.sitofp %266 : vector<16x64xi32> to vector<16x64xf32>
    %268 = vector.broadcast %257 : vector<16x1xf32> to vector<16x4xf32>
    %269 = vector.broadcast %202 : vector<1x4xf32> to vector<16x4xf32>
    %270 = arith.mulf %268, %269 : vector<16x4xf32>
    %271 = arith.addf %237, %270 : vector<16x4xf32>
    %272 = vector.broadcast %213 : vector<1x64xf32> to vector<16x64xf32>
    %273 = arith.mulf %267, %272 : vector<16x64xf32>
    %cst_109 = arith.constant dense<0.000000e+00> : vector<16xf32>
    %274 = vector.multi_reduction <add>, %273, %cst_109 [1] : vector<16x64xf32> to vector<16xf32>
    %275 = vector.shape_cast %274 : vector<16xf32> to vector<16x1xf32>
    %276 = vector.broadcast %275 : vector<16x1xf32> to vector<16x4xf32>
    %277 = vector.broadcast %202 : vector<1x4xf32> to vector<16x4xf32>
    %278 = arith.mulf %276, %277 : vector<16x4xf32>
    %279 = arith.addf %245, %278 : vector<16x4xf32>
    %280 = vector.broadcast %214 : vector<1x64xf32> to vector<16x64xf32>
    %281 = arith.mulf %267, %280 : vector<16x64xf32>
    %cst_110 = arith.constant dense<0.000000e+00> : vector<16xf32>
    %282 = vector.multi_reduction <add>, %281, %cst_110 [1] : vector<16x64xf32> to vector<16xf32>
    %283 = vector.shape_cast %282 : vector<16xf32> to vector<16x1xf32>
    %284 = vector.broadcast %283 : vector<16x1xf32> to vector<16x4xf32>
    %285 = vector.broadcast %202 : vector<1x4xf32> to vector<16x4xf32>
    %286 = arith.mulf %284, %285 : vector<16x4xf32>
    %287 = arith.addf %253, %286 : vector<16x4xf32>
    %cst_111 = arith.constant -1.000000e+30 : f32
    %288 = vector.broadcast %cst_111 : f32 to vector<16x64xf32>
    %289 = arith.select %265, %288, %255 : vector<16x64xi1>, vector<16x64xf32>
    %cst_112 = arith.constant dense<0xFF800000> : vector<16xf32>
    %290 = vector.multi_reduction <maximumf>, %289, %cst_112 [1] : vector<16x64xf32> to vector<16xf32>
    %291 = vector.shape_cast %290 : vector<16xf32> to vector<16x1xf32>
    %292 = vector.broadcast %291 : vector<16x1xf32> to vector<16x64xf32>
    %293 = arith.cmpf oge, %289, %292 : vector<16x64xf32>
    %cst_113 = arith.constant 6.400000e+01 : f32
    %294 = vector.broadcast %cst_113 : f32 to vector<16x64xf32>
    %295 = arith.select %293, %192, %294 : vector<16x64xi1>, vector<16x64xf32>
    %cst_114 = arith.constant dense<0x7F800000> : vector<16xf32>
    %296 = vector.multi_reduction <minimumf>, %295, %cst_114 [1] : vector<16x64xf32> to vector<16xf32>
    %297 = vector.shape_cast %296 : vector<16xf32> to vector<16x1xf32>
    %298 = vector.broadcast %297 : vector<16x1xf32> to vector<16x64xf32>
    %299 = arith.cmpf oeq, %192, %298 : vector<16x64xf32>
    %300 = arith.extui %299 : vector<16x64xi1> to vector<16x64xi32>
    %301 = arith.sitofp %300 : vector<16x64xi32> to vector<16x64xf32>
    %302 = vector.broadcast %291 : vector<16x1xf32> to vector<16x4xf32>
    %303 = vector.broadcast %207 : vector<1x4xf32> to vector<16x4xf32>
    %304 = arith.mulf %302, %303 : vector<16x4xf32>
    %305 = arith.addf %271, %304 : vector<16x4xf32>
    %306 = vector.broadcast %213 : vector<1x64xf32> to vector<16x64xf32>
    %307 = arith.mulf %301, %306 : vector<16x64xf32>
    %cst_115 = arith.constant dense<0.000000e+00> : vector<16xf32>
    %308 = vector.multi_reduction <add>, %307, %cst_115 [1] : vector<16x64xf32> to vector<16xf32>
    %309 = vector.shape_cast %308 : vector<16xf32> to vector<16x1xf32>
    %310 = vector.broadcast %309 : vector<16x1xf32> to vector<16x4xf32>
    %311 = vector.broadcast %207 : vector<1x4xf32> to vector<16x4xf32>
    %312 = arith.mulf %310, %311 : vector<16x4xf32>
    %313 = arith.addf %279, %312 : vector<16x4xf32>
    %314 = vector.broadcast %214 : vector<1x64xf32> to vector<16x64xf32>
    %315 = arith.mulf %301, %314 : vector<16x64xf32>
    %cst_116 = arith.constant dense<0.000000e+00> : vector<16xf32>
    %316 = vector.multi_reduction <add>, %315, %cst_116 [1] : vector<16x64xf32> to vector<16xf32>
    %317 = vector.shape_cast %316 : vector<16xf32> to vector<16x1xf32>
    %318 = vector.broadcast %317 : vector<16x1xf32> to vector<16x4xf32>
    %319 = vector.broadcast %207 : vector<1x4xf32> to vector<16x4xf32>
    %320 = arith.mulf %318, %319 : vector<16x4xf32>
    %321 = arith.addf %287, %320 : vector<16x4xf32>
    %cst_117 = arith.constant -1.000000e+30 : f32
    %322 = vector.broadcast %cst_117 : f32 to vector<16x64xf32>
    %323 = arith.select %299, %322, %289 : vector<16x64xi1>, vector<16x64xf32>
    %cst_118 = arith.constant dense<0xFF800000> : vector<16xf32>
    %324 = vector.multi_reduction <maximumf>, %323, %cst_118 [1] : vector<16x64xf32> to vector<16xf32>
    %325 = vector.shape_cast %324 : vector<16xf32> to vector<16x1xf32>
    %326 = vector.broadcast %325 : vector<16x1xf32> to vector<16x64xf32>
    %327 = arith.cmpf oge, %323, %326 : vector<16x64xf32>
    %cst_119 = arith.constant 6.400000e+01 : f32
    %328 = vector.broadcast %cst_119 : f32 to vector<16x64xf32>
    %329 = arith.select %327, %192, %328 : vector<16x64xi1>, vector<16x64xf32>
    %cst_120 = arith.constant dense<0x7F800000> : vector<16xf32>
    %330 = vector.multi_reduction <minimumf>, %329, %cst_120 [1] : vector<16x64xf32> to vector<16xf32>
    %331 = vector.shape_cast %330 : vector<16xf32> to vector<16x1xf32>
    %332 = vector.broadcast %331 : vector<16x1xf32> to vector<16x64xf32>
    %333 = arith.cmpf oeq, %192, %332 : vector<16x64xf32>
    %334 = arith.extui %333 : vector<16x64xi1> to vector<16x64xi32>
    %335 = arith.sitofp %334 : vector<16x64xi32> to vector<16x64xf32>
    %336 = vector.broadcast %325 : vector<16x1xf32> to vector<16x4xf32>
    %337 = vector.broadcast %212 : vector<1x4xf32> to vector<16x4xf32>
    %338 = arith.mulf %336, %337 : vector<16x4xf32>
    %339 = arith.addf %305, %338 : vector<16x4xf32>
    %340 = vector.broadcast %213 : vector<1x64xf32> to vector<16x64xf32>
    %341 = arith.mulf %335, %340 : vector<16x64xf32>
    %cst_121 = arith.constant dense<0.000000e+00> : vector<16xf32>
    %342 = vector.multi_reduction <add>, %341, %cst_121 [1] : vector<16x64xf32> to vector<16xf32>
    %343 = vector.shape_cast %342 : vector<16xf32> to vector<16x1xf32>
    %344 = vector.broadcast %343 : vector<16x1xf32> to vector<16x4xf32>
    %345 = vector.broadcast %212 : vector<1x4xf32> to vector<16x4xf32>
    %346 = arith.mulf %344, %345 : vector<16x4xf32>
    %347 = arith.addf %313, %346 : vector<16x4xf32>
    %348 = vector.broadcast %214 : vector<1x64xf32> to vector<16x64xf32>
    %349 = arith.mulf %335, %348 : vector<16x64xf32>
    %cst_122 = arith.constant dense<0.000000e+00> : vector<16xf32>
    %350 = vector.multi_reduction <add>, %349, %cst_122 [1] : vector<16x64xf32> to vector<16xf32>
    %351 = vector.shape_cast %350 : vector<16xf32> to vector<16x1xf32>
    %352 = vector.broadcast %351 : vector<16x1xf32> to vector<16x4xf32>
    %353 = vector.broadcast %212 : vector<1x4xf32> to vector<16x4xf32>
    %354 = arith.mulf %352, %353 : vector<16x4xf32>
    %355 = arith.addf %321, %354 : vector<16x4xf32>
    %356 = vector.broadcast %216 : vector<16x1xf32> to vector<16x4xf32>
    %357 = arith.mulf %356, %347 : vector<16x4xf32>
    %c0_123 = arith.constant 0 : index
    %c0_124 = arith.constant 0 : index
    %358 = vector.load %arg24[%c0_123, %c0_124] : memref<4x128xf32, #tpu.memory_space<vmem>>, vector<4x128xf32>
    %cst_125 = arith.constant dense<0.000000e+00> : vector<16x128xf32>
    %359 = tpu.matmul %357, %358, %cst_125 {dimension_numbers = #tpu.dot_dimension_numbers<[1], [0], [0], [1], [0, 0, 1, 1], [], []>} : vector<16x4xf32>, vector<4x128xf32>, vector<16x128xf32> -> vector<16x128xf32>
    %360 = arith.negf %359 : vector<16x128xf32>
    %361 = math.exp %360 : vector<16x128xf32>
    %cst_126 = arith.constant 1.000000e+00 : f32
    %362 = vector.broadcast %cst_126 : f32 to vector<16x128xf32>
    %363 = arith.addf %362, %361 : vector<16x128xf32>
    %364 = arith.divf %362, %363 : vector<16x128xf32>
    %365 = arith.mulf %359, %364 : vector<16x128xf32>
    %c0_127 = arith.constant 0 : index
    %c0_128 = arith.constant 0 : index
    %366 = vector.load %arg25[%c0_127, %c0_128] : memref<4x128xf32, #tpu.memory_space<vmem>>, vector<4x128xf32>
    %cst_129 = arith.constant dense<0.000000e+00> : vector<16x128xf32>
    %367 = tpu.matmul %357, %366, %cst_129 {dimension_numbers = #tpu.dot_dimension_numbers<[1], [0], [0], [1], [0, 0, 1, 1], [], []>} : vector<16x4xf32>, vector<4x128xf32>, vector<16x128xf32> -> vector<16x128xf32>
    %368 = arith.mulf %365, %367 : vector<16x128xf32>
    %c0_130 = arith.constant 0 : index
    %c0_131 = arith.constant 0 : index
    %369 = vector.load %arg26[%c0_130, %c0_131] : memref<128x4xf32, #tpu.memory_space<vmem>>, vector<128x4xf32>
    %cst_132 = arith.constant dense<0.000000e+00> : vector<16x4xf32>
    %370 = tpu.matmul %368, %369, %cst_132 {dimension_numbers = #tpu.dot_dimension_numbers<[1], [0], [0], [1], [0, 0, 1, 1], [], []>} : vector<16x128xf32>, vector<128x4xf32>, vector<16x4xf32> -> vector<16x4xf32>
    %cst_133 = arith.constant dense<0xFF800000> : vector<16xf32>
    %371 = vector.multi_reduction <maximumf>, %339, %cst_133 [1] : vector<16x4xf32> to vector<16xf32>
    %372 = vector.shape_cast %371 : vector<16xf32> to vector<16x1xf32>
    %373 = vector.broadcast %372 : vector<16x1xf32> to vector<16x4xf32>
    %374 = arith.subf %339, %373 : vector<16x4xf32>
    %375 = math.exp %374 : vector<16x4xf32>
    %cst_134 = arith.constant dense<0.000000e+00> : vector<16xf32>
    %376 = vector.multi_reduction <add>, %375, %cst_134 [1] : vector<16x4xf32> to vector<16xf32>
    %377 = vector.shape_cast %376 : vector<16xf32> to vector<16x1xf32>
    %378 = tpu.reciprocal %377 {approx = true} : vector<16x1xf32> -> vector<16x1xf32>
    %379 = vector.broadcast %378 : vector<16x1xf32> to vector<16x4xf32>
    %380 = arith.mulf %375, %379 : vector<16x4xf32>
    %381 = arith.mulf %370, %380 : vector<16x4xf32>
    %382 = arith.mulf %381, %355 : vector<16x4xf32>
    %cst_135 = arith.constant dense<0.000000e+00> : vector<16xf32>
    %383 = vector.multi_reduction <add>, %382, %cst_135 [1] : vector<16x4xf32> to vector<16xf32>
    %384 = vector.shape_cast %383 : vector<16xf32> to vector<16x1xf32>
    %385 = arith.addf %217, %384 : vector<16x1xf32>
    %386 = vector.extract_strided_slice %190 {offsets = [0, 64], sizes = [16, 64], strides = [1, 1]} : vector<16x128xf32> to vector<16x64xf32>
    %cst_136 = arith.constant 0.000000e+00 : f32
    %387 = vector.broadcast %cst_136 : f32 to vector<16x4xf32>
    %cst_137 = arith.constant 0.000000e+00 : f32
    %388 = vector.broadcast %cst_137 : f32 to vector<16x4xf32>
    %cst_138 = arith.constant 0.000000e+00 : f32
    %389 = vector.broadcast %cst_138 : f32 to vector<16x4xf32>
    %cst_139 = arith.constant dense<0xFF800000> : vector<16xf32>
    %390 = vector.multi_reduction <maximumf>, %386, %cst_139 [1] : vector<16x64xf32> to vector<16xf32>
    %391 = vector.shape_cast %390 : vector<16xf32> to vector<16x1xf32>
    %392 = vector.broadcast %391 : vector<16x1xf32> to vector<16x64xf32>
    %393 = arith.cmpf oge, %386, %392 : vector<16x64xf32>
    %cst_140 = arith.constant 6.400000e+01 : f32
    %394 = vector.broadcast %cst_140 : f32 to vector<16x64xf32>
    %395 = arith.select %393, %192, %394 : vector<16x64xi1>, vector<16x64xf32>
    %cst_141 = arith.constant dense<0x7F800000> : vector<16xf32>
    %396 = vector.multi_reduction <minimumf>, %395, %cst_141 [1] : vector<16x64xf32> to vector<16xf32>
    %397 = vector.shape_cast %396 : vector<16xf32> to vector<16x1xf32>
    %398 = vector.broadcast %397 : vector<16x1xf32> to vector<16x64xf32>
    %399 = arith.cmpf oeq, %192, %398 : vector<16x64xf32>
    %400 = arith.extui %399 : vector<16x64xi1> to vector<16x64xi32>
    %401 = arith.sitofp %400 : vector<16x64xi32> to vector<16x64xf32>
    %402 = vector.broadcast %391 : vector<16x1xf32> to vector<16x4xf32>
    %403 = vector.broadcast %197 : vector<1x4xf32> to vector<16x4xf32>
    %404 = arith.mulf %402, %403 : vector<16x4xf32>
    %405 = arith.addf %387, %404 : vector<16x4xf32>
    %406 = vector.broadcast %213 : vector<1x64xf32> to vector<16x64xf32>
    %407 = arith.mulf %401, %406 : vector<16x64xf32>
    %cst_142 = arith.constant dense<0.000000e+00> : vector<16xf32>
    %408 = vector.multi_reduction <add>, %407, %cst_142 [1] : vector<16x64xf32> to vector<16xf32>
    %409 = vector.shape_cast %408 : vector<16xf32> to vector<16x1xf32>
    %410 = vector.broadcast %409 : vector<16x1xf32> to vector<16x4xf32>
    %411 = vector.broadcast %197 : vector<1x4xf32> to vector<16x4xf32>
    %412 = arith.mulf %410, %411 : vector<16x4xf32>
    %413 = arith.addf %388, %412 : vector<16x4xf32>
    %414 = vector.broadcast %214 : vector<1x64xf32> to vector<16x64xf32>
    %415 = arith.mulf %401, %414 : vector<16x64xf32>
    %cst_143 = arith.constant dense<0.000000e+00> : vector<16xf32>
    %416 = vector.multi_reduction <add>, %415, %cst_143 [1] : vector<16x64xf32> to vector<16xf32>
    %417 = vector.shape_cast %416 : vector<16xf32> to vector<16x1xf32>
    %418 = vector.broadcast %417 : vector<16x1xf32> to vector<16x4xf32>
    %419 = vector.broadcast %197 : vector<1x4xf32> to vector<16x4xf32>
    %420 = arith.mulf %418, %419 : vector<16x4xf32>
    %421 = arith.addf %389, %420 : vector<16x4xf32>
    %cst_144 = arith.constant -1.000000e+30 : f32
    %422 = vector.broadcast %cst_144 : f32 to vector<16x64xf32>
    %423 = arith.select %399, %422, %386 : vector<16x64xi1>, vector<16x64xf32>
    %cst_145 = arith.constant dense<0xFF800000> : vector<16xf32>
    %424 = vector.multi_reduction <maximumf>, %423, %cst_145 [1] : vector<16x64xf32> to vector<16xf32>
    %425 = vector.shape_cast %424 : vector<16xf32> to vector<16x1xf32>
    %426 = vector.broadcast %425 : vector<16x1xf32> to vector<16x64xf32>
    %427 = arith.cmpf oge, %423, %426 : vector<16x64xf32>
    %cst_146 = arith.constant 6.400000e+01 : f32
    %428 = vector.broadcast %cst_146 : f32 to vector<16x64xf32>
    %429 = arith.select %427, %192, %428 : vector<16x64xi1>, vector<16x64xf32>
    %cst_147 = arith.constant dense<0x7F800000> : vector<16xf32>
    %430 = vector.multi_reduction <minimumf>, %429, %cst_147 [1] : vector<16x64xf32> to vector<16xf32>
    %431 = vector.shape_cast %430 : vector<16xf32> to vector<16x1xf32>
    %432 = vector.broadcast %431 : vector<16x1xf32> to vector<16x64xf32>
    %433 = arith.cmpf oeq, %192, %432 : vector<16x64xf32>
    %434 = arith.extui %433 : vector<16x64xi1> to vector<16x64xi32>
    %435 = arith.sitofp %434 : vector<16x64xi32> to vector<16x64xf32>
    %436 = vector.broadcast %425 : vector<16x1xf32> to vector<16x4xf32>
    %437 = vector.broadcast %202 : vector<1x4xf32> to vector<16x4xf32>
    %438 = arith.mulf %436, %437 : vector<16x4xf32>
    %439 = arith.addf %405, %438 : vector<16x4xf32>
    %440 = vector.broadcast %213 : vector<1x64xf32> to vector<16x64xf32>
    %441 = arith.mulf %435, %440 : vector<16x64xf32>
    %cst_148 = arith.constant dense<0.000000e+00> : vector<16xf32>
    %442 = vector.multi_reduction <add>, %441, %cst_148 [1] : vector<16x64xf32> to vector<16xf32>
    %443 = vector.shape_cast %442 : vector<16xf32> to vector<16x1xf32>
    %444 = vector.broadcast %443 : vector<16x1xf32> to vector<16x4xf32>
    %445 = vector.broadcast %202 : vector<1x4xf32> to vector<16x4xf32>
    %446 = arith.mulf %444, %445 : vector<16x4xf32>
    %447 = arith.addf %413, %446 : vector<16x4xf32>
    %448 = vector.broadcast %214 : vector<1x64xf32> to vector<16x64xf32>
    %449 = arith.mulf %435, %448 : vector<16x64xf32>
    %cst_149 = arith.constant dense<0.000000e+00> : vector<16xf32>
    %450 = vector.multi_reduction <add>, %449, %cst_149 [1] : vector<16x64xf32> to vector<16xf32>
    %451 = vector.shape_cast %450 : vector<16xf32> to vector<16x1xf32>
    %452 = vector.broadcast %451 : vector<16x1xf32> to vector<16x4xf32>
    %453 = vector.broadcast %202 : vector<1x4xf32> to vector<16x4xf32>
    %454 = arith.mulf %452, %453 : vector<16x4xf32>
    %455 = arith.addf %421, %454 : vector<16x4xf32>
    %cst_150 = arith.constant -1.000000e+30 : f32
    %456 = vector.broadcast %cst_150 : f32 to vector<16x64xf32>
    %457 = arith.select %433, %456, %423 : vector<16x64xi1>, vector<16x64xf32>
    %cst_151 = arith.constant dense<0xFF800000> : vector<16xf32>
    %458 = vector.multi_reduction <maximumf>, %457, %cst_151 [1] : vector<16x64xf32> to vector<16xf32>
    %459 = vector.shape_cast %458 : vector<16xf32> to vector<16x1xf32>
    %460 = vector.broadcast %459 : vector<16x1xf32> to vector<16x64xf32>
    %461 = arith.cmpf oge, %457, %460 : vector<16x64xf32>
    %cst_152 = arith.constant 6.400000e+01 : f32
    %462 = vector.broadcast %cst_152 : f32 to vector<16x64xf32>
    %463 = arith.select %461, %192, %462 : vector<16x64xi1>, vector<16x64xf32>
    %cst_153 = arith.constant dense<0x7F800000> : vector<16xf32>
    %464 = vector.multi_reduction <minimumf>, %463, %cst_153 [1] : vector<16x64xf32> to vector<16xf32>
    %465 = vector.shape_cast %464 : vector<16xf32> to vector<16x1xf32>
    %466 = vector.broadcast %465 : vector<16x1xf32> to vector<16x64xf32>
    %467 = arith.cmpf oeq, %192, %466 : vector<16x64xf32>
    %468 = arith.extui %467 : vector<16x64xi1> to vector<16x64xi32>
    %469 = arith.sitofp %468 : vector<16x64xi32> to vector<16x64xf32>
    %470 = vector.broadcast %459 : vector<16x1xf32> to vector<16x4xf32>
    %471 = vector.broadcast %207 : vector<1x4xf32> to vector<16x4xf32>
    %472 = arith.mulf %470, %471 : vector<16x4xf32>
    %473 = arith.addf %439, %472 : vector<16x4xf32>
    %474 = vector.broadcast %213 : vector<1x64xf32> to vector<16x64xf32>
    %475 = arith.mulf %469, %474 : vector<16x64xf32>
    %cst_154 = arith.constant dense<0.000000e+00> : vector<16xf32>
    %476 = vector.multi_reduction <add>, %475, %cst_154 [1] : vector<16x64xf32> to vector<16xf32>
    %477 = vector.shape_cast %476 : vector<16xf32> to vector<16x1xf32>
    %478 = vector.broadcast %477 : vector<16x1xf32> to vector<16x4xf32>
    %479 = vector.broadcast %207 : vector<1x4xf32> to vector<16x4xf32>
    %480 = arith.mulf %478, %479 : vector<16x4xf32>
    %481 = arith.addf %447, %480 : vector<16x4xf32>
    %482 = vector.broadcast %214 : vector<1x64xf32> to vector<16x64xf32>
    %483 = arith.mulf %469, %482 : vector<16x64xf32>
    %cst_155 = arith.constant dense<0.000000e+00> : vector<16xf32>
    %484 = vector.multi_reduction <add>, %483, %cst_155 [1] : vector<16x64xf32> to vector<16xf32>
    %485 = vector.shape_cast %484 : vector<16xf32> to vector<16x1xf32>
    %486 = vector.broadcast %485 : vector<16x1xf32> to vector<16x4xf32>
    %487 = vector.broadcast %207 : vector<1x4xf32> to vector<16x4xf32>
    %488 = arith.mulf %486, %487 : vector<16x4xf32>
    %489 = arith.addf %455, %488 : vector<16x4xf32>
    %cst_156 = arith.constant -1.000000e+30 : f32
    %490 = vector.broadcast %cst_156 : f32 to vector<16x64xf32>
    %491 = arith.select %467, %490, %457 : vector<16x64xi1>, vector<16x64xf32>
    %cst_157 = arith.constant dense<0xFF800000> : vector<16xf32>
    %492 = vector.multi_reduction <maximumf>, %491, %cst_157 [1] : vector<16x64xf32> to vector<16xf32>
    %493 = vector.shape_cast %492 : vector<16xf32> to vector<16x1xf32>
    %494 = vector.broadcast %493 : vector<16x1xf32> to vector<16x64xf32>
    %495 = arith.cmpf oge, %491, %494 : vector<16x64xf32>
    %cst_158 = arith.constant 6.400000e+01 : f32
    %496 = vector.broadcast %cst_158 : f32 to vector<16x64xf32>
    %497 = arith.select %495, %192, %496 : vector<16x64xi1>, vector<16x64xf32>
    %cst_159 = arith.constant dense<0x7F800000> : vector<16xf32>
    %498 = vector.multi_reduction <minimumf>, %497, %cst_159 [1] : vector<16x64xf32> to vector<16xf32>
    %499 = vector.shape_cast %498 : vector<16xf32> to vector<16x1xf32>
    %500 = vector.broadcast %499 : vector<16x1xf32> to vector<16x64xf32>
    %501 = arith.cmpf oeq, %192, %500 : vector<16x64xf32>
    %502 = arith.extui %501 : vector<16x64xi1> to vector<16x64xi32>
    %503 = arith.sitofp %502 : vector<16x64xi32> to vector<16x64xf32>
    %504 = vector.broadcast %493 : vector<16x1xf32> to vector<16x4xf32>
    %505 = vector.broadcast %212 : vector<1x4xf32> to vector<16x4xf32>
    %506 = arith.mulf %504, %505 : vector<16x4xf32>
    %507 = arith.addf %473, %506 : vector<16x4xf32>
    %508 = vector.broadcast %213 : vector<1x64xf32> to vector<16x64xf32>
    %509 = arith.mulf %503, %508 : vector<16x64xf32>
    %cst_160 = arith.constant dense<0.000000e+00> : vector<16xf32>
    %510 = vector.multi_reduction <add>, %509, %cst_160 [1] : vector<16x64xf32> to vector<16xf32>
    %511 = vector.shape_cast %510 : vector<16xf32> to vector<16x1xf32>
    %512 = vector.broadcast %511 : vector<16x1xf32> to vector<16x4xf32>
    %513 = vector.broadcast %212 : vector<1x4xf32> to vector<16x4xf32>
    %514 = arith.mulf %512, %513 : vector<16x4xf32>
    %515 = arith.addf %481, %514 : vector<16x4xf32>
    %516 = vector.broadcast %214 : vector<1x64xf32> to vector<16x64xf32>
    %517 = arith.mulf %503, %516 : vector<16x64xf32>
    %cst_161 = arith.constant dense<0.000000e+00> : vector<16xf32>
    %518 = vector.multi_reduction <add>, %517, %cst_161 [1] : vector<16x64xf32> to vector<16xf32>
    %519 = vector.shape_cast %518 : vector<16xf32> to vector<16x1xf32>
    %520 = vector.broadcast %519 : vector<16x1xf32> to vector<16x4xf32>
    %521 = vector.broadcast %212 : vector<1x4xf32> to vector<16x4xf32>
    %522 = arith.mulf %520, %521 : vector<16x4xf32>
    %523 = arith.addf %489, %522 : vector<16x4xf32>
    %524 = vector.broadcast %216 : vector<16x1xf32> to vector<16x4xf32>
    %525 = arith.mulf %524, %515 : vector<16x4xf32>
    %c0_162 = arith.constant 0 : index
    %c0_163 = arith.constant 0 : index
    %526 = vector.load %arg24[%c0_162, %c0_163] : memref<4x128xf32, #tpu.memory_space<vmem>>, vector<4x128xf32>
    %cst_164 = arith.constant dense<0.000000e+00> : vector<16x128xf32>
    %527 = tpu.matmul %525, %526, %cst_164 {dimension_numbers = #tpu.dot_dimension_numbers<[1], [0], [0], [1], [0, 0, 1, 1], [], []>} : vector<16x4xf32>, vector<4x128xf32>, vector<16x128xf32> -> vector<16x128xf32>
    %528 = arith.negf %527 : vector<16x128xf32>
    %529 = math.exp %528 : vector<16x128xf32>
    %cst_165 = arith.constant 1.000000e+00 : f32
    %530 = vector.broadcast %cst_165 : f32 to vector<16x128xf32>
    %531 = arith.addf %530, %529 : vector<16x128xf32>
    %532 = arith.divf %530, %531 : vector<16x128xf32>
    %533 = arith.mulf %527, %532 : vector<16x128xf32>
    %c0_166 = arith.constant 0 : index
    %c0_167 = arith.constant 0 : index
    %534 = vector.load %arg25[%c0_166, %c0_167] : memref<4x128xf32, #tpu.memory_space<vmem>>, vector<4x128xf32>
    %cst_168 = arith.constant dense<0.000000e+00> : vector<16x128xf32>
    %535 = tpu.matmul %525, %534, %cst_168 {dimension_numbers = #tpu.dot_dimension_numbers<[1], [0], [0], [1], [0, 0, 1, 1], [], []>} : vector<16x4xf32>, vector<4x128xf32>, vector<16x128xf32> -> vector<16x128xf32>
    %536 = arith.mulf %533, %535 : vector<16x128xf32>
    %c0_169 = arith.constant 0 : index
    %c0_170 = arith.constant 0 : index
    %537 = vector.load %arg26[%c0_169, %c0_170] : memref<128x4xf32, #tpu.memory_space<vmem>>, vector<128x4xf32>
    %cst_171 = arith.constant dense<0.000000e+00> : vector<16x4xf32>
    %538 = tpu.matmul %536, %537, %cst_171 {dimension_numbers = #tpu.dot_dimension_numbers<[1], [0], [0], [1], [0, 0, 1, 1], [], []>} : vector<16x128xf32>, vector<128x4xf32>, vector<16x4xf32> -> vector<16x4xf32>
    %cst_172 = arith.constant dense<0xFF800000> : vector<16xf32>
    %539 = vector.multi_reduction <maximumf>, %507, %cst_172 [1] : vector<16x4xf32> to vector<16xf32>
    %540 = vector.shape_cast %539 : vector<16xf32> to vector<16x1xf32>
    %541 = vector.broadcast %540 : vector<16x1xf32> to vector<16x4xf32>
    %542 = arith.subf %507, %541 : vector<16x4xf32>
    %543 = math.exp %542 : vector<16x4xf32>
    %cst_173 = arith.constant dense<0.000000e+00> : vector<16xf32>
    %544 = vector.multi_reduction <add>, %543, %cst_173 [1] : vector<16x4xf32> to vector<16xf32>
    %545 = vector.shape_cast %544 : vector<16xf32> to vector<16x1xf32>
    %546 = tpu.reciprocal %545 {approx = true} : vector<16x1xf32> -> vector<16x1xf32>
    %547 = vector.broadcast %546 : vector<16x1xf32> to vector<16x4xf32>
    %548 = arith.mulf %543, %547 : vector<16x4xf32>
    %549 = arith.mulf %538, %548 : vector<16x4xf32>
    %550 = arith.mulf %549, %523 : vector<16x4xf32>
    %cst_174 = arith.constant dense<0.000000e+00> : vector<16xf32>
    %551 = vector.multi_reduction <add>, %550, %cst_174 [1] : vector<16x4xf32> to vector<16xf32>
    %552 = vector.shape_cast %551 : vector<16xf32> to vector<16x1xf32>
    %553 = arith.addf %385, %552 : vector<16x1xf32>
    %c0_175 = arith.constant 0 : index
    %c0_176 = arith.constant 0 : index
    %554 = vector.load %arg27[%c0_175, %c0_176] : memref<32x8xf32, #tpu.memory_space<vmem>>, vector<32x8xf32>
    %cst_177 = arith.constant dense<0.000000e+00> : vector<16x8xf32>
    %555 = tpu.matmul %177, %554, %cst_177 {dimension_numbers = #tpu.dot_dimension_numbers<[1], [0], [0], [1], [0, 0, 1, 1], [], []>} : vector<16x32xf32>, vector<32x8xf32>, vector<16x8xf32> -> vector<16x8xf32>
    %556 = arith.negf %555 : vector<16x8xf32>
    %557 = math.exp %556 : vector<16x8xf32>
    %cst_178 = arith.constant 1.000000e+00 : f32
    %558 = vector.broadcast %cst_178 : f32 to vector<16x8xf32>
    %559 = arith.addf %558, %557 : vector<16x8xf32>
    %560 = arith.divf %558, %559 : vector<16x8xf32>
    %561 = arith.mulf %555, %560 : vector<16x8xf32>
    %c0_179 = arith.constant 0 : index
    %c0_180 = arith.constant 0 : index
    %562 = vector.load %arg28[%c0_179, %c0_180] : memref<32x8xf32, #tpu.memory_space<vmem>>, vector<32x8xf32>
    %cst_181 = arith.constant dense<0.000000e+00> : vector<16x8xf32>
    %563 = tpu.matmul %177, %562, %cst_181 {dimension_numbers = #tpu.dot_dimension_numbers<[1], [0], [0], [1], [0, 0, 1, 1], [], []>} : vector<16x32xf32>, vector<32x8xf32>, vector<16x8xf32> -> vector<16x8xf32>
    %564 = arith.mulf %561, %563 : vector<16x8xf32>
    %c0_182 = arith.constant 0 : index
    %c0_183 = arith.constant 0 : index
    %565 = vector.load %arg29[%c0_182, %c0_183] : memref<8x32xf32, #tpu.memory_space<vmem>>, vector<8x32xf32>
    %cst_184 = arith.constant dense<0.000000e+00> : vector<16x32xf32>
    %566 = tpu.matmul %564, %565, %cst_184 {dimension_numbers = #tpu.dot_dimension_numbers<[1], [0], [0], [1], [0, 0, 1, 1], [], []>} : vector<16x8xf32>, vector<8x32xf32>, vector<16x32xf32> -> vector<16x32xf32>
    %567 = vector.broadcast %553 : vector<16x1xf32> to vector<16x32xf32>
    %568 = arith.addf %164, %567 : vector<16x32xf32>
    %569 = arith.addf %568, %566 : vector<16x32xf32>
    %c0_185 = arith.constant 0 : index
    %c0_186 = arith.constant 0 : index
    %570 = vector.load %arg30[%c0_185, %c0_186] : memref<16x32xf32, #tpu.memory_space<vmem>>, vector<16x32xf32>
    tpu.vector_store %arg30[%c0_185, %c0_186], %569 {strides = array<i32>} : memref<16x32xf32, #tpu.memory_space<vmem>>, vector<16x32xf32>,
    return
  }
}

</mosaic_0001>

<bundles_post_ra>
// kernel: tile.33
= control target key start
LH: loop header
LB: loop body
LE: loop exit
PB: predicated region body
PF: predicated region fallthrough
CT: control target
= control target key end

     0   :  { %s130_s0 = inlined_call_operand.vmem [shape: f32[8,4], index: 0, kind: input, shape index: {}]   ;;  %s131_s1 = inlined_call_operand.vmem [shape: f32[2,8,4,4], index: 1, kind: output, shape index: {}]  }
   0x1   :  { %v4_v0 = vld [vmem:[%s130_s0] ss:$0 sm:$0xff]  ;;  %v45_v1 = vld [vmem:[%s130_s0 + $0x1] ss:$0 sm:$0xff]  ;;  %v50_v2 = vld [vmem:[%s130_s0 + $0x2] ss:$0 sm:$0xff] }
   0x2   :  { %5 = vst [vmem:[%s131_s1] sm:$0x3] %v4_v0  ;;  %42 = vst [vmem:[%s131_s1 + $0x8] sm:$0x3] %v4_v0  ;;  %v55_v3 = vld [vmem:[%s130_s0 + $0x3] ss:$0 sm:$0xff] }
   0x3   :  { %43 = vst [vmem:[%s131_s1 + $0x10] sm:$0x3] %v4_v0  ;;  %44 = vst [vmem:[%s131_s1 + $0x18] sm:$0x3] %v4_v0 }
   0x4   :  { %46 = vst [vmem:[%s131_s1 + $0x2] sm:$0x3] %v45_v1  ;;  %47 = vst [vmem:[%s131_s1 + $0xa] sm:$0x3] %v45_v1 }
   0x5   :  { %48 = vst [vmem:[%s131_s1 + $0x12] sm:$0x3] %v45_v1  ;;  %49 = vst [vmem:[%s131_s1 + $0x1a] sm:$0x3] %v45_v1 }
   0x6   :  { %51 = vst [vmem:[%s131_s1 + $0x4] sm:$0x3] %v50_v2  ;;  %52 = vst [vmem:[%s131_s1 + $0xc] sm:$0x3] %v50_v2 }
   0x7   :  { %53 = vst [vmem:[%s131_s1 + $0x14] sm:$0x3] %v50_v2  ;;  %54 = vst [vmem:[%s131_s1 + $0x1c] sm:$0x3] %v50_v2 }
   0x8   :  { %56 = vst [vmem:[%s131_s1 + $0x6] sm:$0x3] %v55_v3  ;;  %57 = vst [vmem:[%s131_s1 + $0xe] sm:$0x3] %v55_v3 }
   0x9   :  { %58 = vst [vmem:[%s131_s1 + $0x16] sm:$0x3] %v55_v3  ;;  %59 = vst [vmem:[%s131_s1 + $0x1e] sm:$0x3] %v55_v3 }

// kernel: tile.34
= control target key start
LH: loop header
LB: loop body
LE: loop exit
PB: predicated region body
PF: predicated region fallthrough
CT: control target
= control target key end

     0   :  { %vm82_vm0 = vcmask 1047556   ;;  %vm84_vm1 = vcmask 64512   ;;  %vm103_vm2 = vcmask 130112   ;;  %s225_s0 = inlined_call_operand.vmem [shape: f32[2,8,4,4], index: 0, kind: input, shape index: {}]   ;;  %s226_s1 = inlined_call_operand.vmem [shape: f32[16,16], index: 1, kind: output, shape index: {}]  }
   0x1   :  { %v138_v0 = vld [vmem:[%s225_s0 + $0xe] sm:$0x3]  ;;  %v139_v1 = vld [vmem:[%s225_s0 + $0xc] sm:$0x3]  ;;  %v140_v2 = vld [vmem:[%s225_s0 + $0xa] sm:$0x3] }
   0x2   :  { %48 = vst [vmem:[#allocation0 + $0x38] sm:$0x3] %v138_v0  ;;  %53 = vst [vmem:[#allocation0 + $0x30] sm:$0x3] %v139_v1  ;;  %v141_v3 = vld [vmem:[%s225_s0 + $0x8] sm:$0x3] }
   0x3   :  { %58 = vst [vmem:[#allocation0 + $0x28] sm:$0x3] %v140_v2  ;;  %v142_v4 = vld [vmem:[%s225_s0 + $0x6] sm:$0x3]  ;;  %v143_v5 = vld [vmem:[%s225_s0 + $0x4] sm:$0x3] }
   0x4   :  { %63 = vst [vmem:[#allocation0 + $0x20] sm:$0x3] %v141_v3  ;;  %68 = vst [vmem:[#allocation0 + $0x18] sm:$0x3] %v142_v4  ;;  %v144_v6 = vld [vmem:[%s225_s0 + $0x2] sm:$0x3] }
   0x5   :  { %73 = vst [vmem:[#allocation0 + $0x10] sm:$0x3] %v143_v5  ;;  %v78_v7 = vld [vmem:[%s225_s0] sm:$0x3]  ;;  %77 = vst [vmem:[#allocation0 + $0x8] sm:$0x3] %v144_v6 }
   0x6   :  { %79 = vst [vmem:[#allocation0] sm:$0x3] %v78_v7  ;;  %v130_v8 = vld [vmem:[%s225_s0 + $0x1e] sm:$0x3]  ;;  %v131_v9 = vld [vmem:[%s225_s0 + $0x1c] sm:$0x3] }
   0x7   :  { %v132_v10 = vld [vmem:[%s225_s0 + $0x1a] sm:$0x3]  ;;  %8 = vst [vmem:[#allocation0 + $0x78] sm:$0x3] %v130_v8  ;;  %13 = vst [vmem:[#allocation0 + $0x70] sm:$0x3] %v131_v9 }
   0x8   :  { %18 = vst [vmem:[#allocation0 + $0x68] sm:$0x3] %v132_v10  ;;  %v133_v11 = vld [vmem:[%s225_s0 + $0x18] sm:$0x3]  ;;  %v134_v12 = vld [vmem:[%s225_s0 + $0x16] sm:$0x3] }
   0x9   :  { %v135_v13 = vld [vmem:[%s225_s0 + $0x14] sm:$0x3]  ;;  %23 = vst [vmem:[#allocation0 + $0x60] sm:$0x3] %v133_v11  ;;  %28 = vst [vmem:[#allocation0 + $0x58] sm:$0x3] %v134_v12 }
   0xa   :  { %33 = vst [vmem:[#allocation0 + $0x50] sm:$0x3] %v135_v13  ;;  %v136_v14 = vld [vmem:[%s225_s0 + $0x12] sm:$0x3]  ;;  %v137_v15 = vld [vmem:[%s225_s0 + $0x10] sm:$0x3] }
   0xb   :  { %38 = vst [vmem:[#allocation0 + $0x48] sm:$0x3] %v136_v14  ;;  %43 = vst [vmem:[#allocation0 + $0x40] sm:$0x3] %v137_v15  ;;  %s148_s0 = smov 8  }
   0xc   :  { %v98_v16 = vld [vmem:[#allocation0 + $0x1] ss:$8 sm:$0xf0]   ;;  %v81_v17 = vld [vmem:[#allocation0] ss:$8 sm:$0xf0]  }
   0xd   :  { %v96_v18 = vld [vmem:[#allocation0 + $0x1] ss:$8 sm:$0xf]   ;;  %v80_v19 = vld [vmem:[#allocation0] ss:$8 sm:$0xf]  }
   0xe   :  { %v100_v20 = vsel %vm82_vm0, %v98_v16, %v96_v18  ;;  %v83_v21 = vsel %vm82_vm0, %v81_v17, %v80_v19 }
   0xf   :  { %101 = vrot.lane.b32.xlu0 %v100_v20, %s148_s0  ;;  %85 = vst.msk [vmem:[%s226_s1] sm:$0xff] %vm84_vm1, %v83_v21  }
  0x10   :  { %v108_v22 = vld [vmem:[#allocation0 + $0x41] ss:$8 sm:$0xf0]   ;;  %v89_v23 = vld [vmem:[#allocation0 + $0x40] ss:$8 sm:$0xf0]  }
  0x12   :  { %v106_v24 = vld [vmem:[#allocation0 + $0x41] ss:$8 sm:$0xf]   ;;  %v87_v25 = vld [vmem:[#allocation0 + $0x40] ss:$8 sm:$0xf]  }
  0x13   :  { %v110_v26 = vsel %vm82_vm0, %v108_v22, %v106_v24  ;;  %v91_v27 = vsel %vm82_vm0, %v89_v23, %v87_v25 }
  0x14   :  { %145 = vst.msk [vmem:[%s226_s1 + $0x8] sm:$0xff] %vm84_vm1, %v91_v27   ;;  %111 = vrot.lane.b32.xlu0 %v110_v26, %s148_s0 }
  0x81   :  { %v102_v28 = vpop.permute.xlu0 %101  }
  0x82   :  { %104 = vst.msk [vmem:[%s226_s1] sm:$0xff] %vm103_vm2, %v102_v28  }
  0x86   :  { %v112_v29 = vpop.permute.xlu0 %111  }
  0x87   :  { %146 = vst.msk [vmem:[%s226_s1 + $0x8] sm:$0xff] %vm103_vm2, %v112_v29  }

// kernel: block_forward.1
= control target key start
LH: loop header
LB: loop body
LE: loop exit
PB: predicated region body
PF: predicated region fallthrough
CT: control target
= control target key end

     0   :  { %s4824_s6 = smov 1   ;;  %s4825_s10 = smov 2   ;;  %s5946_s0 = inlined_call_operand.smem [shape: u32[31], index: -1, kind: input, shape index: {}] }
   0x1   :  { %s4878_s5 = sld [smem:[%s5946_s0]]   ;;  %s4826_s14 = smov 3  }
   0x2   :  { %s4883_s9 = sld [smem:[%s5946_s0 + %s4824_s6]]   ;;  %s4827_s18 = smov 4  }
   0x3   :  { %s4888_s13 = sld [smem:[%s5946_s0 + %s4825_s10]]   ;;  %s4828_s22 = smov 5  }
   0x4   :  { %s4893_s17 = sld [smem:[%s5946_s0 + %s4826_s14]]   ;;  %s4829_s26 = smov 6  }
   0x5   :  { %s4898_s21 = sld [smem:[%s5946_s0 + %s4827_s18]]   ;;  %s4830_s30 = smov 7  }
   0x6   :  { %s4903_s25 = sld [smem:[%s5946_s0 + %s4828_s22]]   ;;  %s4831_s4 = smov 8  }
   0x7   :  { %s4908_s29 = sld [smem:[%s5946_s0 + %s4829_s26]]   ;;  %s4832_s10 = smov 9  }
   0x8   :  { %5953 = sst [smem:[#allocation5_spill]] %s4883_s9  ;;  %s4833_s15 = smov 10  }
   0x9   :  { %s4913_s3 = sld [smem:[%s5946_s0 + %s4830_s30]]   ;;  %s4834_s20 = smov 11  }
   0xa   :  { %s4918_s8 = sld [smem:[%s5946_s0 + %s4831_s4]]   ;;  %s4835_s26 = smov 12  }
   0xb   :  { %s4923_s14 = sld [smem:[%s5946_s0 + %s4832_s10]]   ;;  %s4836_s1 = smov 13  }
   0xc   :  { %s4928_s19 = sld [smem:[%s5946_s0 + %s4833_s15]]   ;;  %s4837_s7 = smov 14  }
   0xd   :  { %s4933_s24 = sld [smem:[%s5946_s0 + %s4834_s20]]   ;;  %s4838_s15 = smov 15  }
   0xe   :  { %s4938_s30 = sld [smem:[%s5946_s0 + %s4835_s26]]   ;;  %s4839_s22 = smov 16  }
   0xf   :  { %s4943_s6 = sld [smem:[%s5946_s0 + %s4836_s1]]   ;;  %s4840_s28 = smov 17  }
  0x10   :  { %s4948_s12 = sld [smem:[%s5946_s0 + %s4837_s7]]   ;;  %s4841_s7 = smov 18  }
  0x11   :  { %s4953_s20 = sld [smem:[%s5946_s0 + %s4838_s15]]   ;;  %s4842_s15 = smov 19  }
  0x12   :  { %s4958_s27 = sld [smem:[%s5946_s0 + %s4839_s22]]   ;;  %s4843_s22 = smov 20  }
  0x13   :  { %s4963_s4 = sld [smem:[%s5946_s0 + %s4840_s28]]   ;;  %s4844_s28 = smov 21  }
  0x14   :  { %s4968_s9 = sld [smem:[%s5946_s0 + %s4841_s7]]   ;;  %s4845_s7 = smov 22  }
  0x17   :  { %5954 = sst [smem:[#allocation6_spill]] %s4953_s20 }
  0x18   :  { %5955 = sst [smem:[#allocation7_spill]] %s4958_s27 }
  0x19   :  { %5956 = sst [smem:[#allocation8_spill]] %s4963_s4 }
  0x1a   :  { %5957 = sst [smem:[#allocation9_spill]] %s4968_s9 }
  0x1b   :  { %s4973_s20 = sld [smem:[%s5946_s0 + %s4842_s15]]   ;;  %s4846_s15 = smov 23  }
  0x1c   :  { %s4978_s27 = sld [smem:[%s5946_s0 + %s4843_s22]]   ;;  %s4847_s22 = smov 24  }
  0x1d   :  { %s4983_s4 = sld [smem:[%s5946_s0 + %s4844_s28]]   ;;  %s4848_s28 = smov 25  }
  0x1e   :  { %s4988_s9 = sld [smem:[%s5946_s0 + %s4845_s7]]   ;;  %s4849_s7 = smov 26  }
  0x21   :  { %5958 = sst [smem:[#allocation10_spill]] %s4973_s20 }
  0x22   :  { %5959 = sst [smem:[#allocation11_spill]] %s4978_s27 }
  0x23   :  { %5960 = sst [smem:[#allocation12_spill]] %s4983_s4 }
  0x24   :  { %5961 = sst [smem:[#allocation13_spill]] %s4988_s9 }
  0x25   :  { %s4993_s20 = sld [smem:[%s5946_s0 + %s4846_s15]]   ;;  %s4850_s15 = smov 27  }
  0x26   :  { %s4998_s27 = sld [smem:[%s5946_s0 + %s4847_s22]]   ;;  %s4851_s22 = smov 28  }
  0x27   :  { %s5003_s4 = sld [smem:[%s5946_s0 + %s4848_s28]]   ;;  %s4852_s28 = smov 29  }
  0x28   :  { %s5008_s9 = sld [smem:[%s5946_s0 + %s4849_s7]]   ;;  %s4853_s7 = smov 30  }
  0x2b   :  { %5962 = sst [smem:[#allocation14_spill]] %s4993_s20 }
  0x2c   :  { %5963 = sst [smem:[#allocation15_spill]] %s4998_s27 }
  0x2d   :  { %5964 = sst [smem:[#allocation16_spill]] %s5003_s4 }
  0x2e   :  { %5965 = sst [smem:[#allocation17_spill]] %s5008_s9 }
  0x2f   :  { %s5013_s20 = sld [smem:[%s5946_s0 + %s4850_s15]]  }
  0x30   :  { %s5018_s27 = sld [smem:[%s5946_s0 + %s4851_s22]]  }
  0x31   :  { %s5023_s4 = sld [smem:[%s5946_s0 + %s4852_s28]]  }
  0x32   :  { %s5028_s9 = sld [smem:[%s5946_s0 + %s4853_s7]]  }
  0x33   :  { %v5031_v0 = vld [vmem:[%s4878_s5] sm:$0xff]  ;;  %vm134_vm0 = vcmask 261120   ;;  %v5034_v1 = vld [vmem:[%s4878_s5 + $0x8] sm:$0xff] }
  0x34   :  { %66 = vsyncpa [#allocation3], 0  ;;  %v132_v2 = vmul.f32 %v5031_v0, %v5031_v0  ;;  %v133_v3 = vmul.f32 %v5034_v1, %v5034_v1  ;;  %v158_v6 = vld [vmem:[%s4923_s14] sm:$0xff]  ;;  %v159_v7 = vld [vmem:[%s4923_s14 + $0x8] sm:$0xff]  ;;  %vm246_vm1 = vcmask 130048   ;;  %s4854_s0 = smov 96  }
  0x35   :  { %v160_v8 = vld [vmem:[%s4923_s14 + $0x10] sm:$0xff]  ;;  %v4409_v9 = vpack.c.bf16 %v159_v7, %v158_v6  ;;  %v161_v10 = vld [vmem:[%s4923_s14 + $0x18] sm:$0xff]  ;;  %v3838_v19 = vld [vmem:[%s4918_s8] ss:$0 sm:$0xff]  ;;  %s4855_s5 = smov 112   ;;  %vm564_vm2 = vcmask 1043456  }
  0x36   :  { %v135_v4 = vsel %vm134_vm0, %v132_v2, 0.0  ;;  %v138_v5 = vsel %vm134_vm0, %v133_v3, 0.0  ;;  %v4413_v11 = vpack.c.bf16 %v161_v10, %v160_v8  ;;  %v270_v31 = vld [vmem:[%s4933_s24] sm:$0xff]  ;;  %v271_v32 = vld [vmem:[%s4933_s24 + $0x8] sm:$0xff]  ;;  %v355_v48 = vld [vmem:[%s4938_s30 + $0x10] sm:$0xff]  ;;  %vm559_vm3 = vcmask 31744  }
  0x37   :  { %136 = vadd.xlane.f32.xlu0 %v135_v4  ;;  %4410 = vmatprep.subr.bf16.mxu0 %v4409_v9  ;;  %v4417_v33 = vpack.c.bf16 %v271_v32, %v270_v31  ;;  %v353_v34 = vld [vmem:[%s4938_s30] sm:$0xff]  ;;  %v354_v35 = vld [vmem:[%s4938_s30 + $0x8] sm:$0xff]  ;;  %v356_v49 = vld [vmem:[%s4938_s30 + $0x18] sm:$0xff]  ;;  %vm5952_vm4 = vcmask 64512   ;;  %s4861_s8 = smov 84   ;;  %s5971_s14 = sld [smem:[#allocation6_spill]] }
  0x38   :  { %4412 = vmatpush3.bf16.msra.mxu0 %v4409_v9  ;;  %v4421_v36 = vpack.c.bf16 %v354_v35, %v353_v34  ;;  %v3841_v44 = vld [vmem:[%s4928_s19] ss:$0 sm:$0xff]  ;;  %v4425_v52 = vpack.c.bf16 %v356_v49, %v355_v48  ;;  %v670_v62 = vld [vmem:[%s4913_s3 + $0x8] sm:$0xff]  ;;  %vm5128_vm5 = vmpackc.low %vm559_vm3, %vm559_vm3  ;;  %s4862_s19 = smov 104   ;;  %s4863_s24 = smov 80   ;;  %vm2502_vm7 = vcmask 523264  }
  0x39   :  { %4414 = vmatprep.subr.bf16.mxu0 %v4413_v11  ;;  %4418 = vmatprep.subr.bf16.mxu1 %v4417_v33  ;;  %v669_v61 = vld [vmem:[%s4913_s3] sm:$0xff]  ;;  %v658_v3 = vld [vmem:[%s4898_s21 + $0x8] sm:$0xff]  ;;  %s4856_s3 = smov 32   ;;  %vm5134_vm6 = vmpackc.low %vm5952_vm4, %vm5952_vm4  ;;  %s4864_s30 = smov 72   ;;  %vm3028_vm12 = vcmask 1048064  }
  0x3a   :  { %4420 = vmatpush3.bf16.msra.mxu1 %v4417_v33  ;;  %v4433_v63 = vpack.c.bf16 %v670_v62, %v669_v61  ;;  %v657_v2 = vld [vmem:[%s4898_s21] sm:$0xff]  ;;  %v541_v31 = vld [vmem:[%s4888_s13 + $0x8] sm:$0xff]  ;;  %s4857_s21 = smov 16   ;;  %s5974_s15 = sld [smem:[#allocation12_spill]] }
  0x3b   :  { %139 = vadd.xlane.f32.xlu0 %v138_v5  ;;  %4422 = vmatprep.subr.bf16.mxu1 %v4421_v36  ;;  %v457_v4 = vld [vmem:[%s4948_s12] sm:$0xff]  ;;  %v458_v5 = vld [vmem:[%s4948_s12 + $0x8] sm:$0xff]  ;;  %s5973_s12 = sld [smem:[#allocation7_spill]]  ;;  %s5975_s16 = sld [smem:[#allocation9_spill]] }
  0x3c   :  { %4416 = vmatpush3.bf16.msra.mxu0 %v4413_v11  ;;  %v4429_v6 = vpack.c.bf16 %v458_v5, %v457_v4  ;;  %v552_v7 = vld [vmem:[%s4908_s29] sm:$0xf]  ;;  %v644_v35 = vld [vmem:[%s4893_s17 + $0x8] sm:$0xff]  ;;  %s4860_s29 = smov 88   ;;  %s5976_s18 = sld [smem:[#allocation10_spill]] }
  0x3d   :  { %v540_v32 = vld [vmem:[%s4888_s13] sm:$0xff]  ;;  %s5966_s13 = sld [smem:[#allocation5_spill]]  ;;  %s5977_s22 = sld [smem:[#allocation11_spill]] }
  0x3e   :  { %4430 = vmatprep.subr.bf16.mxu0 %v4429_v6  ;;  %s4865_s23 = smov 64   ;;  %s5978_s26 = sld [smem:[#allocation13_spill]] }
  0x3f   :  { %s5979_s28 = sld [smem:[#allocation15_spill]]  ;;  %s5980_s1 = sld [smem:[#allocation16_spill]] }
  0x40   :  { %s5981_s2 = sld [smem:[#allocation17_spill]]  ;;  %s5982_s7 = sld [smem:[#allocation14_spill]] }
  0xc4   :  { %v137_v12 = vpop.xlane.xlu0 %136 }
  0xc5   :  { %v142_v13 = vmul.f32 0.03125, %v137_v12 }
  0xc7   :  { %v144_v14 = vadd.f32 1e-05, %v142_v13 }
  0xc8   :  { %v140_v15 = vpop.xlane.xlu0 %139 }
  0xc9   :  { %4712 = vrsqrt.f32 %v144_v14  ;;  %v143_v16 = vmul.f32 0.03125, %v140_v15 }
  0xcb   :  { %v145_v17 = vadd.f32 1e-05, %v143_v16 }
  0xcd   :  { %4714 = vrsqrt.f32 %v145_v17 }
  0xd3   :  { %v4713_v18 = vpop.eup %4712 }
  0xd4   :  { %v148_v20 = vmul.f32 %v4713_v18, %v5031_v0  ;;  %v3846_v18 = vld [vmem:[%s4943_s6] ss:$0 sm:$0xff]  ;;  %s5972_s6 = sld [smem:[#allocation8_spill]] }
  0xd6   :  { %v156_v21 = vmul.f32 %v3838_v19, %v148_v20 }
  0xd7   :  { %v4715_v22 = vpop.eup %4714 }
  0xd8   :  { %v149_v23 = vmul.f32 %v4715_v22, %v5034_v1  ;;  %4126 = vmatprep.mubr.msk.f32.mxu0 %vm134_vm0, %v156_v21 }
  0xda   :  { %v157_v24 = vmul.f32 %v3838_v19, %v149_v23 }
  0xdc   :  { %4127 = vmatmul.mubr.msk.f32.vlgmr.msra.gmra.mrb[0].mxu0 %vm134_vm0, %v157_v24 }
  0xdd   :  { %4432 = vmatpush3.bf16.msra.mxu0 %v4429_v6 }
  0xde   :  { %4154 = vmatprep.subr.msk.mxu0 %vm564_vm2, %v552_v7 }
 0x1af   :  { %v4128_v25 = vpop.f32.mrb[0].mxu0 }
 0x1b0   :  { %v234_v26 = vpop.f32.mrb[1].mxu0  ;;  %v245_v28 = vmul.f32 %v4128_v25, %v4128_v25 }
 0x1b1   :  { %v244_v27 = vmul.f32 %v234_v26, %v234_v26 }
 0x1b2   :  { %v250_v30 = vsel %vm246_vm1, %v245_v28, 0.0 }
 0x1b3   :  { %v247_v29 = vsel %vm246_vm1, %v244_v27, 0.0 }
 0x1b4   :  { %248 = vadd.xlane.f32.xlu1 %v247_v29 }
 0x1b8   :  { %251 = vadd.xlane.f32.xlu1 %v250_v30 }
 0x241   :  { %v249_v37 = vpop.xlane.xlu1 %248 }
 0x242   :  { %v254_v38 = vmul.f32 0.0625, %v249_v37 }
 0x244   :  { %v256_v39 = vadd.f32 1e-05, %v254_v38  ;;  %v643_v38 = vld [vmem:[%s4893_s17] sm:$0xff]  ;;  %s4858_s17 = smov 120  }
 0x245   :  { %v252_v40 = vpop.xlane.xlu1 %251 }
 0x246   :  { %4716 = vrsqrt.f32 %v256_v39  ;;  %v255_v41 = vmul.f32 0.0625, %v252_v40 }
 0x248   :  { %v257_v42 = vadd.f32 1e-05, %v255_v41 }
 0x24a   :  { %4718 = vrsqrt.f32 %v257_v42 }
 0x250   :  { %v4717_v43 = vpop.eup %4716 }
 0x251   :  { %v260_v45 = vmul.f32 %v4717_v43, %v234_v26  ;;  %v756_v26 = vld [vmem:[%s4903_s25] sm:$0xff] }
 0x253   :  { %v268_v46 = vmul.f32 %v3841_v44, %v260_v45 }
 0x254   :  { %v4719_v47 = vpop.eup %4718 }
 0x255   :  { %v261_v50 = vmul.f32 %v4719_v47, %v4128_v25  ;;  %4133 = vmatprep.mubr.msk.f32.mxu1 %vm246_vm1, %v268_v46  ;;  %v757_v25 = vld [vmem:[%s4903_s25 + $0x8] sm:$0xff]  ;;  %s4859_s25 = smov 92  }
 0x257   :  { %v269_v51 = vmul.f32 %v3841_v44, %v261_v50 }
 0x259   :  { %4134 = vmatmul.mubr.msk.f32.vlgmr.msra.gmra.mrb[0].mxu1 %vm246_vm1, %v269_v51 }
 0x25a   :  { %4424 = vmatpush3.bf16.msra.mxu1 %v4421_v36  ;;  %4144 = vmatprep.mubr.msk.f32.mxu1 %vm134_vm0, %v156_v21 }
 0x25b   :  { %4426 = vmatprep.subr.bf16.mxu1 %v4425_v52 }
 0x25e   :  { %4428 = vmatpush3.bf16.msra.mxu1 %v4425_v52 }
 0x25f   :  { %4434 = vmatprep.subr.bf16.mxu1 %v4433_v63 }
 0x261   :  { %4145 = vmatmul.mubr.msk.f32.vlgmr.msra.gmra.mrb[2].mxu1 %vm134_vm0, %v157_v24 }
 0x262   :  { %4436 = vmatpush3.bf16.msra.mxu1 %v4433_v63 }
 0x32c   :  { %v5064_v53 = vpop.f32.mrb[0].mxu1 }
 0x32d   :  { %v5066_v54 = vpop.f32.mrb[1].mxu1 }
 0x334   :  { %v5068_v55 = vpop.f32.mrb[2].mxu1 }
 0x335   :  { %v5070_v56 = vpop.f32.mrb[3].mxu1  ;;  %v434_v57 = vmul.f32 %v5068_v55, %v5068_v55 }
 0x336   :  { %v433_v58 = vmul.f32 %v5070_v56, %v5070_v56 }
 0x337   :  { %v438_v59 = vsel %vm246_vm1, %v434_v57, 0.0 }
 0x338   :  { %439 = vadd.xlane.f32.xlu1 %v438_v59  ;;  %v435_v60 = vsel %vm246_vm1, %v433_v58, 0.0 }
 0x339   :  { %436 = vadd.xlane.f32.xlu0 %v435_v60 }
 0x349   :  { %675 = vrot.lane.b32.xlu1 %v5064_v53, %s4854_s0 }
 0x34d   :  { %555 = vrot.lane.b32.xlu1 %v5070_v56, %s4855_s5 }
 0x34f   :  { %673 = vrot.lane.b32.xlu0 %v5066_v54, %s4854_s0 }
 0x351   :  { %557 = vrot.lane.b32.xlu1 %v5068_v55, %s4855_s5 }
 0x353   :  { %661 = vrot.lane.b32.xlu0 %v657_v2, %s4856_s3 }
 0x355   :  { %663 = vrot.lane.b32.xlu1 %v658_v3, %s4856_s3 }
 0x3c5   :  { %v440_v8 = vpop.xlane.xlu1 %439 }
 0x3c6   :  { %v442_v9 = vmul.f32 0.0625, %v440_v8  ;;  %v437_v10 = vpop.xlane.xlu0 %436 }
 0x3c7   :  { %v441_v11 = vmul.f32 0.0625, %v437_v10 }
 0x3c8   :  { %v444_v12 = vadd.f32 1e-05, %v442_v9  ;;  %v5159_v9 = vld [vmem:[%s5966_s13 + $0x8] sm:$0xff] }
 0x3c9   :  { %v443_v13 = vadd.f32 1e-05, %v441_v11  ;;  %v676_v15 = vpop.permute.xlu1 %675 }
 0x3ca   :  { %4720 = vrsqrt.f32 %v444_v12  ;;  %v674_v14 = vpop.permute.xlu0 %673  ;;  %v5162_v12 = vld [vmem:[%s5966_s13] sm:$0xff] }
 0x3cb   :  { %4722 = vrsqrt.f32 %v443_v13  ;;  %4163 = vmatprep.mubr.msk.f32.mxu1 %vm246_vm1, %v674_v14 }
 0x3cc   :  { %4164 = vmatmul.mubr.msk.f32.vlgmr.msra.gmra.mrb[4].mxu1 %vm246_vm1, %v676_v15 }
 0x3cd   :  { %v556_v21 = vpop.permute.xlu1 %555 }
 0x3ce   :  { %v662_v44 = vpop.permute.xlu0 %661 }
 0x3cf   :  { %v667_v46 = vmul.f32 %v662_v44, %v5066_v54 }
 0x3d1   :  { %v558_v24 = vpop.permute.xlu1 %557 }
 0x3d4   :  { %v4721_v16 = vpop.eup %4720 }
 0x3d5   :  { %v4723_v17 = vpop.eup %4722  ;;  %v448_v19 = vmul.f32 %v4721_v16, %v5068_v55  ;;  %v664_v43 = vpop.permute.xlu1 %663 }
 0x3d6   :  { %v447_v20 = vmul.f32 %v4723_v17, %v5070_v56  ;;  %v668_v45 = vmul.f32 %v5064_v53, %v664_v43 }
 0x3d7   :  { %v456_v23 = vmul.f32 %v3846_v18, %v448_v19 }
 0x3d8   :  { %v455_v22 = vmul.f32 %v3846_v18, %v447_v20 }
 0x3da   :  { %4151 = vmatprep.mubr.msk.f32.mxu0 %vm246_vm1, %v455_v22 }
 0x3db   :  { %4152 = vmatmul.mubr.msk.f32.vlgmr.msra.gmra.mrb[2].mxu0 %vm246_vm1, %v456_v23 }
 0x3dc   :  { %4155 = vmatpush3.msk.msra.mxu0 %vm564_vm2, %v552_v7  ;;  %4156 = vmatprep.mubr.msk.f32.mxu0 %vm559_vm3, %v556_v21 }
 0x3df   :  { %4157 = vmatmul.mubr.msk.f32.vlgmr.msra.gmra.mrb[4].mxu0 %vm559_vm3, %v558_v24 }
 0x49f   :  { %v4165_v27 = vpop.f32.mrb[4].mxu1 }
 0x4a0   :  { %v759_v28 = vmul.f32 %v4165_v27, %v757_v25  ;;  %v747_v29 = vpop.f32.mrb[5].mxu1 }
 0x4a1   :  { %v758_v30 = vmul.f32 %v756_v26, %v747_v29 }
 0x4a2   :  { %764 = vrot.lane.b32.xlu1 %v759_v28, %s4856_s3 }
 0x4a3   :  { %762 = vrot.lane.b32.xlu0 %v758_v30, %s4856_s3 }
 0x4a6   :  { %546 = vrot.lane.b32.xlu1 %v541_v31, %s4857_s21 }
 0x4a7   :  { %544 = vrot.lane.b32.xlu0 %v540_v32, %s4857_s21 }
 0x4ae   :  { %v4153_v33 = vpop.f32.mrb[2].mxu0 }
 0x4af   :  { %v531_v34 = vpop.f32.mrb[3].mxu0 }
 0x4b0   :  { %v4443_v36 = vpack.c.bf16 %v4153_v33, %v531_v34  ;;  %v5113_v37 = vpack.i.bf16 %v4153_v33, %v531_v34 }
 0x4b2   :  { %v4158_v39 = vpop.f32.mrb[4].mxu0 }
 0x4b3   :  { %v646_v40 = vmul.f32 %v4158_v39, %v644_v35  ;;  %v634_v41 = vpop.f32.mrb[5].mxu0 }
 0x4b4   :  { %v645_v42 = vmul.f32 %v643_v38, %v634_v41 }
 0x4b5   :  { %651 = vrot.lane.b32.xlu1 %v646_v40, %s4857_s21 }
 0x4b6   :  { %649 = vrot.lane.b32.xlu0 %v645_v42, %s4857_s21 }
 0x514   :  { %v765_v47 = vpop.permute.xlu1 %764 }
 0x515   :  { %v769_v48 = vadd.f32 %v765_v47, %v668_v45  ;;  %v763_v49 = vpop.permute.xlu0 %762 }
 0x516   :  { %v768_v50 = vadd.f32 %v763_v49, %v667_v46 }
 0x518   :  { %v5118_v51 = vpack.i.bf16 %v769_v48, %v768_v50  ;;  %v547_v52 = vpop.permute.xlu1 %546 }
 0x519   :  { %v545_v57 = vpop.permute.xlu0 %544  ;;  %v551_v58 = vmul.f32 %v5068_v55, %v547_v52 }
 0x51a   :  { %4658 = vrot.lane.b32.xlu0 %v5118_v51, %s4854_s0  ;;  %v550_v59 = vmul.f32 %v545_v57, %v5070_v56 }
 0x527   :  { %v652_v60 = vpop.permute.xlu1 %651 }
 0x528   :  { %v656_v61 = vadd.f32 %v652_v60, %v551_v58  ;;  %v650_v62 = vpop.permute.xlu0 %649 }
 0x529   :  { %v655_v63 = vadd.f32 %v650_v62, %v550_v59 }
 0x52a   :  { %778 = vrot.lane.b32.xlu0 %v656_v61, %s4855_s5 }
 0x52b   :  { %776 = vrot.lane.b32.xlu1 %v655_v63, %s4855_s5 }
 0x58c   :  { %v4659_v2 = vpop.permute.xlu0 %4658 }
 0x58d   :  { %v4661_v3 = vunpack.i.h.bf16 %v4659_v2  ;;  %v4660_v4 = vunpack.i.l.bf16 %v4659_v2 }
 0x58f   :  { %v4437_v55 = vpack.c.bf16 %v4661_v3, %v4660_v4 }
 0x591   :  { %4439 = vmatprep.subr.msk.bf16.mxu0 %vm5128_vm5, %v4437_v55 }
 0x592   :  { %4442 = vmatpush3.bf16.xpose.msk.msra.mxu0 %vm5128_vm5, %v4437_v55 }
 0x593   :  { %4445 = vmatprep.subr.msk.bf16.mxu0 %vm5134_vm6, %v4443_v36 }
 0x59c   :  { %v5146_v7 = vpop.permute.xlu0 %778 }
 0x59d   :  { %v5144_v6 = vpop.permute.xlu1 %776 }
 0x59e   :  { %4170 = vmatprep.mubr.msk.f32.mxu0 %vm559_vm3, %v5144_v6 }
 0x59f   :  { %4171 = vmatmul.mubr.msk.f32.vlgmr.msra.gmra.mrb[6].mxu0 %vm559_vm3, %v5146_v7 }
 0x5a0   :  { %4448 = vmatpush3.bf16.xpose.msk.msra.mxu0 %vm5134_vm6, %v4443_v36  ;;  %4177 = vmatprep.mubr.msk.f32.mxu0 %vm5952_vm4, %v5066_v54 }
 0x5a7   :  { %4178 = vmatmul.mubr.msk.f32.vlgmr.msra.gmra.mrb[6].mxu0 %vm5952_vm4, %v5064_v53 }
 0x67a   :  { %v4179_v8 = vpop.f32.mrb[6].mxu0 }
 0x67b   :  { %v956_v10 = vmul.f32 0.35355338, %v4179_v8  ;;  %v946_v11 = vpop.f32.mrb[7].mxu0 }
 0x67c   :  { %v955_v13 = vmul.f32 0.35355338, %v946_v11 }
 0x67d   :  { %v958_v14 = vadd.f32 %v956_v10, %v5159_v9 }
 0x67e   :  { %v957_v15 = vadd.f32 %v955_v13, %v5162_v12 }
 0x67f   :  { %v962_v16 = vsel %vm246_vm1, %v958_v14, -inf }
 0x680   :  { %963 = vmax.xlane.f32.xlu0 %v962_v16  ;;  %v959_v17 = vsel %vm246_vm1, %v957_v15, -inf }
 0x681   :  { %960 = vmax.xlane.f32.xlu1 %v959_v17 }
 0x692   :  { %4663 = vrot.lane.b32.xlu1 %v5113_v37, %s4854_s0 }
 0x696   :  { %4673 = vrot.lane.b32.xlu1 %v5113_v37, %s4858_s17 }
 0x69a   :  { %1151 = vrot.lane.b32.xlu1 %v5066_v54, %s4858_s17 }
 0x69e   :  { %1153 = vrot.lane.b32.xlu1 %v5064_v53, %s4858_s17 }
 0x6a2   :  { %4683 = vrot.lane.b32.xlu1 %v5113_v37, %s4855_s5 }
 0x6a6   :  { %1602 = vrot.lane.b32.xlu1 %v5064_v53, %s4855_s5 }
 0x70d   :  { %v964_v18 = vpop.xlane.xlu0 %963 }
 0x70e   :  { %v966_v19 = vsub.f32 %v958_v14, %v964_v18  ;;  %v961_v20 = vpop.xlane.xlu1 %960 }
 0x70f   :  { %v965_v21 = vsub.f32 %v957_v15, %v961_v20 }
 0x710   :  { %v969_v22 = vmul.f32 1.442695, %v966_v19 }
 0x711   :  { %v967_v23 = vmul.f32 1.442695, %v965_v21 }
 0x712   :  { %4724 = vpow2.f32 %v969_v22  ;;  %v4664_v24 = vpop.permute.xlu1 %4663 }
 0x713   :  { %v4666_v25 = vunpack.i.h.bf16 %v4664_v24  ;;  %v4665_v26 = vunpack.i.l.bf16 %v4664_v24  ;;  %4726 = vpow2.f32 %v967_v23 }
 0x715   :  { %v4449_v27 = vpack.c.bf16 %v4666_v25, %v4665_v26 }
 0x716   :  { %v4674_v38 = vpop.permute.xlu1 %4673 }
 0x717   :  { %4450 = vmatprep.subr.bf16.mxu1 %v4449_v27  ;;  %v4676_v42 = vunpack.i.h.bf16 %v4674_v38  ;;  %v4675_v43 = vunpack.i.l.bf16 %v4674_v38 }
 0x718   :  { %4452 = vmatpush3.bf16.msra.mxu1 %v4449_v27 }
 0x719   :  { %v4459_v47 = vpack.c.bf16 %v4676_v42, %v4675_v43 }
 0x71a   :  { %v1152_v44 = vpop.permute.xlu1 %1151 }
 0x71c   :  { %v4725_v28 = vpop.eup %4724 }
 0x71d   :  { %v974_v29 = vsel %vm246_vm1, %v4725_v28, 0.0  ;;  %v4727_v30 = vpop.eup %4726 }
 0x71e   :  { %975 = vadd.xlane.f32.xlu0 %v974_v29  ;;  %v971_v31 = vsel %vm246_vm1, %v4727_v30, 0.0  ;;  %v1154_v49 = vpop.permute.xlu1 %1153 }
 0x722   :  { %972 = vadd.xlane.f32.xlu0 %v971_v31  ;;  %v4684_v58 = vpop.permute.xlu1 %4683 }
 0x723   :  { %v4686_v59 = vunpack.i.h.bf16 %v4684_v58  ;;  %v4685_v60 = vunpack.i.l.bf16 %v4684_v58 }
 0x725   :  { %v4475_v61 = vpack.c.bf16 %v4686_v59, %v4685_v60 }
 0x726   :  { %v1603_v63 = vpop.permute.xlu1 %1602 }
 0x738   :  { %4668 = vrot.lane.b32.xlu0 %v5118_v51, %s4859_s25 }
 0x73c   :  { %4678 = vrot.lane.b32.xlu0 %v5118_v51, %s4860_s29 }
 0x740   :  { %1600 = vrot.lane.b32.xlu0 %v5066_v54, %s4855_s5 }
 0x7ab   :  { %v976_v32 = vpop.xlane.xlu0 %975 }
 0x7ac   :  { %4728 = vrcp.f32 %v976_v32 }
 0x7af   :  { %v973_v33 = vpop.xlane.xlu0 %972 }
 0x7b0   :  { %4730 = vrcp.f32 %v973_v33 }
 0x7b3   :  { %v4669_v34 = vpop.permute.xlu0 %4668 }
 0x7b4   :  { %v4671_v35 = vunpack.i.h.bf16 %v4669_v34  ;;  %v4670_v36 = vunpack.i.l.bf16 %v4669_v34 }
 0x7b6   :  { %v4453_v39 = vpack.c.bf16 %v4671_v35, %v4670_v36  ;;  %v4729_v40 = vpop.eup %4728 }
 0x7b7   :  { %v980_v46 = vmul.f32 %v4729_v40, %v4725_v28  ;;  %v4679_v48 = vpop.permute.xlu0 %4678 }
 0x7b8   :  { %4455 = vmatprep.subr.msk.bf16.mxu1 %vm5128_vm5, %v4453_v39  ;;  %v4681_v50 = vunpack.i.h.bf16 %v4679_v48  ;;  %v4680_v52 = vunpack.i.l.bf16 %v4679_v48 }
 0x7ba   :  { %v4731_v41 = vpop.eup %4730  ;;  %v4469_v57 = vpack.c.bf16 %v4681_v50, %v4680_v52 }
 0x7bb   :  { %v979_v45 = vmul.f32 %v4731_v41, %v4727_v30  ;;  %v1601_v62 = vpop.permute.xlu0 %1600 }
 0x7bd   :  { %4184 = vmatprep.mubr.msk.f32.mxu1 %vm246_vm1, %v979_v45 }
 0x7be   :  { %4185 = vmatmul.mubr.msk.f32.vlgmr.msra.gmra.mrb[6].mxu1 %vm246_vm1, %v980_v46 }
 0x7bf   :  { %4458 = vmatpush3.bf16.xpose.msk.msra.mxu1 %vm5128_vm5, %v4453_v39  ;;  %4191 = vmatprep.mubr.msk.f32.mxu1 %vm559_vm3, %v5144_v6 }
 0x7c0   :  { %4461 = vmatprep.subr.msk.bf16.mxu1 %vm5134_vm6, %v4459_v47 }
 0x7c6   :  { %4192 = vmatmul.mubr.msk.f32.vlgmr.msra.gmra.mrb[8].mxu1 %vm559_vm3, %v5146_v7 }
 0x7c7   :  { %4464 = vmatpush3.bf16.xpose.msk.msra.mxu1 %vm5134_vm6, %v4459_v47  ;;  %4198 = vmatprep.mubr.msk.f32.mxu1 %vm5952_vm4, %v1152_v44 }
 0x7c8   :  { %4471 = vmatprep.subr.msk.bf16.mxu1 %vm5128_vm5, %v4469_v57 }
 0x7ce   :  { %4199 = vmatmul.mubr.msk.f32.vlgmr.msra.gmra.mrb[8].mxu1 %vm5952_vm4, %v1154_v49 }
 0x7cf   :  { %4474 = vmatpush3.bf16.xpose.msk.msra.mxu1 %vm5128_vm5, %v4469_v57  ;;  %4222 = vmatprep.mubr.msk.f32.mxu1 %vm559_vm3, %v5144_v6 }
 0x7d0   :  { %4477 = vmatprep.subr.msk.bf16.mxu1 %vm5134_vm6, %v4475_v61 }
 0x7d6   :  { %4223 = vmatmul.mubr.msk.f32.vlgmr.msra.gmra.mrb[10].mxu1 %vm559_vm3, %v5146_v7 }
 0x7d7   :  { %4480 = vmatpush3.bf16.xpose.msk.msra.mxu1 %vm5134_vm6, %v4475_v61  ;;  %4229 = vmatprep.mubr.msk.f32.mxu1 %vm5952_vm4, %v1601_v62 }
 0x7de   :  { %4230 = vmatmul.mubr.msk.f32.vlgmr.msra.gmra.mrb[10].mxu1 %vm5952_vm4, %v1603_v63 }
 0x891   :  { %v5214_v2 = vpop.f32.mrb[6].mxu1 }
 0x892   :  { %v5216_v3 = vpop.f32.mrb[7].mxu1 }
 0x8a1   :  { %v4200_v4 = vpop.f32.mrb[8].mxu1 }
 0x8a2   :  { %v1243_v55 = vmul.f32 0.35355338, %v4200_v4  ;;  %v1233_v8 = vpop.f32.mrb[9].mxu1 }
 0x8a3   :  { %v1242_v10 = vmul.f32 0.35355338, %v1233_v8 }
 0x8a4   :  { %v1245_v11 = vadd.f32 %v1243_v55, %v5159_v9 }
 0x8a5   :  { %v1244_v13 = vadd.f32 %v1242_v10, %v5162_v12 }
 0x8a6   :  { %v1249_v14 = vsel %vm246_vm1, %v1245_v11, -inf }
 0x8a7   :  { %1250 = vmax.xlane.f32.xlu1 %v1249_v14  ;;  %v1246_v15 = vsel %vm246_vm1, %v1244_v13, -inf }
 0x8a8   :  { %1247 = vmax.xlane.f32.xlu0 %v1246_v15  ;;  %v772_v15 = vld [vmem:[%s5971_s14 + $0x10] sm:$0xff] }
 0x8b1   :  { %v4231_v16 = vpop.f32.mrb[10].mxu1 }
 0x8b2   :  { %v1682_v17 = vpop.f32.mrb[11].mxu1  ;;  %v1692_v18 = vmul.f32 0.35355338, %v4231_v16 }
 0x8b3   :  { %v1691_v19 = vmul.f32 0.35355338, %v1682_v17 }
 0x8b4   :  { %v1694_v22 = vadd.f32 %v1692_v18, %v5159_v9 }
 0x8b5   :  { %v1693_v20 = vadd.f32 %v1691_v19, %v5162_v12 }
 0x8b6   :  { %v1698_v23 = vsel %vm246_vm1, %v1694_v22, -inf }
 0x8b7   :  { %v1695_v21 = vsel %vm246_vm1, %v1693_v20, -inf }
 0x8b8   :  { %1696 = vmax.xlane.f32.xlu1 %v1695_v21 }
 0x8bc   :  { %1699 = vmax.xlane.f32.xlu1 %v1698_v23 }
 0x934   :  { %v1251_v24 = vpop.xlane.xlu1 %1250 }
 0x935   :  { %v1253_v25 = vsub.f32 %v1245_v11, %v1251_v24  ;;  %v1248_v26 = vpop.xlane.xlu0 %1247 }
 0x936   :  { %v1252_v27 = vsub.f32 %v1244_v13, %v1248_v26 }
 0x937   :  { %v1256_v28 = vmul.f32 1.442695, %v1253_v25 }
 0x938   :  { %v1254_v29 = vmul.f32 1.442695, %v1252_v27 }
 0x939   :  { %4732 = vpow2.f32 %v1256_v28 }
 0x93a   :  { %4734 = vpow2.f32 %v1254_v29 }
 0x943   :  { %v4733_v30 = vpop.eup %4732 }
 0x944   :  { %v1261_v31 = vsel %vm246_vm1, %v4733_v30, 0.0  ;;  %v4735_v32 = vpop.eup %4734 }
 0x945   :  { %v1697_v33 = vpop.xlane.xlu1 %1696  ;;  %1262 = vadd.xlane.f32.xlu0 %v1261_v31  ;;  %v1258_v35 = vsel %vm246_vm1, %v4735_v32, 0.0 }
 0x946   :  { %v1701_v34 = vsub.f32 %v1693_v20, %v1697_v33 }
 0x948   :  { %v1703_v39 = vmul.f32 1.442695, %v1701_v34 }
 0x949   :  { %v1700_v36 = vpop.xlane.xlu1 %1699  ;;  %1259 = vadd.xlane.f32.xlu0 %v1258_v35 }
 0x94a   :  { %v1702_v38 = vsub.f32 %v1694_v22, %v1700_v36 }
 0x94c   :  { %v1705_v40 = vmul.f32 1.442695, %v1702_v38 }
 0x94e   :  { %4736 = vpow2.f32 %v1705_v40 }
 0x94f   :  { %4738 = vpow2.f32 %v1703_v39  ;;  %v773_v39 = vld [vmem:[%s5971_s14 + $0x18] sm:$0xff] }
 0x958   :  { %v4737_v41 = vpop.eup %4736 }
 0x959   :  { %v1710_v42 = vsel %vm246_vm1, %v4737_v41, 0.0  ;;  %v4739_v43 = vpop.eup %4738 }
 0x95a   :  { %1711 = vadd.xlane.f32.xlu1 %v1710_v42  ;;  %v1707_v44 = vsel %vm246_vm1, %v4739_v43, 0.0 }
 0x95e   :  { %1708 = vadd.xlane.f32.xlu1 %v1707_v44 }
 0x95f   :  { %4688 = vrot.lane.b32.xlu0 %v5113_v37, %s4860_s29 }
 0x963   :  { %4698 = vrot.lane.b32.xlu0 %v5118_v51, %s4861_s8  ;;  %v771_v51 = vld [vmem:[%s5971_s14 + $0x8] sm:$0xff] }
 0x967   :  { %4703 = vrot.lane.b32.xlu0 %v5113_v37, %s4862_s19 }
 0x96b   :  { %1970 = vrot.lane.b32.xlu0 %v5066_v54, %s4862_s19 }
 0x96f   :  { %4693 = vrot.lane.b32.xlu1 %v5113_v37, %s4863_s24 }
 0x973   :  { %1972 = vrot.lane.b32.xlu1 %v5064_v53, %s4862_s19  ;;  %v770_v53 = vld [vmem:[%s5971_s14] sm:$0xff] }
 0x9d2   :  { %v1263_v45 = vpop.xlane.xlu0 %1262 }
 0x9d3   :  { %4740 = vrcp.f32 %v1263_v45 }
 0x9d6   :  { %v1260_v46 = vpop.xlane.xlu0 %1259 }
 0x9d7   :  { %4742 = vrcp.f32 %v1260_v46 }
 0x9da   :  { %v4689_v47 = vpop.permute.xlu0 %4688 }
 0x9db   :  { %v4691_v48 = vunpack.i.h.bf16 %v4689_v47  ;;  %v4690_v49 = vunpack.i.l.bf16 %v4689_v47 }
 0x9dd   :  { %v4465_v50 = vpack.c.bf16 %v4691_v48, %v4690_v49  ;;  %v4741_v52 = vpop.eup %4740 }
 0x9de   :  { %v1267_v58 = vmul.f32 %v4741_v52, %v4733_v30  ;;  %v4699_v11 = vpop.permute.xlu0 %4698 }
 0x9df   :  { %4466 = vmatprep.subr.bf16.mxu0 %v4465_v50  ;;  %v4701_v16 = vunpack.i.h.bf16 %v4699_v11  ;;  %v4700_v17 = vunpack.i.l.bf16 %v4699_v11 }
 0x9e0   :  { %4468 = vmatpush3.bf16.msra.mxu0 %v4465_v50 }
 0x9e1   :  { %v4743_v57 = vpop.eup %4742  ;;  %4208 = vmatprep.subr.mxu0 %v771_v51  ;;  %v4485_v19 = vpack.c.bf16 %v4701_v16, %v4700_v17  ;;  %v3902_v16 = vld [vmem:[%s5973_s12] ss:$0 sm:$0xff] }
 0x9e2   :  { %v1266_v54 = vmul.f32 %v4743_v57, %v4735_v32 }
 0x9e4   :  { %4205 = vmatprep.mubr.msk.f32.mxu0 %vm246_vm1, %v1266_v54 }
 0x9e5   :  { %4206 = vmatmul.mubr.msk.f32.vlgmr.msra.gmra.mrb[8].mxu0 %vm246_vm1, %v1267_v58 }
 0x9e6   :  { %4209 = vmatpush3.msra.mxu0 %v771_v51 }
 0x9e7   :  { %4213 = vmatprep.subr.mxu0 %v770_v53  ;;  %v1712_v59 = vpop.xlane.xlu1 %1711 }
 0x9eb   :  { %v1709_v60 = vpop.xlane.xlu1 %1708 }
 0x9ec   :  { %4744 = vrcp.f32 %v1709_v60 }
 0x9ed   :  { %4746 = vrcp.f32 %v1712_v59 }
 0x9ef   :  { %v4694_v61 = vpop.permute.xlu1 %4693 }
 0x9f0   :  { %v4696_v62 = vunpack.i.h.bf16 %v4694_v61  ;;  %v4695_v63 = vunpack.i.l.bf16 %v4694_v61  ;;  %v2284_v61 = vld [vmem:[%s5972_s6] sm:$0xff] }
 0x9f2   :  { %v4481_v8 = vpack.c.bf16 %v4696_v62, %v4695_v63  ;;  %v2285_v62 = vld [vmem:[%s5972_s6 + $0x8] sm:$0xff]  ;;  %v2286_v63 = vld [vmem:[%s5972_s6 + $0x10] sm:$0xff] }
 0x9f3   :  { %v1973_v25 = vpop.permute.xlu1 %1972 }
 0x9f6   :  { %v4745_v10 = vpop.eup %4744 }
 0x9f7   :  { %v4747_v13 = vpop.eup %4746  ;;  %v1715_v14 = vmul.f32 %v4745_v10, %v4739_v43 }
 0x9f8   :  { %v1716_v18 = vmul.f32 %v4747_v13, %v4737_v41 }
 0xab8   :  { %v4207_v4 = vpop.f32.mrb[8].mxu0 }
 0xab9   :  { %v1346_v55 = vpop.f32.mrb[9].mxu0 }
 0xaba   :  { %4210 = vmatprep.mubr.msk.f32.mxu0 %vm5952_vm4, %v1346_v55 }
 0xabb   :  { %4211 = vmatmul.mubr.msk.f32.vlgmr.msra.gmra.mrb[10].mxu0 %vm5952_vm4, %v4207_v4  ;;  %v2287_v4 = vld [vmem:[%s5972_s6 + $0x18] sm:$0xff] }
 0xabc   :  { %4214 = vmatpush3.msra.mxu0 %v770_v53  ;;  %4215 = vmatprep.mubr.msk.f32.mxu0 %vm5952_vm4, %v5216_v3  ;;  %v4704_v3 = vpop.permute.xlu0 %4703 }
 0xabd   :  { %4482 = vmatprep.subr.bf16.mxu0 %v4481_v8  ;;  %v4706_v20 = vunpack.i.h.bf16 %v4704_v3  ;;  %v4705_v21 = vunpack.i.l.bf16 %v4704_v3 }
 0xac0   :  { %v1971_v24 = vpop.permute.xlu0 %1970 }
 0xac3   :  { %4216 = vmatmul.mubr.msk.f32.vlgmr.msra.gmra.mrb[10].mxu0 %vm5952_vm4, %v5214_v2  ;;  %v4491_v2 = vpack.c.bf16 %v4706_v20, %v4705_v21  ;;  %v2394_v21 = vld [vmem:[%s5974_s15] sm:$0xff] }
 0xac4   :  { %4484 = vmatpush3.bf16.msra.mxu0 %v4481_v8  ;;  %4236 = vmatprep.mubr.msk.f32.mxu0 %vm246_vm1, %v1715_v14 }
 0xac5   :  { %4239 = vmatprep.subr.mxu0 %v772_v15 }
 0xac7   :  { %4237 = vmatmul.mubr.msk.f32.vlgmr.msra.gmra.mrb[12].mxu0 %vm246_vm1, %v1716_v18 }
 0xac8   :  { %4240 = vmatpush3.msra.mxu0 %v772_v15 }
 0xac9   :  { %4487 = vmatprep.subr.msk.bf16.mxu0 %vm5128_vm5, %v4485_v19 }
 0xb9a   :  { %v4238_v22 = vpop.f32.mrb[12].mxu0 }
 0xb9b   :  { %v1795_v23 = vpop.f32.mrb[13].mxu0 }
 0xb9c   :  { %4241 = vmatprep.mubr.msk.f32.mxu0 %vm5952_vm4, %v1795_v23 }
 0xb9d   :  { %4242 = vmatmul.mubr.msk.f32.vlgmr.msra.gmra.mrb[10].mxu0 %vm5952_vm4, %v4238_v22  ;;  %v2395_v22 = vld [vmem:[%s5974_s15 + $0x8] sm:$0xff] }
 0xb9e   :  { %4490 = vmatpush3.bf16.xpose.msk.msra.mxu0 %vm5128_vm5, %v4485_v19  ;;  %4248 = vmatprep.mubr.msk.f32.mxu0 %vm559_vm3, %v5144_v6  ;;  %v4509_v23 = vpack.c.bf16 %v2395_v22, %v2394_v21 }
 0xb9f   :  { %4493 = vmatprep.subr.msk.bf16.mxu0 %vm5134_vm6, %v4491_v2 }
 0xba5   :  { %4249 = vmatmul.mubr.msk.f32.vlgmr.msra.gmra.mrb[14].mxu0 %vm559_vm3, %v5146_v7 }
 0xba6   :  { %4496 = vmatpush3.bf16.xpose.msk.msra.mxu0 %vm5134_vm6, %v4491_v2  ;;  %4255 = vmatprep.mubr.msk.f32.mxu0 %vm5952_vm4, %v1971_v24  ;;  %v2396_v2 = vld [vmem:[%s5974_s15 + $0x10] sm:$0xff]  ;;  %v2397_v24 = vld [vmem:[%s5974_s15 + $0x18] sm:$0xff] }
 0xba7   :  { %4265 = vmatprep.subr.mxu0 %v773_v39 }
 0xbad   :  { %4256 = vmatmul.mubr.msk.f32.vlgmr.msra.gmra.mrb[14].mxu0 %vm5952_vm4, %v1973_v25  ;;  %v4513_v25 = vpack.c.bf16 %v2397_v24, %v2396_v2 }
 0xbae   :  { %4266 = vmatpush3.msra.mxu0 %v773_v39 }
 0xc80   :  { %v4257_v5 = vpop.f32.mrb[14].mxu0 }
 0xc81   :  { %v2062_v26 = vmul.f32 0.35355338, %v4257_v5  ;;  %v2052_v27 = vpop.f32.mrb[15].mxu0  ;;  %v3903_v5 = vld [vmem:[%s5975_s16] ss:$0 sm:$0xff] }
 0xc82   :  { %v2061_v28 = vmul.f32 0.35355338, %v2052_v27  ;;  %v3906_v27 = vld [vmem:[%s5976_s18] ss:$0 sm:$0xff] }
 0xc83   :  { %v2064_v6 = vadd.f32 %v2062_v26, %v5159_v9 }
 0xc84   :  { %v2063_v29 = vadd.f32 %v2061_v28, %v5162_v12 }
 0xc85   :  { %v2068_v30 = vsel %vm246_vm1, %v2064_v6, -inf }
 0xc86   :  { %2069 = vmax.xlane.f32.xlu1 %v2068_v30  ;;  %v2065_v7 = vsel %vm246_vm1, %v2063_v29, -inf }
 0xc87   :  { %2066 = vmax.xlane.f32.xlu0 %v2065_v7  ;;  %v3907_v7 = vld [vmem:[%s5977_s22] ss:$0 sm:$0xff] }
 0xd13   :  { %v2070_v56 = vpop.xlane.xlu1 %2069 }
 0xd14   :  { %v2072_v31 = vsub.f32 %v2064_v6, %v2070_v56  ;;  %v2067_v32 = vpop.xlane.xlu0 %2066 }
 0xd15   :  { %v2071_v33 = vsub.f32 %v2063_v29, %v2067_v32 }
 0xd16   :  { %v2075_v34 = vmul.f32 1.442695, %v2072_v31 }
 0xd17   :  { %v2073_v35 = vmul.f32 1.442695, %v2071_v33 }
 0xd18   :  { %4748 = vpow2.f32 %v2075_v34 }
 0xd19   :  { %4750 = vpow2.f32 %v2073_v35 }
 0xd22   :  { %v4749_v36 = vpop.eup %4748 }
 0xd23   :  { %v2080_v9 = vsel %vm246_vm1, %v4749_v36, 0.0  ;;  %v4751_v38 = vpop.eup %4750 }
 0xd24   :  { %2081 = vadd.xlane.f32.xlu0 %v2080_v9  ;;  %v2077_v12 = vsel %vm246_vm1, %v4751_v38, 0.0  ;;  %v2479_v9 = vlaneseq }
 0xd28   :  { %2078 = vadd.xlane.f32.xlu0 %v2077_v12 }
 0xd3e   :  { %4708 = vrot.lane.b32.xlu0 %v5113_v37, %s4864_s30 }
 0xdb1   :  { %v2082_v40 = vpop.xlane.xlu0 %2081 }
 0xdb2   :  { %4752 = vrcp.f32 %v2082_v40 }
 0xdb5   :  { %v2079_v41 = vpop.xlane.xlu0 %2078 }
 0xdb6   :  { %4754 = vrcp.f32 %v2079_v41 }
 0xdb9   :  { %v4709_v42 = vpop.permute.xlu0 %4708 }
 0xdba   :  { %v4711_v43 = vunpack.i.h.bf16 %v4709_v42  ;;  %v4710_v44 = vunpack.i.l.bf16 %v4709_v42 }
 0xdbc   :  { %v4497_v45 = vpack.c.bf16 %v4711_v43, %v4710_v44  ;;  %v4753_v46 = vpop.eup %4752 }
 0xdbd   :  { %v2086_v49 = vmul.f32 %v4753_v46, %v4749_v36 }
 0xdbe   :  { %4498 = vmatprep.subr.bf16.mxu1 %v4497_v45 }
 0xdbf   :  { %4500 = vmatpush3.bf16.msra.mxu1 %v4497_v45 }
 0xdc0   :  { %v4755_v47 = vpop.eup %4754 }
 0xdc1   :  { %v2085_v48 = vmul.f32 %v4755_v47, %v4751_v38  ;;  %v5316_v38 = vand.u32 127, %v2479_v9 }
 0xdc3   :  { %4262 = vmatprep.mubr.msk.f32.mxu1 %vm246_vm1, %v2085_v48  ;;  %v5319_v12 = vcvt.s32.f32 %v5316_v38 }
 0xdc4   :  { %4263 = vmatmul.mubr.msk.f32.vlgmr.msra.gmra.mrb[12].mxu1 %vm246_vm1, %v2086_v49 }
 0xe97   :  { %v4264_v37 = vpop.f32.mrb[12].mxu1 }
 0xe98   :  { %v2165_v50 = vpop.f32.mrb[13].mxu1 }
 0xe99   :  { %4267 = vmatprep.mubr.msk.f32.mxu0 %vm5952_vm4, %v2165_v50 }
 0xe9a   :  { %4268 = vmatmul.mubr.msk.f32.vlgmr.msra.gmra.mrb[10].mxu0 %vm5952_vm4, %v4264_v37 }
 0xf6d   :  { %v4269_v51 = vpop.f32.mrb[10].mxu0 }
 0xf6e   :  { %v2246_v52 = vpop.f32.mrb[11].mxu0  ;;  %v5279_v57 = vadd.f32 %v4269_v51, %v5034_v1  ;;  %v4501_v1 = vpack.c.bf16 %v2285_v62, %v2284_v61 }
 0xf6f   :  { %v5282_v54 = vadd.f32 %v2246_v52, %v5031_v0  ;;  %v4505_v0 = vpack.c.bf16 %v2287_v4, %v2286_v63 }
 0xf70   :  { %v2261_v59 = vmul.f32 %v5279_v57, %v5279_v57  ;;  %4502 = vmatprep.subr.bf16.mxu1 %v4501_v1 }
 0xf71   :  { %v2260_v58 = vmul.f32 %v5282_v54, %v5282_v54  ;;  %4504 = vmatpush3.bf16.msra.mxu1 %v4501_v1 }
 0xf72   :  { %v2265_v60 = vsel %vm134_vm0, %v2261_v59, 0.0  ;;  %4506 = vmatprep.subr.bf16.mxu1 %v4505_v0 }
 0xf73   :  { %v2262_v53 = vsel %vm134_vm0, %v2260_v58, 0.0 }
 0xf74   :  { %2263 = vadd.xlane.f32.xlu1 %v2262_v53 }
 0xf75   :  { %4508 = vmatpush3.bf16.msra.mxu1 %v4505_v0 }
 0xf76   :  { %4510 = vmatprep.subr.bf16.mxu1 %v4509_v23 }
 0xf78   :  { %2266 = vadd.xlane.f32.xlu1 %v2265_v60 }
0x1001   :  { %v2264_v55 = vpop.xlane.xlu1 %2263 }
0x1002   :  { %v2268_v8 = vmul.f32 0.03125, %v2264_v55 }
0x1004   :  { %v2270_v10 = vadd.f32 1e-05, %v2268_v8 }
0x1005   :  { %v2267_v11 = vpop.xlane.xlu1 %2266 }
0x1006   :  { %4756 = vrsqrt.f32 %v2270_v10  ;;  %v2269_v13 = vmul.f32 0.03125, %v2267_v11 }
0x1008   :  { %v2271_v14 = vadd.f32 1e-05, %v2269_v13 }
0x100a   :  { %4758 = vrsqrt.f32 %v2271_v14 }
0x1010   :  { %v4757_v15 = vpop.eup %4756 }
0x1011   :  { %v2274_v17 = vmul.f32 %v4757_v15, %v5282_v54 }
0x1013   :  { %v5296_v18 = vmul.f32 %v3902_v16, %v2274_v17 }
0x1014   :  { %v4759_v19 = vpop.eup %4758 }
0x1015   :  { %v2275_v3 = vmul.f32 %v4759_v19, %v5279_v57  ;;  %4278 = vmatprep.mubr.msk.f32.mxu1 %vm134_vm0, %v5296_v18 }
0x1017   :  { %v5301_v20 = vmul.f32 %v3902_v16, %v2275_v3 }
0x1019   :  { %4279 = vmatmul.mubr.msk.f32.vlgmr.msra.gmra.mrb[14].mxu1 %vm134_vm0, %v5301_v20 }
0x101a   :  { %4512 = vmatpush3.bf16.msra.mxu1 %v4509_v23 }
0x101b   :  { %4514 = vmatprep.subr.bf16.mxu1 %v4513_v25 }
0x101e   :  { %4516 = vmatpush3.bf16.msra.mxu1 %v4513_v25  ;;  %v4866_v25 = vmov 0.0  }
0x10ec   :  { %v4280_v26 = vpop.f32.mrb[14].mxu1 }
0x10ed   :  { %v2373_v28 = vadd.f32 %v4280_v26, %v3903_v5  ;;  %v2367_v6 = vpop.f32.mrb[15].mxu1 }
0x10ee   :  { %v2368_v29 = vadd.f32 %v3903_v5, %v2367_v6 }
0x10ef   :  { %v2384_v30 = vmul.f32 %v3906_v27, %v2373_v28 }
0x10f0   :  { %v2383_v56 = vmul.f32 %v3906_v27, %v2368_v29 }
0x10f1   :  { %v2393_v32 = vadd.f32 %v3907_v7, %v2384_v30 }
0x10f2   :  { %v2392_v31 = vadd.f32 %v3907_v7, %v2383_v56 }
0x10f4   :  { %4289 = vmatprep.mubr.msk.f32.mxu1 %vm134_vm0, %v2392_v31 }
0x10f5   :  { %4290 = vmatmul.mubr.msk.f32.vlgmr.msra.gmra.mrb[16].mxu1 %vm134_vm0, %v2393_v32 }
0x11c8   :  { %v4291_v33 = vpop.f32.mrb[16].mxu1 }
0x11c9   :  { %v2470_v34 = vpop.f32.mrb[17].mxu1  ;;  %v2506_v36 = vsel %vm2502_vm7, %v4291_v33, -inf  ;;  %v3032_v51 = vsel %vm3028_vm12, %v4291_v33, -inf }
0x11ca   :  { %v2503_v35 = vsel %vm2502_vm7, %v2470_v34, -inf  ;;  %v3029_v50 = vsel %vm3028_vm12, %v2470_v34, -inf }
0x11cb   :  { %2504 = vmax.xlane.f32.xlu1 %v2503_v35 }
0x11cf   :  { %2507 = vmax.xlane.f32.xlu1 %v2506_v36 }
0x1258   :  { %v5321_v39 = vpop.xlane.xlu1 %2504 }
0x1259   :  { %vm2509_vm8 = vcmp.ge.f32.partialorder %v2470_v34, %v5321_v39 }
0x125a   :  { %v2511_v40 = vsel %vm2509_vm8, %v5319_v12, 64.0 }
0x125b   :  { %v2513_v41 = vsel %vm2502_vm7, %v2511_v40, inf }
0x125c   :  { %2514 = vmin.xlane.f32.xlu1 %v2513_v41  ;;  %v5326_v42 = vpop.xlane.xlu1 %2507 }
0x125d   :  { %vm2510_vm9 = vcmp.ge.f32.partialorder %v4291_v33, %v5326_v42 }
0x125e   :  { %v2512_v43 = vsel %vm2510_vm9, %v5319_v12, 64.0 }
0x125f   :  { %v2516_v44 = vsel %vm2502_vm7, %v2512_v43, inf }
0x1260   :  { %2517 = vmin.xlane.f32.xlu1 %v2516_v44 }
0x12e9   :  { %v5331_v45 = vpop.xlane.xlu1 %2514 }
0x12ea   :  { %vm2519_vm10 = vcmp.eq.f32.partialorder %v5319_v12, %v5331_v45 }
0x12eb   :  { %v2565_v46 = vsel %vm2519_vm10, -1e+30, %v2470_v34 }
0x12ec   :  { %v2567_v47 = vsel %vm2502_vm7, %v2565_v46, -inf }
0x12ed   :  { %2568 = vmax.xlane.f32.xlu0 %v2567_v47  ;;  %v5339_v48 = vpop.xlane.xlu1 %2517 }
0x12ee   :  { %vm2520_vm11 = vcmp.eq.f32.partialorder %v5319_v12, %v5339_v48 }
0x12ef   :  { %v2566_v49 = vsel %vm2520_vm11, -1e+30, %v4291_v33  ;;  %v5495_v45 = vsel %vm2520_vm11, 1.0, %v4866_v25 }
0x12f0   :  { %v2570_v37 = vsel %vm2502_vm7, %v2566_v49, -inf }
0x12f1   :  { %2571 = vmax.xlane.f32.xlu1 %v2570_v37 }
0x12f5   :  { %3030 = vmax.xlane.f32.xlu1 %v3029_v50 }
0x12f9   :  { %3033 = vmax.xlane.f32.xlu1 %v3032_v51 }
0x130a   :  { %3038 = vrot.lane.b32.xlu1 %v5319_v12, %s4865_s23 }
0x137a   :  { %v2569_v61 = vpop.xlane.xlu0 %2568 }
0x137b   :  { %vm2573_vm14 = vcmp.ge.f32.partialorder %v2565_v46, %v2569_v61 }
0x137c   :  { %v2575_v4 = vsel %vm2573_vm14, %v5319_v12, 64.0  ;;  %vm2488_vm14 = vcmp.eq.s32.totalorder %v5316_v38, 2 }
0x137d   :  { %v2577_v0 = vsel %vm2502_vm7, %v2575_v4, inf  ;;  %v5407_v29 = vsel %vm2488_vm14, 1.0, %v4866_v25 }
0x137e   :  { %v5350_v52 = vpop.xlane.xlu1 %2571 }
0x137f   :  { %vm2574_vm13 = vcmp.ge.f32.partialorder %v2566_v49, %v5350_v52 }
0x1380   :  { %v2576_v58 = vsel %vm2574_vm13, %v5319_v12, 64.0  ;;  %vm2482_vm13 = vcmp.eq.s32.totalorder %v5316_v38, 0 }
0x1381   :  { %v2580_v53 = vsel %vm2502_vm7, %v2576_v58, inf  ;;  %v5400_v26 = vsel %vm2482_vm13, 1.0, %v4866_v25 }
0x1382   :  { %2581 = vmin.xlane.f32.xlu1 %v2580_v53  ;;  %v3031_v59 = vpop.xlane.xlu1 %3030  ;;  %v2525_v6 = vmul.f32 %v5400_v26, %v5321_v39 }
0x1383   :  { %vm3035_vm15 = vcmp.ge.f32.partialorder %v2470_v34, %v3031_v59  ;;  %v3055_v9 = vmul.f32 %v5400_v26, %v3031_v59 }
0x1386   :  { %v5355_v60 = vpop.xlane.xlu1 %3033 }
0x1387   :  { %vm3036_vm1 = vcmp.ge.f32.partialorder %v4291_v33, %v5355_v60 }
0x138a   :  { %v3039_v62 = vpop.permute.xlu1 %3038 }
0x138b   :  { %v3041_v63 = vsel %vm3035_vm15, %v3039_v62, 64.0  ;;  %v3042_v55 = vsel %vm3036_vm1, %v3039_v62, 64.0 }
0x138c   :  { %v3043_v1 = vsel %vm3028_vm12, %v3041_v63, inf  ;;  %v3046_v8 = vsel %vm3028_vm12, %v3042_v55, inf  ;;  %vm2485_vm12 = vcmp.eq.s32.totalorder %v5316_v38, 1 }
0x138d   :  { %3044 = vmin.xlane.f32.xlu0 %v3043_v1  ;;  %v5397_v5 = vsel %vm2485_vm12, 1.0, %v4866_v25 }
0x138e   :  { %v2589_v27 = vmul.f32 %v5397_v5, %v2569_v61  ;;  %v2590_v55 = vmul.f32 %v5397_v5, %v5350_v52 }
0x1390   :  { %v2591_v7 = vadd.f32 %v2589_v27, %v2525_v6  ;;  %v5478_v27 = vsel %vm2519_vm10, 1.0, %v4866_v25 }
0x1391   :  { %2578 = vmin.xlane.f32.xlu0 %v2577_v0 }
0x1395   :  { %3047 = vmin.xlane.f32.xlu0 %v3046_v8 }
0x13ab   :  { %3085 = vrot.lane.b32.xlu0 %v2470_v34, %s4865_s23 }
0x13af   :  { %3087 = vrot.lane.b32.xlu0 %v4291_v33, %s4865_s23 }
0x140f   :  { %v5362_v10 = vpop.xlane.xlu1 %2581 }
0x1410   :  { %vm2584_vm5 = vcmp.eq.f32.partialorder %v5319_v12, %v5362_v10 }
0x1411   :  { %v2618_v11 = vsel %vm2584_vm5, -1e+30, %v2566_v49 }
0x1412   :  { %v2622_v13 = vsel %vm2502_vm7, %v2618_v11, -inf }
0x1413   :  { %2623 = vmax.xlane.f32.xlu0 %v2622_v13 }
0x141a   :  { %v5370_v14 = vpop.xlane.xlu0 %3044 }
0x141b   :  { %vm3049_vm8 = vcmp.eq.f32.partialorder %v5319_v12, %v5370_v14 }
0x141e   :  { %v5372_v15 = vpop.xlane.xlu0 %2578 }
0x141f   :  { %vm2583_vm6 = vcmp.eq.f32.partialorder %v5319_v12, %v5372_v15 }
0x1420   :  { %v2617_v16 = vsel %vm2583_vm6, -1e+30, %v2565_v46 }
0x1421   :  { %v2619_v17 = vsel %vm2502_vm7, %v2617_v16, -inf }
0x1422   :  { %2620 = vmax.xlane.f32.xlu1 %v2619_v17  ;;  %v5380_v19 = vpop.xlane.xlu0 %3047 }
0x1423   :  { %vm3050_vm9 = vcmp.eq.f32.partialorder %v5319_v12, %v5380_v19 }
0x1426   :  { %v3086_v3 = vpop.permute.xlu0 %3085 }
0x1427   :  { %v3091_v21 = vsel %vm3049_vm8, -1e+30, %v3086_v3 }
0x1428   :  { %v3093_v22 = vsel %vm2502_vm7, %v3091_v21, -inf }
0x1429   :  { %3094 = vmax.xlane.f32.xlu1 %v3093_v22 }
0x142a   :  { %v3088_v23 = vpop.permute.xlu0 %3087 }
0x142b   :  { %v3092_v2 = vsel %vm3050_vm9, -1e+30, %v3088_v23 }
0x142c   :  { %v3096_v24 = vsel %vm2502_vm7, %v3092_v2, -inf }
0x142d   :  { %3097 = vmax.xlane.f32.xlu1 %v3096_v24 }
0x14a0   :  { %v2624_v28 = vpop.xlane.xlu0 %2623 }
0x14a1   :  { %vm2626_vm15 = vcmp.ge.f32.partialorder %v2618_v11, %v2624_v28  ;;  %v2642_v13 = vmul.f32 %v5407_v29, %v2624_v28  ;;  %v5481_v28 = vld [vmem:[%s5978_s26] ss:$0 sm:$0xff] }
0x14a2   :  { %v2628_v34 = vsel %vm2626_vm15, %v5319_v12, 64.0  ;;  %v2536_v15 = vmul.f32 %v5481_v28, %v5495_v45 }
0x14a3   :  { %v2632_v36 = vsel %vm2502_vm7, %v2628_v34, inf }
0x14af   :  { %v2621_v30 = vpop.xlane.xlu1 %2620 }
0x14b0   :  { %vm2625_vm1 = vcmp.ge.f32.partialorder %v2617_v16, %v2621_v30  ;;  %v2641_v56 = vmul.f32 %v5407_v29, %v2621_v30 }
0x14b1   :  { %v2627_v31 = vsel %vm2625_vm1, %v5319_v12, 64.0 }
0x14b2   :  { %v2643_v32 = vadd.f32 %v2641_v56, %v2591_v7  ;;  %v2629_v33 = vsel %vm2502_vm7, %v2627_v31, inf  ;;  %v2535_v56 = vmul.f32 %v5481_v28, %v5478_v27  ;;  %v5501_v31 = vsel %vm2583_vm6, 1.0, %v4866_v25 }
0x14b3   :  { %2630 = vmin.xlane.f32.xlu1 %v2629_v33  ;;  %v2593_v34 = vmul.f32 %v5501_v31, %v5481_v28 }
0x14b4   :  { %v2537_v48 = vsel %vm2502_vm7, %v2535_v56, 0.0 }
0x14b6   :  { %v3095_v35 = vpop.xlane.xlu1 %3094 }
0x14b7   :  { %vm3099_vm12 = vcmp.ge.f32.partialorder %v3091_v21, %v3095_v35  ;;  %v3115_v39 = vmul.f32 %v5397_v5, %v3095_v35  ;;  %2633 = vmin.xlane.f32.xlu1 %v2632_v36  ;;  %v5518_v36 = vsel %vm2584_vm5, 1.0, %v4866_v25 }
0x14b8   :  { %v3101_v40 = vsel %vm3099_vm12, %v5319_v12, 64.0 }
0x14b9   :  { %v5417_v41 = vadd.f32 %v3115_v39, %v3055_v9  ;;  %v3103_v43 = vsel %vm2502_vm7, %v3101_v40, inf  ;;  %v2594_v39 = vmul.f32 %v5518_v36, %v5481_v28  ;;  %v2595_v40 = vsel %vm2502_vm7, %v2593_v34, 0.0 }
0x14ba   :  { %v5420_v44 = vpop.xlane.xlu1 %3097 }
0x14bb   :  { %vm3100_vm13 = vcmp.ge.f32.partialorder %v3092_v2, %v5420_v44  ;;  %3104 = vmin.xlane.f32.xlu1 %v3103_v43  ;;  %v2540_v43 = vsel %vm2502_vm7, %v2536_v15, 0.0 }
0x14bc   :  { %v3102_v46 = vsel %vm3100_vm13, %v5319_v12, 64.0  ;;  %vm2491_vm13 = vcmp.eq.s32.totalorder %v5316_v38, 3 }
0x14bd   :  { %v3106_v47 = vsel %vm2502_vm7, %v3102_v46, inf  ;;  %v5457_v0 = vsel %vm2491_vm13, 1.0, %v4866_v25 }
0x14bf   :  { %3107 = vmin.xlane.f32.xlu1 %v3106_v47 }
0x1540   :  { %v2631_v49 = vpop.xlane.xlu1 %2630 }
0x1541   :  { %vm2635_vm14 = vcmp.eq.f32.partialorder %v5319_v12, %v2631_v49  ;;  %v2598_v49 = vsel %vm2502_vm7, %v2594_v39, 0.0 }
0x1542   :  { %v2669_v37 = vsel %vm2635_vm14, -1e+30, %v2617_v16  ;;  %v5523_v9 = vsel %vm2635_vm14, 1.0, %v4866_v25 }
0x1543   :  { %v2671_v50 = vsel %vm2502_vm7, %v2669_v37, -inf  ;;  %v2645_v46 = vmul.f32 %v5523_v9, %v5481_v28 }
0x1544   :  { %2672 = vmax.xlane.f32.xlu1 %v2671_v50  ;;  %v2634_v51 = vpop.xlane.xlu1 %2633 }
0x1545   :  { %vm2636_vm15 = vcmp.eq.f32.partialorder %v5319_v12, %v2634_v51 }
0x1546   :  { %v2670_v58 = vsel %vm2636_vm15, -1e+30, %v2618_v11  ;;  %v2526_v11 = vmul.f32 %v5400_v26, %v5326_v42  ;;  %v5534_v10 = vsel %vm2636_vm15, 1.0, %v4866_v25 }
0x1547   :  { %v2674_v53 = vsel %vm2502_vm7, %v2670_v58, -inf  ;;  %v2646_v47 = vmul.f32 %v5534_v10, %v5481_v28 }
0x1548   :  { %2675 = vmax.xlane.f32.xlu1 %v2674_v53  ;;  %v5433_v59 = vpop.xlane.xlu1 %3104  ;;  %v2592_v3 = vadd.f32 %v2590_v55, %v2526_v11 }
0x1549   :  { %vm3109_vm1 = vcmp.eq.f32.partialorder %v5319_v12, %v5433_v59  ;;  %v2650_v50 = vsel %vm2502_vm7, %v2646_v47, 0.0 }
0x154a   :  { %v5440_v61 = vsel %vm3109_vm1, -1e+30, %v3091_v21  ;;  %v2644_v52 = vadd.f32 %v2642_v13, %v2592_v3 }
0x154b   :  { %v3145_v62 = vsel %vm2502_vm7, %v5440_v61, -inf }
0x154c   :  { %3146 = vmax.xlane.f32.xlu0 %v3145_v62  ;;  %v5444_v63 = vpop.xlane.xlu1 %3107 }
0x154d   :  { %vm3110_vm12 = vcmp.eq.f32.partialorder %v5319_v12, %v5444_v63 }
0x154e   :  { %v5451_v1 = vsel %vm3110_vm12, -1e+30, %v3092_v2 }
0x154f   :  { %v3148_v4 = vsel %vm2502_vm7, %v5451_v1, -inf }
0x1550   :  { %3149 = vmax.xlane.f32.xlu1 %v3148_v4 }
0x15d1   :  { %v2673_v8 = vpop.xlane.xlu1 %2672 }
0x15d2   :  { %vm2677_vm4 = vcmp.ge.f32.partialorder %v2669_v37, %v2673_v8  ;;  %v2693_v16 = vmul.f32 %v5457_v0, %v2673_v8  ;;  %v2647_v37 = vsel %vm2502_vm7, %v2645_v46, 0.0 }
0x15d3   :  { %v2679_v17 = vsel %vm2677_vm4, %v5319_v12, 64.0 }
0x15d4   :  { %v2681_v38 = vsel %vm2502_vm7, %v2679_v17, inf  ;;  %v5467_v21 = vadd.f32 %v2693_v16, %v2643_v32  ;;  %v2496_v16 = vsel %vm134_vm0, %v5296_v18, 0.0 }
0x15d5   :  { %2682 = vmin.xlane.f32.xlu0 %v2681_v38  ;;  %v2676_v22 = vpop.xlane.xlu1 %2675  ;;  %v2499_v38 = vsel %vm134_vm0, %v5301_v20, 0.0 }
0x15d6   :  { %vm2678_vm13 = vcmp.ge.f32.partialorder %v2670_v58, %v2676_v22  ;;  %v2694_v23 = vmul.f32 %v5457_v0, %v2676_v22 }
0x15d7   :  { %v2680_v42 = vsel %vm2678_vm13, %v5319_v12, 64.0 }
0x15d8   :  { %v2684_v2 = vsel %vm2502_vm7, %v2680_v42, inf  ;;  %v5472_v24 = vadd.f32 %v2694_v23, %v2644_v52  ;;  %v5579_v42 = vld [vmem:[%s5980_s1] sm:$0xf] }
0x15d9   :  { %v5483_v6 = vpop.xlane.xlu0 %3146  ;;  %2685 = vmin.xlane.f32.xlu1 %v2684_v2  ;;  %4297 = vmatprep.subr.msk.mxu1 %vm564_vm2, %v5579_v42 }
0x15da   :  { %vm3151_vm4 = vcmp.ge.f32.partialorder %v5440_v61, %v5483_v6  ;;  %4298 = vmatpush3.msk.msra.mxu1 %vm564_vm2, %v5579_v42 }
0x15db   :  { %v3153_v30 = vsel %vm3151_vm4, %v5319_v12, 64.0 }
0x15dc   :  { %v3155_v7 = vsel %vm2502_vm7, %v3153_v30, inf }
0x15dd   :  { %3156 = vmin.xlane.f32.xlu0 %v3155_v7  ;;  %v5503_v32 = vpop.xlane.xlu1 %3149 }
0x15de   :  { %vm3152_vm10 = vcmp.ge.f32.partialorder %v5451_v1, %v5503_v32 }
0x15df   :  { %v3154_v33 = vsel %vm3152_vm10, %v5319_v12, 64.0 }
0x15e0   :  { %v3158_v35 = vsel %vm2502_vm7, %v3154_v33, inf }
0x15e1   :  { %2538 = vadd.xlane.f32.xlu0 %v2537_v48  ;;  %3159 = vmin.xlane.f32.xlu1 %v3158_v35 }
0x15e5   :  { %2596 = vadd.xlane.f32.xlu1 %v2595_v40  ;;  %2541 = vadd.xlane.f32.xlu0 %v2540_v43 }
0x15e9   :  { %2599 = vadd.xlane.f32.xlu1 %v2598_v49  ;;  %2648 = vadd.xlane.f32.xlu0 %v2647_v37 }
0x15ed   :  { %2651 = vadd.xlane.f32.xlu1 %v2650_v50 }
0x1662   :  { %v2683_v58 = vpop.xlane.xlu0 %2682 }
0x1663   :  { %vm2687_vm11 = vcmp.eq.f32.partialorder %v5319_v12, %v2683_v58 }
0x1664   :  { %v5543_v51 = vsel %vm2687_vm11, 1.0, %v4866_v25 }
0x1665   :  { %v2697_v53 = vmul.f32 %v5543_v51, %v5481_v28 }
0x1666   :  { %v2686_v62 = vpop.xlane.xlu1 %2685 }
0x1667   :  { %vm2688_vm5 = vcmp.eq.f32.partialorder %v5319_v12, %v2686_v62  ;;  %v2699_v4 = vsel %vm2502_vm7, %v2697_v53, 0.0 }
0x1668   :  { %v5550_v55 = vsel %vm2688_vm5, 1.0, %v4866_v25  ;;  %2700 = vadd.xlane.f32.xlu0 %v2699_v4 }
0x1669   :  { %v2698_v8 = vmul.f32 %v5550_v55, %v5481_v28 }
0x166a   :  { %v5554_v11 = vpop.xlane.xlu0 %3156 }
0x166b   :  { %vm3161_vm6 = vcmp.eq.f32.partialorder %v5319_v12, %v5554_v11  ;;  %v2702_v13 = vsel %vm2502_vm7, %v2698_v8, 0.0 }
0x166c   :  { %2703 = vadd.xlane.f32.xlu1 %v2702_v13  ;;  %2497 = vadd.xlane.f32.xlu0 %v2496_v16  ;;  %v3195_v17 = vsel %vm3161_vm6, -1e+30, %v5440_v61  ;;  %v2723_v61 = vld [vmem:[%s5979_s28] sm:$0xf]  ;;  %v5605_v16 = vsel %vm3049_vm8, 1.0, %v4866_v25 }
0x166d   :  { %v3197_v22 = vsel %vm2502_vm7, %v3195_v17, -inf  ;;  %4292 = vmatprep.subr.msk.mxu0 %vm564_vm2, %v2723_v61  ;;  %4337 = vmatprep.subr.msk.mxu1 %vm564_vm2, %v2723_v61  ;;  %v3059_v14 = vmul.f32 %v5605_v16, %v5481_v28 }
0x166e   :  { %v5565_v3 = vpop.xlane.xlu1 %3159  ;;  %4293 = vmatpush3.msk.msra.mxu0 %vm564_vm2, %v2723_v61 }
0x166f   :  { %vm3162_vm14 = vcmp.eq.f32.partialorder %v5319_v12, %v5565_v3  ;;  %v3061_v59 = vsel %vm2502_vm7, %v3059_v14, 0.0  ;;  %v2903_v3 = vld [vmem:[%s5981_s2] sm:$0xff]  ;;  %v2912_v14 = vld [vmem:[%s5981_s2 + $0x48] sm:$0xff] }
0x1670   :  { %v3196_v52 = vsel %vm3162_vm14, -1e+30, %v5451_v1  ;;  %2500 = vadd.xlane.f32.xlu1 %v2499_v38  ;;  %3198 = vmax.xlane.f32.xlu0 %v3197_v22  ;;  %v2539_v1 = vpop.xlane.xlu0 %2538  ;;  %v5666_v11 = vsel %vm3162_vm14, 1.0, %v4866_v25 }
0x1671   :  { %v3200_v23 = vsel %vm2502_vm7, %v3196_v52, -inf  ;;  %v2543_v34 = vmul.f32 %v5400_v26, %v2539_v1 }
0x1672   :  { %v2597_v2 = vpop.xlane.xlu1 %2596 }
0x1673   :  { %v2601_v33 = vmul.f32 %v5397_v5, %v2597_v2 }
0x1674   :  { %3201 = vmax.xlane.f32.xlu1 %v3200_v23  ;;  %v2542_v30 = vpop.xlane.xlu0 %2541 }
0x1675   :  { %v2603_v15 = vadd.f32 %v2601_v33, %v2543_v34  ;;  %v2544_v43 = vmul.f32 %v5400_v26, %v2542_v30  ;;  %v5623_v30 = vsel %vm3050_vm9, 1.0, %v4866_v25 }
0x1676   :  { %v2600_v7 = vpop.xlane.xlu1 %2599  ;;  %v3060_v34 = vmul.f32 %v5623_v30, %v5481_v28 }
0x1677   :  { %v2602_v39 = vmul.f32 %v5397_v5, %v2600_v7 }
0x1678   :  { %v2649_v56 = vpop.xlane.xlu0 %2648 }
0x1679   :  { %v2653_v48 = vmul.f32 %v5407_v29, %v2649_v56  ;;  %v2604_v37 = vadd.f32 %v2602_v39, %v2544_v43  ;;  %v3172_v39 = vmul.f32 %v5666_v11, %v5481_v28 }
0x167a   :  { %v2652_v35 = vpop.xlane.xlu1 %2651 }
0x167b   :  { %v2655_v46 = vadd.f32 %v2653_v48, %v2603_v15  ;;  %v2654_v47 = vmul.f32 %v5407_v29, %v2652_v35  ;;  %v3064_v15 = vsel %vm2502_vm7, %v3060_v34, 0.0  ;;  %v2915_v34 = vld [vmem:[%s5981_s2 + $0x60] sm:$0xff] }
0x167d   :  { %v2656_v62 = vadd.f32 %v2654_v47, %v2604_v37  ;;  %v2904_v47 = vld [vmem:[%s5981_s2 + $0x8] sm:$0xff]  ;;  %v2905_v37 = vld [vmem:[%s5981_s2 + $0x10] sm:$0xff] }
0x16f5   :  { %v2701_v40 = vpop.xlane.xlu0 %2700 }
0x16f6   :  { %v2705_v49 = vmul.f32 %v5457_v0, %v2701_v40 }
0x16f8   :  { %v2707_v50 = vadd.f32 %v2705_v49, %v2655_v46  ;;  %v3176_v46 = vsel %vm2502_vm7, %v3172_v39, 0.0  ;;  %v5675_v49 = vpack.c.bf16 %v2904_v47, %v2903_v3 }
0x16f9   :  { %v2704_v58 = vpop.xlane.xlu1 %2703  ;;  %v5595_v53 = vpop.xlane.xlu0 %2497 }
0x16fa   :  { %v2706_v4 = vmul.f32 %v5457_v0, %v2704_v58  ;;  %v2721_v8 = vmul.f32 %v2707_v50, %v5595_v53  ;;  %4518 = vmatprep.subr.bf16.mxu0 %v5675_v49  ;;  %v2906_v50 = vld [vmem:[%s5981_s2 + $0x18] sm:$0xff] }
0x16fb   :  { %v5681_v58 = vpack.c.bf16 %v2906_v50, %v2905_v37  ;;  %v3167_v37 = vmul.f32 %v5407_v29, %v5483_v6 }
0x16fc   :  { %v2708_v13 = vadd.f32 %v2706_v4, %v2656_v62  ;;  %4294 = vmatprep.mubr.msk.f32.mxu0 %vm559_vm3, %v2721_v8  ;;  %4299 = vmatprep.mubr.msk.f32.mxu1 %vm559_vm3, %v2721_v8  ;;  %v2907_v62 = vld [vmem:[%s5981_s2 + $0x20] sm:$0xff]  ;;  %v2908_v4 = vld [vmem:[%s5981_s2 + $0x28] sm:$0xff] }
0x16fd   :  { %v5607_v38 = vpop.xlane.xlu1 %2500  ;;  %v5609_v22 = vpop.xlane.xlu0 %3198  ;;  %v5687_v8 = vpack.c.bf16 %v2908_v4, %v2907_v62  ;;  %v3116_v62 = vmul.f32 %v5397_v5, %v5420_v44  ;;  %v3168_v44 = vmul.f32 %v5407_v29, %v5503_v32 }
0x16fe   :  { %v2722_v23 = vmul.f32 %v2708_v13, %v5607_v38  ;;  %vm3203_vm15 = vcmp.ge.f32.partialorder %v3195_v17, %v5609_v22  ;;  %v5629_v17 = vsel %vm3109_vm1, 1.0, %v4866_v25  ;;  %v2909_v13 = vld [vmem:[%s5981_s2 + $0x30] sm:$0xff] }
0x16ff   :  { %v3205_v1 = vsel %vm3203_vm15, %v5319_v12, 64.0  ;;  %v3119_v56 = vmul.f32 %v5629_v17, %v5481_v28 }
0x1700   :  { %4295 = vmatmul.mubr.msk.f32.vlgmr.msra.gmra.mrb[16].mxu0 %vm559_vm3, %v2722_v23  ;;  %4300 = vmatmul.mubr.msk.f32.vlgmr.msra.gmra.mrb[18].mxu1 %vm559_vm3, %v2722_v23  ;;  %v3207_v2 = vsel %vm2502_vm7, %v3205_v1, inf  ;;  %v2910_v23 = vld [vmem:[%s5981_s2 + $0x38] sm:$0xff] }
0x1701   :  { %v5631_v7 = vpop.xlane.xlu1 %3201  ;;  %3208 = vmin.xlane.f32.xlu0 %v3207_v2  ;;  %4338 = vmatpush3.msk.msra.mxu1 %vm564_vm2, %v2723_v61  ;;  %v5654_v61 = vsel %vm3161_vm6, 1.0, %v4866_v25  ;;  %v3121_v35 = vsel %vm2502_vm7, %v3119_v56, 0.0  ;;  %v5693_v1 = vpack.c.bf16 %v2910_v23, %v2909_v13  ;;  %v2911_v2 = vld [vmem:[%s5981_s2 + $0x40] sm:$0xff]  ;;  %v2913_v56 = vld [vmem:[%s5981_s2 + $0x50] sm:$0xff]  ;;  %v3219_v13 = vmul.f32 %v5457_v0, %v5609_v22 }
0x1702   :  { %vm3204_vm8 = vcmp.ge.f32.partialorder %v3196_v52, %v5631_v7  ;;  %4342 = vmatprep.subr.msk.mxu1 %vm564_vm2, %v5579_v42  ;;  %v5648_v52 = vsel %vm3110_vm12, 1.0, %v4866_v25  ;;  %v3171_v63 = vmul.f32 %v5654_v61, %v5481_v28  ;;  %4520 = vmatpush3.bf16.msra.mxu0 %v5675_v49 }
0x1703   :  { %v3206_v19 = vsel %vm3204_vm8, %v5319_v12, 64.0  ;;  %v3120_v48 = vmul.f32 %v5648_v52, %v5481_v28  ;;  %4522 = vmatprep.subr.bf16.mxu0 %v5681_v58 }
0x1704   :  { %v3210_v33 = vsel %vm2502_vm7, %v3206_v19, inf  ;;  %v3173_v43 = vsel %vm2502_vm7, %v3171_v63, 0.0  ;;  %v5699_v19 = vpack.c.bf16 %v2912_v14, %v2911_v2  ;;  %v2918_v63 = vld [vmem:[%s5981_s2 + $0x78] sm:$0xff]  ;;  %v3056_v2 = vmul.f32 %v5400_v26, %v5355_v60 }
0x1705   :  { %3211 = vmin.xlane.f32.xlu1 %v3210_v33  ;;  %3062 = vadd.xlane.f32.xlu0 %v3061_v59  ;;  %v3124_v40 = vsel %vm2502_vm7, %v3120_v48, 0.0  ;;  %v2914_v33 = vld [vmem:[%s5981_s2 + $0x58] sm:$0xff]  ;;  %v2916_v48 = vld [vmem:[%s5981_s2 + $0x68] sm:$0xff]  ;;  %v3169_v14 = vadd.f32 %v3167_v37, %v5417_v41  ;;  %v2994_v60 = vsel %vm559_vm3, %v5467_v21, -inf }
0x1706   :  { %4524 = vmatpush3.bf16.msra.mxu0 %v5681_v58  ;;  %v5705_v59 = vpack.c.bf16 %v2914_v33, %v2913_v56  ;;  %v3118_v22 = vadd.f32 %v3116_v62, %v3056_v2 }
0x1707   :  { %4526 = vmatprep.subr.bf16.mxu0 %v5687_v8 }
0x1708   :  { %v3170_v41 = vadd.f32 %v3168_v44, %v3118_v22 }
0x1709   :  { %3122 = vadd.xlane.f32.xlu1 %v3121_v35  ;;  %3065 = vadd.xlane.f32.xlu0 %v3064_v15  ;;  %v5711_v35 = vpack.c.bf16 %v2916_v48, %v2915_v34  ;;  %v2917_v15 = vld [vmem:[%s5981_s2 + $0x70] sm:$0xff]  ;;  %v5758_v34 = vld [vmem:[%s5982_s7] ss:$0 sm:$0xff] }
0x170a   :  { %4528 = vmatpush3.bf16.msra.mxu0 %v5687_v8  ;;  %v5717_v39 = vpack.c.bf16 %v2918_v63, %v2917_v15  ;;  %v2553_v32 = vmul.f32 %v5758_v34, %v5478_v27  ;;  %v2554_v15 = vmul.f32 %v5758_v34, %v5495_v45  ;;  %v2605_v63 = vmul.f32 %v5501_v31, %v5758_v34 }
0x170b   :  { %4530 = vmatprep.subr.bf16.mxu0 %v5693_v1  ;;  %v3072_v31 = vmul.f32 %v5623_v30, %v5758_v34  ;;  %v2658_v30 = vmul.f32 %v5534_v10, %v5758_v34 }
0x170c   :  { %v2555_v27 = vsel %vm2502_vm7, %v2553_v32, 0.0  ;;  %v2558_v37 = vsel %vm2502_vm7, %v2554_v15, 0.0  ;;  %v2607_v45 = vsel %vm2502_vm7, %v2605_v63, 0.0  ;;  %v3532_v63 = vld [vmem:[%s5013_s20 + $0x10] sm:$0xff] }
0x170d   :  { %3125 = vadd.xlane.f32.xlu1 %v3124_v40  ;;  %3174 = vadd.xlane.f32.xlu0 %v3173_v43  ;;  %v3530_v40 = vld [vmem:[%s5013_s20] sm:$0xff]  ;;  %v3531_v43 = vld [vmem:[%s5013_s20 + $0x8] sm:$0xff] }
0x170e   :  { %4532 = vmatpush3.bf16.msra.mxu0 %v5693_v1 }
0x170f   :  { %4534 = vmatprep.subr.bf16.mxu0 %v5699_v19 }
0x1711   :  { %3177 = vadd.xlane.f32.xlu1 %v3176_v46  ;;  %v5723_v46 = vpack.c.bf16 %v3531_v43, %v3530_v40  ;;  %v2606_v43 = vmul.f32 %v5518_v36, %v5758_v34  ;;  %v2657_v36 = vmul.f32 %v5523_v9, %v5758_v34  ;;  %v2662_v9 = vsel %vm2502_vm7, %v2658_v30, 0.0 }
0x1712   :  { %4536 = vmatpush3.bf16.msra.mxu0 %v5699_v19 }
0x1713   :  { %4538 = vmatprep.subr.bf16.mxu0 %v5705_v59  ;;  %v2610_v62 = vsel %vm2502_vm7, %v2606_v43, 0.0  ;;  %v2659_v2 = vsel %vm2502_vm7, %v2657_v36, 0.0 }
0x1716   :  { %4540 = vmatpush3.bf16.msra.mxu0 %v5705_v59 }
0x1717   :  { %4542 = vmatprep.subr.bf16.mxu0 %v5711_v35 }
0x171a   :  { %4544 = vmatpush3.bf16.msra.mxu0 %v5711_v35 }
0x171b   :  { %4546 = vmatprep.subr.bf16.mxu0 %v5717_v39 }
0x171e   :  { %4548 = vmatpush3.bf16.msra.mxu0 %v5717_v39 }
0x171f   :  { %4582 = vmatprep.subr.bf16.mxu0 %v5723_v46 }
0x178e   :  { %v3209_v3 = vpop.xlane.xlu0 %3208 }
0x178f   :  { %vm3213_vm9 = vcmp.eq.f32.partialorder %v5319_v12, %v3209_v3  ;;  %v3071_v3 = vmul.f32 %v5605_v16, %v5758_v34  ;;  %v3132_v16 = vmul.f32 %v5648_v52, %v5758_v34 }
0x1790   :  { %v5728_v47 = vsel %vm3213_vm9, 1.0, %v4866_v25 }
0x1791   :  { %v3223_v50 = vmul.f32 %v5728_v47, %v5481_v28 }
0x1792   :  { %v3212_v4 = vpop.xlane.xlu1 %3211 }
0x1793   :  { %vm3214_vm1 = vcmp.eq.f32.partialorder %v5319_v12, %v3212_v4  ;;  %v3225_v23 = vsel %vm2502_vm7, %v3223_v50, 0.0  ;;  %v3220_v12 = vmul.f32 %v5457_v0, %v5631_v7  ;;  %v3131_v50 = vmul.f32 %v5629_v17, %v5758_v34 }
0x1794   :  { %v5743_v6 = vsel %vm3214_vm1, 1.0, %v4866_v25  ;;  %3226 = vadd.xlane.f32.xlu0 %v3225_v23  ;;  %v5755_v25 = vadd.f32 %v3219_v13, %v3169_v14  ;;  %v3073_v4 = vsel %vm2502_vm7, %v3071_v3, 0.0  ;;  %v3076_v13 = vsel %vm2502_vm7, %v3072_v31, 0.0 }
0x1795   :  { %v3224_v56 = vmul.f32 %v5743_v6, %v5481_v28  ;;  %v2997_v28 = vsel %vm559_vm3, %v5472_v24, -inf  ;;  %v5766_v48 = vadd.f32 %v3220_v12, %v3170_v41  ;;  %v3133_v23 = vsel %vm2502_vm7, %v3131_v50, 0.0  ;;  %v3625_v50 = vld [vmem:[%s5018_s27 + $0x10] sm:$0xff] }
0x1796   :  { %v3496_v7 = vsel %vm559_vm3, %v5755_v25, -inf  ;;  %v3136_v17 = vsel %vm2502_vm7, %v3132_v16, 0.0  ;;  %v3123_v36 = vpop.xlane.xlu1 %3122 }
0x1797   :  { %v3228_v33 = vsel %vm2502_vm7, %v3224_v56, 0.0  ;;  %v3499_v40 = vsel %vm559_vm3, %v5766_v48, -inf  ;;  %v3127_v30 = vmul.f32 %v5397_v5, %v3123_v36 }
0x1798   :  { %3229 = vadd.xlane.f32.xlu1 %v3228_v33  ;;  %2995 = vmax.xlane.f32.xlu0 %v2994_v60 }
0x179c   :  { %2998 = vmax.xlane.f32.xlu1 %v2997_v28  ;;  %3497 = vmax.xlane.f32.xlu0 %v3496_v7 }
0x17a0   :  { %3500 = vmax.xlane.f32.xlu1 %v3499_v40  ;;  %2556 = vadd.xlane.f32.xlu0 %v2555_v27  ;;  %v3533_v40 = vld [vmem:[%s5013_s20 + $0x18] sm:$0xff]  ;;  %s4867_s20 = smov [#allocation2]  }
0x17a1   :  { %v4585_v3 = vpack.c.bf16 %v3533_v40, %v3532_v63 }
0x17a4   :  { %2559 = vadd.xlane.f32.xlu1 %v2558_v37  ;;  %2608 = vadd.xlane.f32.xlu0 %v2607_v45  ;;  %v3623_v37 = vld [vmem:[%s5018_s27] sm:$0xff]  ;;  %v3624_v45 = vld [vmem:[%s5018_s27 + $0x8] sm:$0xff] }
0x17a5   :  { %v4589_v31 = vpack.c.bf16 %v3624_v45, %v3623_v37 }
0x17a8   :  { %2611 = vadd.xlane.f32.xlu1 %v2610_v62  ;;  %3074 = vadd.xlane.f32.xlu0 %v3073_v4  ;;  %v3626_v62 = vld [vmem:[%s5018_s27 + $0x18] sm:$0xff]  ;;  %s3797_s27 = sshll.u32 %s4867_s20, 4  ;;  %s3798_s27 = int_to_ptr.vmem [resolvable:$true] %s3797_s27 }
0x17a9   :  { %v4593_v4 = vpack.c.bf16 %v3626_v62, %v3625_v50  ;;  %p4805_p1 = scmp.lt.s32.totalorder %s3798_s27, %s3798_s27 }
0x17ac   :  { %3077 = vadd.xlane.f32.xlu1 %v3076_v13  ;;  %3134 = vadd.xlane.f32.xlu0 %v3133_v23  ;;  %v3126_v13 = vpop.xlane.xlu1 %3125 }
0x17b0   :  { %3137 = vadd.xlane.f32.xlu1 %v3136_v17  ;;  %2660 = vadd.xlane.f32.xlu0 %v2659_v2 }
0x17b4   :  { %2663 = vadd.xlane.f32.xlu1 %v2662_v9  ;;  %v3178_v9 = vpop.xlane.xlu1 %3177 }
0x17d3   :  { %v4296_v14 = vpop.f32.mrb[16].mxu0  ;;  %v4301_v52 = vpop.f32.mrb[18].mxu1 }
0x17d4   :  { %v3928_v44 = vmul.f32 -1.442695, %v4296_v14  ;;  %v2799_v56 = vpop.f32.mrb[17].mxu0  ;;  %v2892_v22 = vpop.f32.mrb[19].mxu1 }
0x17d5   :  { %v3927_v12 = vmul.f32 -1.442695, %v2799_v56 }
0x17d6   :  { %4760 = vpow2.f32 %v3928_v44 }
0x17d7   :  { %4762 = vpow2.f32 %v3927_v12 }
0x17e0   :  { %v4761_v10 = vpop.eup %4760 }
0x17e1   :  { %v4763_v33 = vpop.eup %4762  ;;  %v2815_v60 = vadd.f32 1.0, %v4761_v10 }
0x17e2   :  { %v2814_v41 = vadd.f32 1.0, %v4763_v33 }
0x17e3   :  { %4764 = vrcp.f32 %v2815_v60 }
0x17e4   :  { %4766 = vrcp.f32 %v2814_v41 }
0x17ed   :  { %v4765_v32 = vpop.eup %4764 }
0x17ee   :  { %v4767_v28 = vpop.eup %4766  ;;  %v2821_v7 = vmul.f32 %v4765_v32, %v4296_v14 }
0x17ef   :  { %v2820_v15 = vmul.f32 %v4767_v28, %v2799_v56 }
0x17f0   :  { %v2902_v27 = vmul.f32 %v4301_v52, %v2821_v7 }
0x17f1   :  { %v2901_v43 = vmul.f32 %v2892_v22, %v2820_v15 }
0x17f3   :  { %4334 = vmatprep.mubr.f32.mxu0 %v2901_v43 }
0x17f4   :  { %4335 = vmatmul.mubr.f32.vlgmr.msra.gmra.mrb[18].mxu0 %v2902_v27 }
0x17f5   :  { %4584 = vmatpush3.bf16.msra.mxu0 %v5723_v46  ;;  %4390 = vmatprep.mubr.msk.f32.mxu0 %vm134_vm0, %v5296_v18  ;;  %v3063_v46 = vpop.xlane.xlu0 %3062 }
0x17f6   :  { %4586 = vmatprep.subr.bf16.mxu0 %v4585_v3  ;;  %v3067_v17 = vmul.f32 %v5400_v26, %v3063_v46 }
0x17f8   :  { %v3129_v14 = vadd.f32 %v3127_v30, %v3067_v17 }
0x17f9   :  { %4588 = vmatpush3.bf16.msra.mxu0 %v4585_v3  ;;  %v3066_v16 = vpop.xlane.xlu0 %3065 }
0x17fa   :  { %4590 = vmatprep.subr.bf16.mxu0 %v4589_v31  ;;  %v3068_v44 = vmul.f32 %v5400_v26, %v3066_v16 }
0x17fc   :  { %4391 = vmatmul.mubr.msk.f32.vlgmr.msra.gmra.mrb[20].mxu0 %vm134_vm0, %v5301_v20 }
0x17fd   :  { %4592 = vmatpush3.bf16.msra.mxu0 %v4589_v31  ;;  %4401 = vmatprep.mubr.msk.f32.mxu0 %vm134_vm0, %v5296_v18  ;;  %v3175_v23 = vpop.xlane.xlu0 %3174  ;;  %v3128_v18 = vmul.f32 %v5397_v5, %v3126_v13 }
0x17fe   :  { %4594 = vmatprep.subr.bf16.mxu0 %v4593_v4  ;;  %v3179_v2 = vmul.f32 %v5407_v29, %v3175_v23  ;;  %v3183_v23 = vmul.f32 %v5654_v61, %v5758_v34 }
0x17ff   :  { %v3130_v12 = vadd.f32 %v3128_v18, %v3068_v44  ;;  %v2709_v18 = vmul.f32 %v5543_v51, %v5758_v34  ;;  %v3235_v51 = vmul.f32 %v5728_v47, %v5758_v34  ;;  %v5896_v47 = vld [vmem:[%s5023_s4] sm:$0xff]  ;;  %s4800_s4 = scalar_lea.vmem %s3798_s27, 256 }
0x1800   :  { %v3181_v56 = vadd.f32 %v3179_v2, %v3129_v14  ;;  %p4801_p0 = scmp.ne.s32.totalorder %s3798_s27, %s4800_s4  ;;  %p4806_p2 = scmp.lt.s32.totalorder %s4800_s4, %s4800_s4 }
0x1801   :  { %4596 = vmatpush3.bf16.msra.mxu0 %v4593_v4 }
0x1802   :  { %p4807_p3 = por %p4806_p2, %p4805_p1 }
0x1804   :  { %4402 = vmatmul.mubr.msk.f32.vlgmr.msra.gmra.mrb[22].mxu0 %vm134_vm0, %v5301_v20  ;;  %v3180_v20 = vmul.f32 %v5407_v29, %v3178_v9  ;;  %p4808_p4 = pnand %p4807_p3, %p4801_p0 }
0x1806   :  { %v3182_v41 = vadd.f32 %v3180_v20, %v3130_v12  ;;  %v2710_v20 = vmul.f32 %v5550_v55, %v5758_v34  ;;  %v3236_v12 = vmul.f32 %v5743_v6, %v5758_v34  ;;  %v3237_v55 = vsel %vm2502_vm7, %v3235_v51, 0.0 }
0x1821   :  { %v3227_v52 = vpop.xlane.xlu0 %3226 }
0x1822   :  { %v3231_v22 = vmul.f32 %v5457_v0, %v3227_v52 }
0x1824   :  { %v3233_v10 = vadd.f32 %v3231_v22, %v3181_v56  ;;  %v3185_v56 = vsel %vm2502_vm7, %v3183_v23, 0.0 }
0x1825   :  { %v3230_v33 = vpop.xlane.xlu1 %3229  ;;  %v2996_v60 = vpop.xlane.xlu0 %2995 }
0x1826   :  { %v3247_v32 = vmul.f32 %v3233_v10, %v5595_v53  ;;  %v3232_v28 = vmul.f32 %v5457_v0, %v3230_v33  ;;  %v3000_v7 = vsub.f32 %v5467_v21, %v2996_v60  ;;  %v2714_v10 = vsel %vm2502_vm7, %v2710_v20, 0.0 }
0x1828   :  { %v3234_v15 = vadd.f32 %v3232_v28, %v3182_v41  ;;  %v3002_v63 = vmul.f32 1.442695, %v3000_v7  ;;  %4339 = vmatprep.mubr.msk.f32.mxu1 %vm559_vm3, %v3247_v32 }
0x1829   :  { %v2999_v40 = vpop.xlane.xlu1 %2998  ;;  %v3498_v27 = vpop.xlane.xlu0 %3497 }
0x182a   :  { %v3248_v43 = vmul.f32 %v3234_v15, %v5607_v38  ;;  %4768 = vpow2.f32 %v3002_v63  ;;  %v3001_v3 = vsub.f32 %v5472_v24, %v2999_v40  ;;  %v3502_v37 = vsub.f32 %v5755_v25, %v3498_v27 }
0x182c   :  { %v3004_v45 = vmul.f32 1.442695, %v3001_v3  ;;  %v3504_v31 = vmul.f32 1.442695, %v3502_v37  ;;  %4340 = vmatmul.mubr.msk.f32.vlgmr.msra.gmra.mrb[20].mxu1 %vm559_vm3, %v3248_v43 }
0x182d   :  { %v3501_v53 = vpop.xlane.xlu1 %3500  ;;  %4344 = vmatprep.mubr.msk.f32.mxu1 %vm559_vm3, %v3247_v32  ;;  %v5829_v21 = vpop.xlane.xlu0 %2556  ;;  %4343 = vmatpush3.msk.msra.mxu1 %vm564_vm2, %v5579_v42  ;;  %vm5983_vm2 = vcmask 64512  }
0x182e   :  { %4770 = vpow2.f32 %v3004_v45  ;;  %v3503_v38 = vsub.f32 %v5766_v48, %v3501_v53  ;;  %4550 = vmatprep.subr.bf16.mxu1 %v5675_v49  ;;  %v2561_v7 = vmul.f32 %v5400_v26, %v5829_v21 }
0x182f   :  { %4772 = vpow2.f32 %v3504_v31 }
0x1830   :  { %v3506_v24 = vmul.f32 1.442695, %v3503_v38  ;;  %4345 = vmatmul.mubr.msk.f32.vlgmr.msra.gmra.mrb[22].mxu1 %vm559_vm3, %v3248_v43 }
0x1831   :  { %v5836_v25 = vpop.xlane.xlu1 %2559  ;;  %v5838_v50 = vpop.xlane.xlu0 %2608  ;;  %4552 = vmatpush3.bf16.msra.mxu1 %v5675_v49 }
0x1832   :  { %4774 = vpow2.f32 %v3506_v24  ;;  %4554 = vmatprep.subr.bf16.mxu1 %v5681_v58  ;;  %v2562_v53 = vmul.f32 %v5400_v26, %v5836_v25 }
0x1834   :  { %v5842_v62 = vpop.eup %4768 }
0x1835   :  { %v5844_v42 = vpop.xlane.xlu1 %2611  ;;  %v3075_v48 = vpop.xlane.xlu0 %3074  ;;  %v3006_v4 = vsel %vm559_vm3, %v5842_v62, 0.0  ;;  %4556 = vmatpush3.bf16.msra.mxu1 %v5681_v58 }
0x1836   :  { %3007 = vadd.xlane.f32.xlu0 %v3006_v4  ;;  %4558 = vmatprep.subr.bf16.mxu1 %v5687_v8  ;;  %v3079_v30 = vmul.f32 %v5400_v26, %v3075_v48  ;;  %v2614_v27 = vmul.f32 %v5397_v5, %v5844_v42 }
0x1838   :  { %v5850_v46 = vpop.eup %4770 }
0x1839   :  { %v5852_v36 = vpop.eup %4772  ;;  %v3078_v49 = vpop.xlane.xlu1 %3077  ;;  %v3009_v13 = vsel %vm559_vm3, %v5850_v46, 0.0  ;;  %4560 = vmatpush3.bf16.msra.mxu1 %v5687_v8  ;;  %v3184_v8 = vmul.f32 %v5666_v11, %v5758_v34 }
0x183a   :  { %v3135_v16 = vpop.xlane.xlu0 %3134  ;;  %3010 = vadd.xlane.f32.xlu1 %v3009_v13  ;;  %v3508_v17 = vsel %vm559_vm3, %v5852_v36, 0.0  ;;  %4562 = vmatprep.subr.bf16.mxu1 %v5693_v1  ;;  %v3080_v52 = vmul.f32 %v5400_v26, %v3078_v49 }
0x183b   :  { %v3139_v58 = vmul.f32 %v5397_v5, %v3135_v16  ;;  %3509 = vadd.xlane.f32.xlu0 %v3508_v17  ;;  %v3188_v22 = vsel %vm2502_vm7, %v3184_v8, 0.0  ;;  %v2616_v16 = vadd.f32 %v2614_v27, %v2562_v53 }
0x183c   :  { %v5864_v2 = vpop.eup %4774 }
0x183d   :  { %v3141_v9 = vadd.f32 %v3139_v58, %v3079_v30  ;;  %v3138_v14 = vpop.xlane.xlu1 %3137  ;;  %v3511_v61 = vsel %vm559_vm3, %v5864_v2, 0.0  ;;  %4564 = vmatpush3.bf16.msra.mxu1 %v5693_v1  ;;  %v2711_v1 = vsel %vm2502_vm7, %v2709_v18, 0.0 }
0x183e   :  { %v3140_v44 = vmul.f32 %v5397_v5, %v3138_v14  ;;  %3512 = vadd.xlane.f32.xlu1 %v3511_v61  ;;  %4566 = vmatprep.subr.bf16.mxu1 %v5699_v19 }
0x183f   :  { %3186 = vadd.xlane.f32.xlu0 %v3185_v56 }
0x1840   :  { %v3142_v11 = vadd.f32 %v3140_v44, %v3080_v52 }
0x1841   :  { %4568 = vmatpush3.bf16.msra.mxu1 %v5699_v19  ;;  %v3240_v19 = vsel %vm2502_vm7, %v3236_v12, 0.0  ;;  %v2664_v6 = vpop.xlane.xlu1 %2663  ;;  %vm5984_vm7 = vmmov %vm5983_vm2 }
0x1842   :  { %3189 = vadd.xlane.f32.xlu1 %v3188_v22  ;;  %4570 = vmatprep.subr.bf16.mxu1 %v5705_v59  ;;  %v2666_v21 = vmul.f32 %v5407_v29, %v2664_v6 }
0x1843   :  { %2712 = vadd.xlane.f32.xlu0 %v2711_v1 }
0x1844   :  { %v2668_v30 = vadd.f32 %v2666_v21, %v2616_v16 }
0x1845   :  { %4572 = vmatpush3.bf16.msra.mxu1 %v5705_v59  ;;  %v2661_v59 = vpop.xlane.xlu0 %2660 }
0x1846   :  { %2715 = vadd.xlane.f32.xlu1 %v2714_v10  ;;  %4574 = vmatprep.subr.bf16.mxu1 %v5711_v35  ;;  %v2665_v15 = vmul.f32 %v5407_v29, %v2661_v59 }
0x1847   :  { %3238 = vadd.xlane.f32.xlu0 %v3237_v55 }
0x1849   :  { %4576 = vmatpush3.bf16.msra.mxu1 %v5711_v35  ;;  %v2613_v35 = vmul.f32 %v5397_v5, %v5838_v50 }
0x184a   :  { %3241 = vadd.xlane.f32.xlu1 %v3240_v19  ;;  %4578 = vmatprep.subr.bf16.mxu1 %v5717_v39 }
0x184b   :  { %v2615_v43 = vadd.f32 %v2613_v35, %v2561_v7 }
0x184d   :  { %4580 = vmatpush3.bf16.msra.mxu1 %v5717_v39  ;;  %v2667_v4 = vadd.f32 %v2665_v15, %v2615_v43 }
0x184e   :  { %4404 = vmatprep.subr.mxu1 %v5896_v47 }
0x18c3   :  { %v3008_v34 = vpop.xlane.xlu0 %3007 }
0x18c4   :  { %4776 = vrcp.f32 %v3008_v34 }
0x18c7   :  { %v3011_v33 = vpop.xlane.xlu1 %3010  ;;  %v4336_v60 = vpop.f32.mrb[18].mxu0 }
0x18c8   :  { %4778 = vrcp.f32 %v3011_v33  ;;  %v5899_v41 = vpop.xlane.xlu0 %3509  ;;  %v2985_v32 = vpop.f32.mrb[19].mxu0 }
0x18cb   :  { %v5903_v28 = vpop.xlane.xlu1 %3512 }
0x18cc   :  { %v3187_v39 = vpop.xlane.xlu0 %3186 }
0x18cd   :  { %v3191_v63 = vmul.f32 %v5407_v29, %v3187_v39 }
0x18ce   :  { %v4777_v40 = vpop.eup %4776 }
0x18cf   :  { %v3014_v3 = vmul.f32 %v4777_v40, %v5842_v62  ;;  %v5912_v37 = vadd.f32 %v3191_v63, %v3141_v9  ;;  %v4392_v45 = vpop.f32.mrb[20].mxu0  ;;  %v3190_v31 = vpop.xlane.xlu1 %3189 }
0x18d0   :  { %v3951_v38 = vmul.f32 -1.442695, %v4392_v45  ;;  %v3192_v24 = vmul.f32 %v5407_v29, %v3190_v31  ;;  %v3600_v50 = vpop.f32.mrb[21].mxu0  ;;  %v2713_v48 = vpop.xlane.xlu0 %2712 }
0x18d1   :  { %v3016_v49 = vmul.f32 %v3014_v3, %v2985_v32  ;;  %v3950_v5 = vmul.f32 -1.442695, %v3600_v50  ;;  %v2717_v42 = vmul.f32 %v5457_v0, %v2713_v48 }
0x18d2   :  { %v4779_v62 = vpop.eup %4778  ;;  %4780 = vpow2.f32 %v3951_v38  ;;  %v5919_v13 = vadd.f32 %v3192_v24, %v3142_v11 }
0x18d3   :  { %v3015_v23 = vmul.f32 %v4779_v62, %v5850_v46  ;;  %4782 = vpow2.f32 %v3950_v5  ;;  %v2719_v26 = vadd.f32 %v2717_v42, %v2667_v4  ;;  %v2716_v25 = vpop.xlane.xlu1 %2715 }
0x18d4   :  { %v2718_v29 = vmul.f32 %v5457_v0, %v2716_v25 }
0x18d5   :  { %v3017_v58 = vmul.f32 %v4336_v60, %v3015_v23  ;;  %v3018_v17 = vmul.f32 %v3016_v49, %v2719_v26 }
0x18d6   :  { %v2720_v9 = vadd.f32 %v2718_v29, %v2668_v30 }
0x18d7   :  { %v4403_v8 = vpop.f32.mrb[22].mxu0  ;;  %v3020_v14 = vsel %vm559_vm3, %v3018_v17, 0.0  ;;  %v3242_v3 = vpop.xlane.xlu1 %3241 }
0x18d8   :  { %v3693_v61 = vpop.f32.mrb[23].mxu0  ;;  %3021 = vadd.xlane.f32.xlu0 %v3020_v14  ;;  %v3019_v18 = vmul.f32 %v3017_v58, %v2720_v9  ;;  %v3244_v21 = vmul.f32 %v5457_v0, %v3242_v3 }
0x18da   :  { %v3023_v52 = vsel %vm559_vm3, %v3019_v18, 0.0 }
0x18db   :  { %3024 = vadd.xlane.f32.xlu1 %v3023_v52 }
0x18dc   :  { %v4781_v44 = vpop.eup %4780 }
0x18dd   :  { %v4783_v46 = vpop.eup %4782  ;;  %v3616_v56 = vadd.f32 1.0, %v4781_v44 }
0x18de   :  { %v3615_v11 = vadd.f32 1.0, %v4783_v46 }
0x18df   :  { %4784 = vrcp.f32 %v3616_v56 }
0x18e0   :  { %4786 = vrcp.f32 %v3615_v11 }
0x18e9   :  { %v4785_v20 = vpop.eup %4784 }
0x18ea   :  { %v4787_v22 = vpop.eup %4786  ;;  %v3622_v51 = vmul.f32 %v4785_v20, %v4392_v45  ;;  %v3239_v45 = vpop.xlane.xlu0 %3238 }
0x18eb   :  { %v3621_v1 = vmul.f32 %v4787_v22, %v3600_v50  ;;  %v3243_v38 = vmul.f32 %v5457_v0, %v3239_v45 }
0x18ec   :  { %v3703_v12 = vmul.f32 %v4403_v8, %v3622_v51 }
0x18ed   :  { %v3702_v10 = vmul.f32 %v3693_v61, %v3621_v1 }
0x18ff   :  { %v4341_v55 = vpop.f32.mrb[20].mxu1 }
0x1900   :  { %v3944_v19 = vmul.f32 -1.442695, %v4341_v55  ;;  %v3321_v59 = vpop.f32.mrb[21].mxu1 }
0x1901   :  { %v3943_v6 = vmul.f32 -1.442695, %v3321_v59 }
0x1902   :  { %4788 = vpow2.f32 %v3944_v19 }
0x1903   :  { %4790 = vpow2.f32 %v3943_v6  ;;  %v4346_v34 = vpop.f32.mrb[22].mxu1 }
0x1904   :  { %v3410_v33 = vpop.f32.mrb[23].mxu1 }
0x190c   :  { %v4789_v60 = vpop.eup %4788 }
0x190d   :  { %v4791_v32 = vpop.eup %4790  ;;  %v3337_v35 = vadd.f32 1.0, %v4789_v60 }
0x190e   :  { %v3336_v39 = vadd.f32 1.0, %v4791_v32 }
0x190f   :  { %4792 = vrcp.f32 %v3337_v35 }
0x1910   :  { %4794 = vrcp.f32 %v3336_v39 }
0x1911   :  { %4796 = vrcp.f32 %v5903_v28  ;;  %v3245_v28 = vadd.f32 %v3243_v38, %v5912_v37 }
0x1912   :  { %4798 = vrcp.f32 %v5899_v41 }
0x1919   :  { %v4793_v7 = vpop.eup %4792 }
0x191a   :  { %v4795_v15 = vpop.eup %4794  ;;  %v3343_v63 = vmul.f32 %v4793_v7, %v4341_v55 }
0x191b   :  { %v3342_v40 = vmul.f32 %v4795_v15, %v3321_v59  ;;  %v4797_v31 = vpop.eup %4796 }
0x191c   :  { %v3420_v27 = vmul.f32 %v4346_v34, %v3343_v63  ;;  %v4799_v53 = vpop.eup %4798  ;;  %v3517_v24 = vmul.f32 %v4797_v31, %v5864_v2 }
0x191d   :  { %v3419_v43 = vmul.f32 %v3410_v33, %v3342_v40  ;;  %v3516_v48 = vmul.f32 %v4799_v53, %v5852_v36 }
0x191f   :  { %4379 = vmatprep.mubr.f32.mxu1 %v3419_v43 }
0x1920   :  { %4380 = vmatmul.mubr.f32.vlgmr.msra.gmra.mrb[24].mxu1 %v3420_v27 }
0x1921   :  { %4406 = vmatprep.mubr.msk.f32.mxu1 %vm5983_vm2, %v3702_v10  ;;  %4405 = vmatpush3.msra.mxu1 %v5896_v47  ;;  %v3246_v47 = vadd.f32 %v3244_v21, %v5919_v13 }
0x1924   :  { %4407 = vmatmul.mubr.msk.f32.vlgmr.msra.gmra.mrb[26].mxu1 %vm5984_vm7, %v3703_v12 }
0x1965   :  { %v3022_v26 = vpop.xlane.xlu0 %3021 }
0x1968   :  { %v3025_v2 = vpop.xlane.xlu1 %3024 }
0x19f3   :  { %v4381_v50 = vpop.f32.mrb[24].mxu1 }
0x19f4   :  { %v3519_v4 = vmul.f32 %v4381_v50, %v3517_v24  ;;  %v3487_v49 = vpop.f32.mrb[25].mxu1 }
0x19f5   :  { %v3518_v41 = vmul.f32 %v3516_v48, %v3487_v49 }
0x19f6   :  { %v3521_v5 = vmul.f32 %v3519_v4, %v3246_v47 }
0x19f7   :  { %v3520_v42 = vmul.f32 %v3518_v41, %v3245_v28  ;;  %v4408_v62 = vpop.f32.mrb[26].mxu1 }
0x19f8   :  { %v3777_v16 = vpop.f32.mrb[27].mxu1  ;;  %v3525_v23 = vsel %vm559_vm3, %v3521_v5, 0.0 }
0x19f9   :  { %3526 = vadd.xlane.f32.xlu1 %v3525_v23  ;;  %v3522_v0 = vsel %vm559_vm3, %v3520_v42, 0.0 }
0x19fa   :  { %3523 = vadd.xlane.f32.xlu0 %v3522_v0 }
0x1a86   :  { %v3527_v36 = vpop.xlane.xlu1 %3526 }
0x1a87   :  { %v3529_v25 = vadd.f32 %v3527_v36, %v3025_v2  ;;  %v3524_v13 = vpop.xlane.xlu0 %3523 }
0x1a88   :  { %v3528_v30 = vadd.f32 %v3524_v13, %v3022_v26 }
0x1a89   :  { %v3787_v29 = vadd.f32 %v3529_v25, %v5279_v57 }
0x1a8a   :  { %v3786_v37 = vadd.f32 %v3528_v30, %v5282_v54 }
0x1a8b   :  { %v3789_v58 = vadd.f32 %v4408_v62, %v3787_v29 }
0x1a8c   :  { %v3788_v17 = vadd.f32 %v3786_v37, %v3777_v16 }
0x1a8d   :  { %3791 = vst.msk [vmem:[#allocation2 + $0x8] sm:$0xff] %vm134_vm0, %v3789_v58 }
0x1a8e   :  { %3790 = vst.msk [vmem:[#allocation2] sm:$0xff] %vm134_vm0, %v3788_v17 }
0x1a8f   :  { %4811 = shalt.err (!%p4808_p4)
}
0x1a90   :  { %s4812_s10 = scalar_lea.hbm %s5028_s9, 256 }
0x1a91   :  { %p4813_p5 = scmp.ne.s32.totalorder %s5028_s9, %s4812_s10  ;;  %p4816_p6 = scmp.lt.u32.totalorder %s4812_s10, %s5028_s9 }
0x1a93   :  { %p4818_p7 = pnand %p4816_p6, %p4813_p5 }
0x1a95   :  { %4821 = shalt.err (!%p4818_p7)
}
0x1a96   :  { %s4868_s11 = smov 128   ;;  %s4869_s0 = smov 8  }
0x1a97   :  { %3803 = dma.vmem_to_hbm [thread:$0]  %s3798_s27, 256, %s5028_s9, [#allocation3], %s4868_s11, %s4868_s11, %s4869_s0  }
0x1a98   :  { %4822 = dma.done.wait [#allocation3], 256  }
0x1a99   :  { %4823 = vsyncadd [#allocation3], 4294967040 }
0x1a9a   :  { %3807 = vsyncpa [#allocation3], 1 }

</bundles_post_ra>
